<compile_context>
chip_gen: v7x
topology: tpu7x:2x2x1
jax: 0.10.0
libtpu: 0.0.40
codegen_flags: <defaults>
</compile_context>

<pallas_src>
import functools
import math
import numpy as np
import jax
import jax.numpy as jnp
from jax import lax
from jax.experimental import pallas as pl
from jax.experimental.pallas import tpu as pltpu


# ----------------------------------------------------------------------------
# Fused Pallas kernel
# ----------------------------------------------------------------------------

def _fused_kernel(xh_ref, a_ift_ref, a_ft_ref, o_ref, blur_ref, *, pool_k, taps):
    # xh_ref:    (1, W, H, D, BCh*F_in)   f32   (Fourier coeffs, field axis last)
    # a_ift_ref: (BCh*F_in, BCh*G)        bf16  (block-diag IFT basis)
    # a_ft_ref:  (BCh*G, BCh*F_out)       bf16  (block-diag FT basis)
    # o_ref:     (1, W2, W2, W2, BCh*F_out) f32
    # blur_ref:  (W2, W2, W2, BCh*G)      f32   VMEM scratch
    _, W, H, D, Nf_in = xh_ref.shape
    Nb = a_ift_ref.shape[1]
    W2 = len(taps)
    S = W * H * D

    # ---- 1. inverse Fourier transform: one MXU matmul ----------------------
    # x[s, bc*G + g] = sum_f x_hat[s, bc*F_in + f] * A_ift[g, f]  (block-diag rhs)
    xh = xh_ref[0].reshape(S, Nf_in).astype(a_ift_ref.dtype)
    x = jnp.dot(xh, a_ift_ref[...], preferred_element_type=jnp.float32)
    x = x.reshape(W, H, D, Nb)

    # ---- 2. ExtremePool3D(kernel_size=k, stride=1) --------------------------
    k = pool_k
    Wo, Ho, Do = W - k + 1, H - k + 1, D - k + 1
    ax = jnp.abs(x)                              # hoisted: |x| computed once
    items = []
    for i in range(k):
        for j in range(k):
            for l in range(k):
                v = lax.slice(x, (i, j, l, 0), (i + Wo, j + Ho, l + Do, Nb))
                a = lax.slice(ax, (i, j, l, 0), (i + Wo, j + Ho, l + Do, Nb))
                items.append((v, a))
    # pairwise tree reduction; ties keep the earliest tap, matching the
    # argmax / max_pool3d(return_indices=True) tie-breaking of the module.
    while len(items) > 1:
        nxt = []
        for p in range(0, len(items) - 1, 2):
            v0, a0 = items[p]
            v1, a1 = items[p + 1]
            take1 = a1 > a0
            nxt.append((jnp.where(take1, v1, v0), jnp.maximum(a0, a1)))
        if len(items) % 2:
            nxt.append(items[-1])
        items = nxt
    y = items[0][0]                              # (Wo, Ho, Do, Nb) f32

    # ---- 3. Gaussian blur: separable; zero padding, stride and edge
    #         correction folded into per-output-position tap weights ---------
    def blur_major(v, axis):
        pieces = []
        for tap_list in taps:
            acc = None
            for idx, wgt in tap_list:
                starts = [0] * v.ndim
                limits = list(v.shape)
                starts[axis] = idx
                limits[axis] = idx + 1
                term = wgt * lax.slice(v, tuple(starts), tuple(limits))
                acc = term if acc is None else acc + term
            pieces.append(acc)
        return jnp.concatenate(pieces, axis=axis)

    yb = blur_major(y, 0)                        # (W2, Ho, Do, Nb)
    yb = blur_major(yb, 1)                       # (W2, W2, Do, Nb)
    # last spatial axis lives in the sublane dim: assemble the strided outputs
    # through a small VMEM scratch (static-offset slice stores).
    for o, tap_list in enumerate(taps):
        acc = None
        for idx, wgt in tap_list:
            term = wgt * lax.slice(yb, (0, 0, idx, 0), (W2, W2, idx + 1, Nb))
            acc = term if acc is None else acc + term
        blur_ref[:, :, o:o + 1, :] = acc
    yb = blur_ref[...]                           # (W2, W2, W2, Nb)

    # ---- 4. Fourier transform back: one MXU matmul --------------------------
    yf = yb.reshape(W2 * W2 * W2, Nb).astype(a_ft_ref.dtype)
    out = jnp.dot(yf, a_ft_ref[...], preferred_element_type=jnp.float32)
    o_ref[0] = out.reshape(W2, W2, W2, -1).astype(o_ref.dtype)


# ----------------------------------------------------------------------------
# Wrapper (layout glue only; all compute happens in the single pallas_call)
# ----------------------------------------------------------------------------

def fourier_extreme_pool3d(x_hat, A_ift, A_ft, *, pool_k, stride, w1_np,
                           matmul_dtype=jnp.bfloat16):
    """x_hat: (B, C*F_in, W, H, D) -> (B, C*F_out, W2, W2, W2)."""
    B, CF, W, H, D = x_hat.shape
    G, F_in = A_ift.shape
    F_out = A_ft.shape[0]
    C = CF // F_in
    assert W == H == D
    assert (W - pool_k) % stride == 0            # check_input_shape=True semantics

    kb = int(w1_np.shape[0])
    P = kb // 2
    Wo = W - pool_k + 1
    W2 = (W - pool_k) // stride + 1

    # Host-side per-output-position blur taps: zero 'same' padding handled by
    # dropping out-of-range taps, stride by evaluating only strided positions,
    # edge correction by dividing the weights by the in-range kernel mass
    # (sampled at the strided positions, per the review's correctness note).
    taps = []
    for o in range(W2):
        lo = max(0, P - o * stride)
        hi = min(kb, Wo + P - o * stride)
        den = float(np.sum(w1_np[lo:hi]))
        taps.append(tuple((o * stride + l - P, float(w1_np[l]) / den)
                          for l in range(lo, hi)))
    taps = tuple(taps)

    BC = B * C
    NP = 2 if BC % 2 == 0 else 1                 # 2-way parallel grid: v7x megacore
    BCh = BC // NP
    Nf_in, Nb, Nf_out = BCh * F_in, BCh * G, BCh * F_out

    # Lane-dense relayout: independent (batch-copy, fourier/group) axes go last.
    xt = x_hat.reshape(NP, BCh, F_in, W, H, D)
    xt = jnp.transpose(xt, (0, 3, 4, 5, 1, 2)).reshape(NP, W, H, D, Nf_in)
    xt = xt.astype(jnp.float32)

    # Block-diagonal IFT / FT bases fold the per-copy matmuls into one MXU op.
    eye = jnp.eye(BCh, dtype=jnp.float32)
    A_ift_bd = jnp.kron(eye, A_ift.T).astype(matmul_dtype)     # (Nf_in, Nb)
    A_ft_bd = jnp.kron(eye, A_ft.T).astype(matmul_dtype)       # (Nb, Nf_out)

    kernel = functools.partial(_fused_kernel, pool_k=pool_k, taps=taps)

    out = pl.pallas_call(
        kernel,
        out_shape=jax.ShapeDtypeStruct((NP, W2, W2, W2, Nf_out), jnp.float32),
        grid=(NP,),
        in_specs=[pl.BlockSpec((1, W, H, D, Nf_in), lambda i: (i, 0, 0, 0, 0)),
                  pl.BlockSpec((Nf_in, Nb), lambda i: (0, 0)),
                  pl.BlockSpec((Nb, Nf_out), lambda i: (0, 0))],
        out_specs=pl.BlockSpec((1, W2, W2, W2, Nf_out), lambda i: (i, 0, 0, 0, 0)),
        scratch_shapes=[pltpu.VMEM((W2, W2, W2, Nb), jnp.float32)],
        compiler_params=pltpu.CompilerParams(
            dimension_semantics=("parallel",),
            vmem_limit_bytes=32 * 1024 * 1024),
    )(xt, A_ift_bd, A_ft_bd)

    out = out.reshape(NP, W2, W2, W2, BCh, F_out)
    out = jnp.transpose(out, (0, 4, 5, 1, 2, 3)).reshape(B, C * F_out, W2, W2, W2)
    return out


# ----------------------------------------------------------------------------
# Pure-JAX reference (independent code path) for verification.
# Matmul inputs are cast to the same bf16 dtype as the kernel so the comparison
# isolates implementation differences, not dtype policy.
# ----------------------------------------------------------------------------

def reference(x_hat, A_ift, A_ft, *, pool_k, stride, w1_np,
              matmul_dtype=jnp.bfloat16):
    B, CF, W, H, D = x_hat.shape
    G, F_in = A_ift.shape
    F_out = A_ft.shape[0]
    C = CF // F_in
    S = W * H * D

    xh = x_hat.reshape(B, C, F_in, S).astype(matmul_dtype)
    x = jnp.einsum('gf,bcfs->bcgs', A_ift.astype(matmul_dtype), xh,
                   preferred_element_type=jnp.float32)
    x = x.reshape(B * C * G, W, H, D)

    k = pool_k
    Wo = W - k + 1
    patches = jnp.stack([x[:, i:i + Wo, j:j + Wo, l:l + Wo]
                         for i in range(k) for j in range(k) for l in range(k)],
                        axis=-1)
    idx = jnp.argmax(jnp.abs(patches), axis=-1, keepdims=True)
    y = jnp.take_along_axis(patches, idx, axis=-1)[..., 0]

    kb = w1_np.shape[0]
    P = kb // 2
    w1 = jnp.asarray(w1_np, jnp.float32)
    w3d = w1[:, None, None] * w1[None, :, None] * w1[None, None, :]
    dn = ('NCDHW', 'OIDHW', 'NCDHW')

    def conv(a):
        return lax.conv_general_dilated(a, w3d[None, None], (stride,) * 3,
                                        [(P, P)] * 3, dimension_numbers=dn)

    num = conv(y[:, None])[:, 0]
    den = conv(jnp.ones((1, 1, Wo, Wo, Wo), jnp.float32))[0, 0]
    yb = num / den

    W2 = yb.shape[-1]
    S2 = W2 ** 3
    out = jnp.einsum('fg,bcgs->bcfs', A_ft.astype(matmul_dtype),
                     yb.reshape(B, C, G, S2).astype(matmul_dtype),
                     preferred_element_type=jnp.float32)
    return out.reshape(B, C * F_out, W2, W2, W2)


# ----------------------------------------------------------------------------
# Deterministic parameter setup + run
# ----------------------------------------------------------------------------

def gaussian_weights(sigma):
    # kernel_size_from_radius(r) assumed = 2*ceil(r) + 1, with r = 4*sigma
    R = int(math.ceil(4 * sigma))
    t = np.arange(-R, R + 1, dtype=np.float64)
    w = np.exp(-0.5 * (t / sigma) ** 2)
    w /= w.sum()
    return w.astype(np.float32)


if __name__ == "__main__":
    key = jax.random.PRNGKey(0)
    k1, k2, k3 = jax.random.split(key, 3)

    B, C = 2, 2        # batch, field copies
    F_IN = 8           # Fourier coefficients per field copy
    G = 8              # number of group-grid elements
    F_OUT = F_IN       # out_type == in_type
    W = 8              # cubic spatial size
    POOL_K = 2         # ExtremePool3D kernel size
    STRIDE = 2         # blur stride (defaults to pool kernel_size in the module)
    SIGMA = 0.6

    w1_np = gaussian_weights(SIGMA)

    # deterministic synthetic IFT / FT matrices (stand-ins for the escnn bases)
    A_ift = jax.random.normal(k1, (G, F_IN), jnp.float32) / np.sqrt(G)
    A_ft = jax.random.normal(k2, (F_OUT, G), jnp.float32) / np.sqrt(G)
    x_hat = jax.random.normal(k3, (B, C * F_IN, W, W, W), jnp.float32)

    out = fourier_extreme_pool3d(x_hat, A_ift, A_ft,
                                 pool_k=POOL_K, stride=STRIDE, w1_np=w1_np)
    out = jax.block_until_ready(out)

    ref = jax.block_until_ready(
        reference(x_hat, A_ift, A_ft, pool_k=POOL_K, stride=STRIDE, w1_np=w1_np))

    W2 = (W - POOL_K) // STRIDE + 1
    assert out.shape == (B, C * F_OUT, W2, W2, W2), out.shape
    np.testing.assert_allclose(np.asarray(out), np.asarray(ref), rtol=1e-2, atol=1e-2)
    print("KERNEL_OK")
</pallas_src>

<mosaic_0001>
module attributes {stable_mosaic.version = 11 : i64} {
  func.func @_fused_kernel(%arg0: i32, %arg1: memref<1x8x8x8x16xf32, #tpu.memory_space<vmem>>, %arg2: memref<16x16xbf16, #tpu.memory_space<vmem>>, %arg3: memref<16x16xbf16, #tpu.memory_space<vmem>>, %arg4: memref<1x4x4x4x16xf32, #tpu.memory_space<vmem>>, %arg5: memref<4x4x4x16xf32, #tpu.memory_space<vmem>>) attributes {dimension_semantics = [#tpu.dimension_semantics<parallel>], iteration_bounds = array<i64: 2>, scalar_prefetch = 0 : i64, scratch_operands = 1 : i64, tpu.core_type = #tpu.core_type<tc>, window_params = [{transform_indices = @transform_0, window_bounds = array<i64: 1, 8, 8, 8, 16>}, {pipeline_mode = #tpu.pipeline_mode<synchronous>, transform_indices = @transform_1, window_bounds = array<i64: 16, 16>}, {pipeline_mode = #tpu.pipeline_mode<synchronous>, transform_indices = @transform_2, window_bounds = array<i64: 16, 16>}, {transform_indices = @transform_3, window_bounds = array<i64: 1, 4, 4, 4, 16>}]} {
    %c0 = arith.constant 0 : index
    %c0_0 = arith.constant 0 : index
    %c0_1 = arith.constant 0 : index
    %c0_2 = arith.constant 0 : index
    %c0_3 = arith.constant 0 : index
    %0 = vector.load %arg1[%c0, %c0_0, %c0_1, %c0_2, %c0_3] : memref<1x8x8x8x16xf32, #tpu.memory_space<vmem>>, vector<1x8x8x8x16xf32>
    %1 = vector.shape_cast %0 : vector<1x8x8x8x16xf32> to vector<8x8x8x16xf32>
    %2 = vector.shape_cast %1 : vector<8x8x8x16xf32> to vector<512x16xf32>
    %3 = arith.truncf %2 : vector<512x16xf32> to vector<512x16xbf16>
    %c0_4 = arith.constant 0 : index
    %c0_5 = arith.constant 0 : index
    %4 = vector.load %arg2[%c0_4, %c0_5] : memref<16x16xbf16, #tpu.memory_space<vmem>>, vector<16x16xbf16>
    %cst = arith.constant dense<0.000000e+00> : vector<512x16xf32>
    %5 = tpu.matmul %3, %4, %cst {dimension_numbers = #tpu.dot_dimension_numbers<[1], [0], [0], [1], [0, 0, 1, 1], [], []>} : vector<512x16xbf16>, vector<16x16xbf16>, vector<512x16xf32> -> vector<512x16xf32>
    %6 = vector.shape_cast %5 : vector<512x16xf32> to vector<8x8x8x16xf32>
    %7 = math.absf %6 : vector<8x8x8x16xf32>
    %8 = vector.extract_strided_slice %6 {offsets = [0, 0, 0, 0], sizes = [7, 7, 7, 16], strides = [1, 1, 1, 1]} : vector<8x8x8x16xf32> to vector<7x7x7x16xf32>
    %9 = vector.extract_strided_slice %7 {offsets = [0, 0, 0, 0], sizes = [7, 7, 7, 16], strides = [1, 1, 1, 1]} : vector<8x8x8x16xf32> to vector<7x7x7x16xf32>
    %10 = vector.extract_strided_slice %6 {offsets = [0, 0, 1, 0], sizes = [7, 7, 7, 16], strides = [1, 1, 1, 1]} : vector<8x8x8x16xf32> to vector<7x7x7x16xf32>
    %11 = vector.extract_strided_slice %7 {offsets = [0, 0, 1, 0], sizes = [7, 7, 7, 16], strides = [1, 1, 1, 1]} : vector<8x8x8x16xf32> to vector<7x7x7x16xf32>
    %12 = vector.extract_strided_slice %6 {offsets = [0, 1, 0, 0], sizes = [7, 7, 7, 16], strides = [1, 1, 1, 1]} : vector<8x8x8x16xf32> to vector<7x7x7x16xf32>
    %13 = vector.extract_strided_slice %7 {offsets = [0, 1, 0, 0], sizes = [7, 7, 7, 16], strides = [1, 1, 1, 1]} : vector<8x8x8x16xf32> to vector<7x7x7x16xf32>
    %14 = vector.extract_strided_slice %6 {offsets = [0, 1, 1, 0], sizes = [7, 7, 7, 16], strides = [1, 1, 1, 1]} : vector<8x8x8x16xf32> to vector<7x7x7x16xf32>
    %15 = vector.extract_strided_slice %7 {offsets = [0, 1, 1, 0], sizes = [7, 7, 7, 16], strides = [1, 1, 1, 1]} : vector<8x8x8x16xf32> to vector<7x7x7x16xf32>
    %16 = vector.extract_strided_slice %6 {offsets = [1, 0, 0, 0], sizes = [7, 7, 7, 16], strides = [1, 1, 1, 1]} : vector<8x8x8x16xf32> to vector<7x7x7x16xf32>
    %17 = vector.extract_strided_slice %7 {offsets = [1, 0, 0, 0], sizes = [7, 7, 7, 16], strides = [1, 1, 1, 1]} : vector<8x8x8x16xf32> to vector<7x7x7x16xf32>
    %18 = vector.extract_strided_slice %6 {offsets = [1, 0, 1, 0], sizes = [7, 7, 7, 16], strides = [1, 1, 1, 1]} : vector<8x8x8x16xf32> to vector<7x7x7x16xf32>
    %19 = vector.extract_strided_slice %7 {offsets = [1, 0, 1, 0], sizes = [7, 7, 7, 16], strides = [1, 1, 1, 1]} : vector<8x8x8x16xf32> to vector<7x7x7x16xf32>
    %20 = vector.extract_strided_slice %6 {offsets = [1, 1, 0, 0], sizes = [7, 7, 7, 16], strides = [1, 1, 1, 1]} : vector<8x8x8x16xf32> to vector<7x7x7x16xf32>
    %21 = vector.extract_strided_slice %7 {offsets = [1, 1, 0, 0], sizes = [7, 7, 7, 16], strides = [1, 1, 1, 1]} : vector<8x8x8x16xf32> to vector<7x7x7x16xf32>
    %22 = vector.extract_strided_slice %6 {offsets = [1, 1, 1, 0], sizes = [7, 7, 7, 16], strides = [1, 1, 1, 1]} : vector<8x8x8x16xf32> to vector<7x7x7x16xf32>
    %23 = vector.extract_strided_slice %7 {offsets = [1, 1, 1, 0], sizes = [7, 7, 7, 16], strides = [1, 1, 1, 1]} : vector<8x8x8x16xf32> to vector<7x7x7x16xf32>
    %24 = arith.cmpf ogt, %11, %9 : vector<7x7x7x16xf32>
    %25 = arith.select %24, %10, %8 : vector<7x7x7x16xi1>, vector<7x7x7x16xf32>
    %26 = arith.maximumf %9, %11 : vector<7x7x7x16xf32>
    %27 = arith.cmpf ogt, %15, %13 : vector<7x7x7x16xf32>
    %28 = arith.select %27, %14, %12 : vector<7x7x7x16xi1>, vector<7x7x7x16xf32>
    %29 = arith.maximumf %13, %15 : vector<7x7x7x16xf32>
    %30 = arith.cmpf ogt, %19, %17 : vector<7x7x7x16xf32>
    %31 = arith.select %30, %18, %16 : vector<7x7x7x16xi1>, vector<7x7x7x16xf32>
    %32 = arith.maximumf %17, %19 : vector<7x7x7x16xf32>
    %33 = arith.cmpf ogt, %23, %21 : vector<7x7x7x16xf32>
    %34 = arith.select %33, %22, %20 : vector<7x7x7x16xi1>, vector<7x7x7x16xf32>
    %35 = arith.maximumf %21, %23 : vector<7x7x7x16xf32>
    %36 = arith.cmpf ogt, %29, %26 : vector<7x7x7x16xf32>
    %37 = arith.select %36, %28, %25 : vector<7x7x7x16xi1>, vector<7x7x7x16xf32>
    %38 = arith.maximumf %26, %29 : vector<7x7x7x16xf32>
    %39 = arith.cmpf ogt, %35, %32 : vector<7x7x7x16xf32>
    %40 = arith.select %39, %34, %31 : vector<7x7x7x16xi1>, vector<7x7x7x16xf32>
    %41 = arith.maximumf %32, %35 : vector<7x7x7x16xf32>
    %42 = arith.cmpf ogt, %41, %38 : vector<7x7x7x16xf32>
    %43 = arith.select %42, %40, %37 : vector<7x7x7x16xi1>, vector<7x7x7x16xf32>
    %44 = vector.extract_strided_slice %43 {offsets = [0, 0, 0, 0], sizes = [1, 7, 7, 16], strides = [1, 1, 1, 1]} : vector<7x7x7x16xf32> to vector<1x7x7x16xf32>
    %cst_6 = arith.constant 0.797943234 : f32
    %45 = vector.broadcast %cst_6 : f32 to vector<1x7x7x16xf32>
    %46 = arith.mulf %45, %44 : vector<1x7x7x16xf32>
    %47 = vector.extract_strided_slice %43 {offsets = [1, 0, 0, 0], sizes = [1, 7, 7, 16], strides = [1, 1, 1, 1]} : vector<7x7x7x16xf32> to vector<1x7x7x16xf32>
    %cst_7 = arith.constant 0.198968917 : f32
    %48 = vector.broadcast %cst_7 : f32 to vector<1x7x7x16xf32>
    %49 = arith.mulf %48, %47 : vector<1x7x7x16xf32>
    %50 = arith.addf %46, %49 : vector<1x7x7x16xf32>
    %51 = vector.extract_strided_slice %43 {offsets = [2, 0, 0, 0], sizes = [1, 7, 7, 16], strides = [1, 1, 1, 1]} : vector<7x7x7x16xf32> to vector<1x7x7x16xf32>
    %cst_8 = arith.constant 0.00308478484 : f32
    %52 = vector.broadcast %cst_8 : f32 to vector<1x7x7x16xf32>
    %53 = arith.mulf %52, %51 : vector<1x7x7x16xf32>
    %54 = arith.addf %50, %53 : vector<1x7x7x16xf32>
    %55 = vector.extract_strided_slice %43 {offsets = [3, 0, 0, 0], sizes = [1, 7, 7, 16], strides = [1, 1, 1, 1]} : vector<7x7x7x16xf32> to vector<1x7x7x16xf32>
    %cst_9 = arith.constant 2.97365796E-6 : f32
    %56 = vector.broadcast %cst_9 : f32 to vector<1x7x7x16xf32>
    %57 = arith.mulf %56, %55 : vector<1x7x7x16xf32>
    %58 = arith.addf %54, %57 : vector<1x7x7x16xf32>
    %59 = vector.extract_strided_slice %43 {offsets = [0, 0, 0, 0], sizes = [1, 7, 7, 16], strides = [1, 1, 1, 1]} : vector<7x7x7x16xf32> to vector<1x7x7x16xf32>
    %cst_10 = arith.constant 0.00256626215 : f32
    %60 = vector.broadcast %cst_10 : f32 to vector<1x7x7x16xf32>
    %61 = arith.mulf %60, %59 : vector<1x7x7x16xf32>
    %62 = vector.extract_strided_slice %43 {offsets = [1, 0, 0, 0], sizes = [1, 7, 7, 16], strides = [1, 1, 1, 1]} : vector<7x7x7x16xf32> to vector<1x7x7x16xf32>
    %cst_11 = arith.constant 0.165524155 : f32
    %63 = vector.broadcast %cst_11 : f32 to vector<1x7x7x16xf32>
    %64 = arith.mulf %63, %62 : vector<1x7x7x16xf32>
    %65 = arith.addf %61, %64 : vector<1x7x7x16xf32>
    %66 = vector.extract_strided_slice %43 {offsets = [2, 0, 0, 0], sizes = [1, 7, 7, 16], strides = [1, 1, 1, 1]} : vector<7x7x7x16xf32> to vector<1x7x7x16xf32>
    %cst_12 = arith.constant 0.66381663 : f32
    %67 = vector.broadcast %cst_12 : f32 to vector<1x7x7x16xf32>
    %68 = arith.mulf %67, %66 : vector<1x7x7x16xf32>
    %69 = arith.addf %65, %68 : vector<1x7x7x16xf32>
    %70 = vector.extract_strided_slice %43 {offsets = [3, 0, 0, 0], sizes = [1, 7, 7, 16], strides = [1, 1, 1, 1]} : vector<7x7x7x16xf32> to vector<1x7x7x16xf32>
    %cst_13 = arith.constant 0.165524155 : f32
    %71 = vector.broadcast %cst_13 : f32 to vector<1x7x7x16xf32>
    %72 = arith.mulf %71, %70 : vector<1x7x7x16xf32>
    %73 = arith.addf %69, %72 : vector<1x7x7x16xf32>
    %74 = vector.extract_strided_slice %43 {offsets = [4, 0, 0, 0], sizes = [1, 7, 7, 16], strides = [1, 1, 1, 1]} : vector<7x7x7x16xf32> to vector<1x7x7x16xf32>
    %cst_14 = arith.constant 0.00256626215 : f32
    %75 = vector.broadcast %cst_14 : f32 to vector<1x7x7x16xf32>
    %76 = arith.mulf %75, %74 : vector<1x7x7x16xf32>
    %77 = arith.addf %73, %76 : vector<1x7x7x16xf32>
    %78 = vector.extract_strided_slice %43 {offsets = [5, 0, 0, 0], sizes = [1, 7, 7, 16], strides = [1, 1, 1, 1]} : vector<7x7x7x16xf32> to vector<1x7x7x16xf32>
    %cst_15 = arith.constant 2.47381467E-6 : f32
    %79 = vector.broadcast %cst_15 : f32 to vector<1x7x7x16xf32>
    %80 = arith.mulf %79, %78 : vector<1x7x7x16xf32>
    %81 = arith.addf %77, %80 : vector<1x7x7x16xf32>
    %82 = vector.extract_strided_slice %43 {offsets = [1, 0, 0, 0], sizes = [1, 7, 7, 16], strides = [1, 1, 1, 1]} : vector<7x7x7x16xf32> to vector<1x7x7x16xf32>
    %cst_16 = arith.constant 2.47381467E-6 : f32
    %83 = vector.broadcast %cst_16 : f32 to vector<1x7x7x16xf32>
    %84 = arith.mulf %83, %82 : vector<1x7x7x16xf32>
    %85 = vector.extract_strided_slice %43 {offsets = [2, 0, 0, 0], sizes = [1, 7, 7, 16], strides = [1, 1, 1, 1]} : vector<7x7x7x16xf32> to vector<1x7x7x16xf32>
    %cst_17 = arith.constant 0.00256626215 : f32
    %86 = vector.broadcast %cst_17 : f32 to vector<1x7x7x16xf32>
    %87 = arith.mulf %86, %85 : vector<1x7x7x16xf32>
    %88 = arith.addf %84, %87 : vector<1x7x7x16xf32>
    %89 = vector.extract_strided_slice %43 {offsets = [3, 0, 0, 0], sizes = [1, 7, 7, 16], strides = [1, 1, 1, 1]} : vector<7x7x7x16xf32> to vector<1x7x7x16xf32>
    %cst_18 = arith.constant 0.165524155 : f32
    %90 = vector.broadcast %cst_18 : f32 to vector<1x7x7x16xf32>
    %91 = arith.mulf %90, %89 : vector<1x7x7x16xf32>
    %92 = arith.addf %88, %91 : vector<1x7x7x16xf32>
    %93 = vector.extract_strided_slice %43 {offsets = [4, 0, 0, 0], sizes = [1, 7, 7, 16], strides = [1, 1, 1, 1]} : vector<7x7x7x16xf32> to vector<1x7x7x16xf32>
    %cst_19 = arith.constant 0.66381663 : f32
    %94 = vector.broadcast %cst_19 : f32 to vector<1x7x7x16xf32>
    %95 = arith.mulf %94, %93 : vector<1x7x7x16xf32>
    %96 = arith.addf %92, %95 : vector<1x7x7x16xf32>
    %97 = vector.extract_strided_slice %43 {offsets = [5, 0, 0, 0], sizes = [1, 7, 7, 16], strides = [1, 1, 1, 1]} : vector<7x7x7x16xf32> to vector<1x7x7x16xf32>
    %cst_20 = arith.constant 0.165524155 : f32
    %98 = vector.broadcast %cst_20 : f32 to vector<1x7x7x16xf32>
    %99 = arith.mulf %98, %97 : vector<1x7x7x16xf32>
    %100 = arith.addf %96, %99 : vector<1x7x7x16xf32>
    %101 = vector.extract_strided_slice %43 {offsets = [6, 0, 0, 0], sizes = [1, 7, 7, 16], strides = [1, 1, 1, 1]} : vector<7x7x7x16xf32> to vector<1x7x7x16xf32>
    %cst_21 = arith.constant 0.00256626215 : f32
    %102 = vector.broadcast %cst_21 : f32 to vector<1x7x7x16xf32>
    %103 = arith.mulf %102, %101 : vector<1x7x7x16xf32>
    %104 = arith.addf %100, %103 : vector<1x7x7x16xf32>
    %105 = vector.extract_strided_slice %43 {offsets = [3, 0, 0, 0], sizes = [1, 7, 7, 16], strides = [1, 1, 1, 1]} : vector<7x7x7x16xf32> to vector<1x7x7x16xf32>
    %cst_22 = arith.constant 2.97365818E-6 : f32
    %106 = vector.broadcast %cst_22 : f32 to vector<1x7x7x16xf32>
    %107 = arith.mulf %106, %105 : vector<1x7x7x16xf32>
    %108 = vector.extract_strided_slice %43 {offsets = [4, 0, 0, 0], sizes = [1, 7, 7, 16], strides = [1, 1, 1, 1]} : vector<7x7x7x16xf32> to vector<1x7x7x16xf32>
    %cst_23 = arith.constant 0.00308478507 : f32
    %109 = vector.broadcast %cst_23 : f32 to vector<1x7x7x16xf32>
    %110 = arith.mulf %109, %108 : vector<1x7x7x16xf32>
    %111 = arith.addf %107, %110 : vector<1x7x7x16xf32>
    %112 = vector.extract_strided_slice %43 {offsets = [5, 0, 0, 0], sizes = [1, 7, 7, 16], strides = [1, 1, 1, 1]} : vector<7x7x7x16xf32> to vector<1x7x7x16xf32>
    %cst_24 = arith.constant 0.198968932 : f32
    %113 = vector.broadcast %cst_24 : f32 to vector<1x7x7x16xf32>
    %114 = arith.mulf %113, %112 : vector<1x7x7x16xf32>
    %115 = arith.addf %111, %114 : vector<1x7x7x16xf32>
    %116 = vector.extract_strided_slice %43 {offsets = [6, 0, 0, 0], sizes = [1, 7, 7, 16], strides = [1, 1, 1, 1]} : vector<7x7x7x16xf32> to vector<1x7x7x16xf32>
    %cst_25 = arith.constant 0.797943294 : f32
    %117 = vector.broadcast %cst_25 : f32 to vector<1x7x7x16xf32>
    %118 = arith.mulf %117, %116 : vector<1x7x7x16xf32>
    %119 = arith.addf %115, %118 : vector<1x7x7x16xf32>
    %120 = tpu.concatenate %58, %81, %104, %119 in 0 : vector<1x7x7x16xf32>, vector<1x7x7x16xf32>, vector<1x7x7x16xf32>, vector<1x7x7x16xf32> -> vector<4x7x7x16xf32>
    %121 = vector.extract_strided_slice %120 {offsets = [0, 0, 0, 0], sizes = [4, 1, 7, 16], strides = [1, 1, 1, 1]} : vector<4x7x7x16xf32> to vector<4x1x7x16xf32>
    %cst_26 = arith.constant 0.797943234 : f32
    %122 = vector.broadcast %cst_26 : f32 to vector<4x1x7x16xf32>
    %123 = arith.mulf %122, %121 : vector<4x1x7x16xf32>
    %124 = vector.extract_strided_slice %120 {offsets = [0, 1, 0, 0], sizes = [4, 1, 7, 16], strides = [1, 1, 1, 1]} : vector<4x7x7x16xf32> to vector<4x1x7x16xf32>
    %cst_27 = arith.constant 0.198968917 : f32
    %125 = vector.broadcast %cst_27 : f32 to vector<4x1x7x16xf32>
    %126 = arith.mulf %125, %124 : vector<4x1x7x16xf32>
    %127 = arith.addf %123, %126 : vector<4x1x7x16xf32>
    %128 = vector.extract_strided_slice %120 {offsets = [0, 2, 0, 0], sizes = [4, 1, 7, 16], strides = [1, 1, 1, 1]} : vector<4x7x7x16xf32> to vector<4x1x7x16xf32>
    %cst_28 = arith.constant 0.00308478484 : f32
    %129 = vector.broadcast %cst_28 : f32 to vector<4x1x7x16xf32>
    %130 = arith.mulf %129, %128 : vector<4x1x7x16xf32>
    %131 = arith.addf %127, %130 : vector<4x1x7x16xf32>
    %132 = vector.extract_strided_slice %120 {offsets = [0, 3, 0, 0], sizes = [4, 1, 7, 16], strides = [1, 1, 1, 1]} : vector<4x7x7x16xf32> to vector<4x1x7x16xf32>
    %cst_29 = arith.constant 2.97365796E-6 : f32
    %133 = vector.broadcast %cst_29 : f32 to vector<4x1x7x16xf32>
    %134 = arith.mulf %133, %132 : vector<4x1x7x16xf32>
    %135 = arith.addf %131, %134 : vector<4x1x7x16xf32>
    %136 = vector.extract_strided_slice %120 {offsets = [0, 0, 0, 0], sizes = [4, 1, 7, 16], strides = [1, 1, 1, 1]} : vector<4x7x7x16xf32> to vector<4x1x7x16xf32>
    %cst_30 = arith.constant 0.00256626215 : f32
    %137 = vector.broadcast %cst_30 : f32 to vector<4x1x7x16xf32>
    %138 = arith.mulf %137, %136 : vector<4x1x7x16xf32>
    %139 = vector.extract_strided_slice %120 {offsets = [0, 1, 0, 0], sizes = [4, 1, 7, 16], strides = [1, 1, 1, 1]} : vector<4x7x7x16xf32> to vector<4x1x7x16xf32>
    %cst_31 = arith.constant 0.165524155 : f32
    %140 = vector.broadcast %cst_31 : f32 to vector<4x1x7x16xf32>
    %141 = arith.mulf %140, %139 : vector<4x1x7x16xf32>
    %142 = arith.addf %138, %141 : vector<4x1x7x16xf32>
    %143 = vector.extract_strided_slice %120 {offsets = [0, 2, 0, 0], sizes = [4, 1, 7, 16], strides = [1, 1, 1, 1]} : vector<4x7x7x16xf32> to vector<4x1x7x16xf32>
    %cst_32 = arith.constant 0.66381663 : f32
    %144 = vector.broadcast %cst_32 : f32 to vector<4x1x7x16xf32>
    %145 = arith.mulf %144, %143 : vector<4x1x7x16xf32>
    %146 = arith.addf %142, %145 : vector<4x1x7x16xf32>
    %147 = vector.extract_strided_slice %120 {offsets = [0, 3, 0, 0], sizes = [4, 1, 7, 16], strides = [1, 1, 1, 1]} : vector<4x7x7x16xf32> to vector<4x1x7x16xf32>
    %cst_33 = arith.constant 0.165524155 : f32
    %148 = vector.broadcast %cst_33 : f32 to vector<4x1x7x16xf32>
    %149 = arith.mulf %148, %147 : vector<4x1x7x16xf32>
    %150 = arith.addf %146, %149 : vector<4x1x7x16xf32>
    %151 = vector.extract_strided_slice %120 {offsets = [0, 4, 0, 0], sizes = [4, 1, 7, 16], strides = [1, 1, 1, 1]} : vector<4x7x7x16xf32> to vector<4x1x7x16xf32>
    %cst_34 = arith.constant 0.00256626215 : f32
    %152 = vector.broadcast %cst_34 : f32 to vector<4x1x7x16xf32>
    %153 = arith.mulf %152, %151 : vector<4x1x7x16xf32>
    %154 = arith.addf %150, %153 : vector<4x1x7x16xf32>
    %155 = vector.extract_strided_slice %120 {offsets = [0, 5, 0, 0], sizes = [4, 1, 7, 16], strides = [1, 1, 1, 1]} : vector<4x7x7x16xf32> to vector<4x1x7x16xf32>
    %cst_35 = arith.constant 2.47381467E-6 : f32
    %156 = vector.broadcast %cst_35 : f32 to vector<4x1x7x16xf32>
    %157 = arith.mulf %156, %155 : vector<4x1x7x16xf32>
    %158 = arith.addf %154, %157 : vector<4x1x7x16xf32>
    %159 = vector.extract_strided_slice %120 {offsets = [0, 1, 0, 0], sizes = [4, 1, 7, 16], strides = [1, 1, 1, 1]} : vector<4x7x7x16xf32> to vector<4x1x7x16xf32>
    %cst_36 = arith.constant 2.47381467E-6 : f32
    %160 = vector.broadcast %cst_36 : f32 to vector<4x1x7x16xf32>
    %161 = arith.mulf %160, %159 : vector<4x1x7x16xf32>
    %162 = vector.extract_strided_slice %120 {offsets = [0, 2, 0, 0], sizes = [4, 1, 7, 16], strides = [1, 1, 1, 1]} : vector<4x7x7x16xf32> to vector<4x1x7x16xf32>
    %cst_37 = arith.constant 0.00256626215 : f32
    %163 = vector.broadcast %cst_37 : f32 to vector<4x1x7x16xf32>
    %164 = arith.mulf %163, %162 : vector<4x1x7x16xf32>
    %165 = arith.addf %161, %164 : vector<4x1x7x16xf32>
    %166 = vector.extract_strided_slice %120 {offsets = [0, 3, 0, 0], sizes = [4, 1, 7, 16], strides = [1, 1, 1, 1]} : vector<4x7x7x16xf32> to vector<4x1x7x16xf32>
    %cst_38 = arith.constant 0.165524155 : f32
    %167 = vector.broadcast %cst_38 : f32 to vector<4x1x7x16xf32>
    %168 = arith.mulf %167, %166 : vector<4x1x7x16xf32>
    %169 = arith.addf %165, %168 : vector<4x1x7x16xf32>
    %170 = vector.extract_strided_slice %120 {offsets = [0, 4, 0, 0], sizes = [4, 1, 7, 16], strides = [1, 1, 1, 1]} : vector<4x7x7x16xf32> to vector<4x1x7x16xf32>
    %cst_39 = arith.constant 0.66381663 : f32
    %171 = vector.broadcast %cst_39 : f32 to vector<4x1x7x16xf32>
    %172 = arith.mulf %171, %170 : vector<4x1x7x16xf32>
    %173 = arith.addf %169, %172 : vector<4x1x7x16xf32>
    %174 = vector.extract_strided_slice %120 {offsets = [0, 5, 0, 0], sizes = [4, 1, 7, 16], strides = [1, 1, 1, 1]} : vector<4x7x7x16xf32> to vector<4x1x7x16xf32>
    %cst_40 = arith.constant 0.165524155 : f32
    %175 = vector.broadcast %cst_40 : f32 to vector<4x1x7x16xf32>
    %176 = arith.mulf %175, %174 : vector<4x1x7x16xf32>
    %177 = arith.addf %173, %176 : vector<4x1x7x16xf32>
    %178 = vector.extract_strided_slice %120 {offsets = [0, 6, 0, 0], sizes = [4, 1, 7, 16], strides = [1, 1, 1, 1]} : vector<4x7x7x16xf32> to vector<4x1x7x16xf32>
    %cst_41 = arith.constant 0.00256626215 : f32
    %179 = vector.broadcast %cst_41 : f32 to vector<4x1x7x16xf32>
    %180 = arith.mulf %179, %178 : vector<4x1x7x16xf32>
    %181 = arith.addf %177, %180 : vector<4x1x7x16xf32>
    %182 = vector.extract_strided_slice %120 {offsets = [0, 3, 0, 0], sizes = [4, 1, 7, 16], strides = [1, 1, 1, 1]} : vector<4x7x7x16xf32> to vector<4x1x7x16xf32>
    %cst_42 = arith.constant 2.97365818E-6 : f32
    %183 = vector.broadcast %cst_42 : f32 to vector<4x1x7x16xf32>
    %184 = arith.mulf %183, %182 : vector<4x1x7x16xf32>
    %185 = vector.extract_strided_slice %120 {offsets = [0, 4, 0, 0], sizes = [4, 1, 7, 16], strides = [1, 1, 1, 1]} : vector<4x7x7x16xf32> to vector<4x1x7x16xf32>
    %cst_43 = arith.constant 0.00308478507 : f32
    %186 = vector.broadcast %cst_43 : f32 to vector<4x1x7x16xf32>
    %187 = arith.mulf %186, %185 : vector<4x1x7x16xf32>
    %188 = arith.addf %184, %187 : vector<4x1x7x16xf32>
    %189 = vector.extract_strided_slice %120 {offsets = [0, 5, 0, 0], sizes = [4, 1, 7, 16], strides = [1, 1, 1, 1]} : vector<4x7x7x16xf32> to vector<4x1x7x16xf32>
    %cst_44 = arith.constant 0.198968932 : f32
    %190 = vector.broadcast %cst_44 : f32 to vector<4x1x7x16xf32>
    %191 = arith.mulf %190, %189 : vector<4x1x7x16xf32>
    %192 = arith.addf %188, %191 : vector<4x1x7x16xf32>
    %193 = vector.extract_strided_slice %120 {offsets = [0, 6, 0, 0], sizes = [4, 1, 7, 16], strides = [1, 1, 1, 1]} : vector<4x7x7x16xf32> to vector<4x1x7x16xf32>
    %cst_45 = arith.constant 0.797943294 : f32
    %194 = vector.broadcast %cst_45 : f32 to vector<4x1x7x16xf32>
    %195 = arith.mulf %194, %193 : vector<4x1x7x16xf32>
    %196 = arith.addf %192, %195 : vector<4x1x7x16xf32>
    %197 = tpu.concatenate %135, %158, %181, %196 in 1 : vector<4x1x7x16xf32>, vector<4x1x7x16xf32>, vector<4x1x7x16xf32>, vector<4x1x7x16xf32> -> vector<4x4x7x16xf32>
    %198 = vector.extract_strided_slice %197 {offsets = [0, 0, 0, 0], sizes = [4, 4, 1, 16], strides = [1, 1, 1, 1]} : vector<4x4x7x16xf32> to vector<4x4x1x16xf32>
    %cst_46 = arith.constant 0.797943234 : f32
    %199 = vector.broadcast %cst_46 : f32 to vector<4x4x1x16xf32>
    %200 = arith.mulf %199, %198 : vector<4x4x1x16xf32>
    %201 = vector.extract_strided_slice %197 {offsets = [0, 0, 1, 0], sizes = [4, 4, 1, 16], strides = [1, 1, 1, 1]} : vector<4x4x7x16xf32> to vector<4x4x1x16xf32>
    %cst_47 = arith.constant 0.198968917 : f32
    %202 = vector.broadcast %cst_47 : f32 to vector<4x4x1x16xf32>
    %203 = arith.mulf %202, %201 : vector<4x4x1x16xf32>
    %204 = arith.addf %200, %203 : vector<4x4x1x16xf32>
    %205 = vector.extract_strided_slice %197 {offsets = [0, 0, 2, 0], sizes = [4, 4, 1, 16], strides = [1, 1, 1, 1]} : vector<4x4x7x16xf32> to vector<4x4x1x16xf32>
    %cst_48 = arith.constant 0.00308478484 : f32
    %206 = vector.broadcast %cst_48 : f32 to vector<4x4x1x16xf32>
    %207 = arith.mulf %206, %205 : vector<4x4x1x16xf32>
    %208 = arith.addf %204, %207 : vector<4x4x1x16xf32>
    %209 = vector.extract_strided_slice %197 {offsets = [0, 0, 3, 0], sizes = [4, 4, 1, 16], strides = [1, 1, 1, 1]} : vector<4x4x7x16xf32> to vector<4x4x1x16xf32>
    %cst_49 = arith.constant 2.97365796E-6 : f32
    %210 = vector.broadcast %cst_49 : f32 to vector<4x4x1x16xf32>
    %211 = arith.mulf %210, %209 : vector<4x4x1x16xf32>
    %212 = arith.addf %208, %211 : vector<4x4x1x16xf32>
    %c0_50 = arith.constant 0 : index
    %c0_51 = arith.constant 0 : index
    %c0_52 = arith.constant 0 : index
    %c0_53 = arith.constant 0 : index
    %213 = vector.load %arg5[%c0_50, %c0_51, %c0_52, %c0_53] : memref<4x4x4x16xf32, #tpu.memory_space<vmem>>, vector<4x4x1x16xf32>
    tpu.vector_store %arg5[%c0_50, %c0_51, %c0_52, %c0_53], %212 {strides = array<i32>} : memref<4x4x4x16xf32, #tpu.memory_space<vmem>>, vector<4x4x1x16xf32>,
    %214 = vector.extract_strided_slice %197 {offsets = [0, 0, 0, 0], sizes = [4, 4, 1, 16], strides = [1, 1, 1, 1]} : vector<4x4x7x16xf32> to vector<4x4x1x16xf32>
    %cst_54 = arith.constant 0.00256626215 : f32
    %215 = vector.broadcast %cst_54 : f32 to vector<4x4x1x16xf32>
    %216 = arith.mulf %215, %214 : vector<4x4x1x16xf32>
    %217 = vector.extract_strided_slice %197 {offsets = [0, 0, 1, 0], sizes = [4, 4, 1, 16], strides = [1, 1, 1, 1]} : vector<4x4x7x16xf32> to vector<4x4x1x16xf32>
    %cst_55 = arith.constant 0.165524155 : f32
    %218 = vector.broadcast %cst_55 : f32 to vector<4x4x1x16xf32>
    %219 = arith.mulf %218, %217 : vector<4x4x1x16xf32>
    %220 = arith.addf %216, %219 : vector<4x4x1x16xf32>
    %221 = vector.extract_strided_slice %197 {offsets = [0, 0, 2, 0], sizes = [4, 4, 1, 16], strides = [1, 1, 1, 1]} : vector<4x4x7x16xf32> to vector<4x4x1x16xf32>
    %cst_56 = arith.constant 0.66381663 : f32
    %222 = vector.broadcast %cst_56 : f32 to vector<4x4x1x16xf32>
    %223 = arith.mulf %222, %221 : vector<4x4x1x16xf32>
    %224 = arith.addf %220, %223 : vector<4x4x1x16xf32>
    %225 = vector.extract_strided_slice %197 {offsets = [0, 0, 3, 0], sizes = [4, 4, 1, 16], strides = [1, 1, 1, 1]} : vector<4x4x7x16xf32> to vector<4x4x1x16xf32>
    %cst_57 = arith.constant 0.165524155 : f32
    %226 = vector.broadcast %cst_57 : f32 to vector<4x4x1x16xf32>
    %227 = arith.mulf %226, %225 : vector<4x4x1x16xf32>
    %228 = arith.addf %224, %227 : vector<4x4x1x16xf32>
    %229 = vector.extract_strided_slice %197 {offsets = [0, 0, 4, 0], sizes = [4, 4, 1, 16], strides = [1, 1, 1, 1]} : vector<4x4x7x16xf32> to vector<4x4x1x16xf32>
    %cst_58 = arith.constant 0.00256626215 : f32
    %230 = vector.broadcast %cst_58 : f32 to vector<4x4x1x16xf32>
    %231 = arith.mulf %230, %229 : vector<4x4x1x16xf32>
    %232 = arith.addf %228, %231 : vector<4x4x1x16xf32>
    %233 = vector.extract_strided_slice %197 {offsets = [0, 0, 5, 0], sizes = [4, 4, 1, 16], strides = [1, 1, 1, 1]} : vector<4x4x7x16xf32> to vector<4x4x1x16xf32>
    %cst_59 = arith.constant 2.47381467E-6 : f32
    %234 = vector.broadcast %cst_59 : f32 to vector<4x4x1x16xf32>
    %235 = arith.mulf %234, %233 : vector<4x4x1x16xf32>
    %236 = arith.addf %232, %235 : vector<4x4x1x16xf32>
    %c0_60 = arith.constant 0 : index
    %c0_61 = arith.constant 0 : index
    %c1 = arith.constant 1 : index
    %c0_62 = arith.constant 0 : index
    %237 = vector.load %arg5[%c0_60, %c0_61, %c1, %c0_62] : memref<4x4x4x16xf32, #tpu.memory_space<vmem>>, vector<4x4x1x16xf32>
    tpu.vector_store %arg5[%c0_60, %c0_61, %c1, %c0_62], %236 {strides = array<i32>} : memref<4x4x4x16xf32, #tpu.memory_space<vmem>>, vector<4x4x1x16xf32>,
    %238 = vector.extract_strided_slice %197 {offsets = [0, 0, 1, 0], sizes = [4, 4, 1, 16], strides = [1, 1, 1, 1]} : vector<4x4x7x16xf32> to vector<4x4x1x16xf32>
    %cst_63 = arith.constant 2.47381467E-6 : f32
    %239 = vector.broadcast %cst_63 : f32 to vector<4x4x1x16xf32>
    %240 = arith.mulf %239, %238 : vector<4x4x1x16xf32>
    %241 = vector.extract_strided_slice %197 {offsets = [0, 0, 2, 0], sizes = [4, 4, 1, 16], strides = [1, 1, 1, 1]} : vector<4x4x7x16xf32> to vector<4x4x1x16xf32>
    %cst_64 = arith.constant 0.00256626215 : f32
    %242 = vector.broadcast %cst_64 : f32 to vector<4x4x1x16xf32>
    %243 = arith.mulf %242, %241 : vector<4x4x1x16xf32>
    %244 = arith.addf %240, %243 : vector<4x4x1x16xf32>
    %245 = vector.extract_strided_slice %197 {offsets = [0, 0, 3, 0], sizes = [4, 4, 1, 16], strides = [1, 1, 1, 1]} : vector<4x4x7x16xf32> to vector<4x4x1x16xf32>
    %cst_65 = arith.constant 0.165524155 : f32
    %246 = vector.broadcast %cst_65 : f32 to vector<4x4x1x16xf32>
    %247 = arith.mulf %246, %245 : vector<4x4x1x16xf32>
    %248 = arith.addf %244, %247 : vector<4x4x1x16xf32>
    %249 = vector.extract_strided_slice %197 {offsets = [0, 0, 4, 0], sizes = [4, 4, 1, 16], strides = [1, 1, 1, 1]} : vector<4x4x7x16xf32> to vector<4x4x1x16xf32>
    %cst_66 = arith.constant 0.66381663 : f32
    %250 = vector.broadcast %cst_66 : f32 to vector<4x4x1x16xf32>
    %251 = arith.mulf %250, %249 : vector<4x4x1x16xf32>
    %252 = arith.addf %248, %251 : vector<4x4x1x16xf32>
    %253 = vector.extract_strided_slice %197 {offsets = [0, 0, 5, 0], sizes = [4, 4, 1, 16], strides = [1, 1, 1, 1]} : vector<4x4x7x16xf32> to vector<4x4x1x16xf32>
    %cst_67 = arith.constant 0.165524155 : f32
    %254 = vector.broadcast %cst_67 : f32 to vector<4x4x1x16xf32>
    %255 = arith.mulf %254, %253 : vector<4x4x1x16xf32>
    %256 = arith.addf %252, %255 : vector<4x4x1x16xf32>
    %257 = vector.extract_strided_slice %197 {offsets = [0, 0, 6, 0], sizes = [4, 4, 1, 16], strides = [1, 1, 1, 1]} : vector<4x4x7x16xf32> to vector<4x4x1x16xf32>
    %cst_68 = arith.constant 0.00256626215 : f32
    %258 = vector.broadcast %cst_68 : f32 to vector<4x4x1x16xf32>
    %259 = arith.mulf %258, %257 : vector<4x4x1x16xf32>
    %260 = arith.addf %256, %259 : vector<4x4x1x16xf32>
    %c0_69 = arith.constant 0 : index
    %c0_70 = arith.constant 0 : index
    %c2 = arith.constant 2 : index
    %c0_71 = arith.constant 0 : index
    %261 = vector.load %arg5[%c0_69, %c0_70, %c2, %c0_71] : memref<4x4x4x16xf32, #tpu.memory_space<vmem>>, vector<4x4x1x16xf32>
    tpu.vector_store %arg5[%c0_69, %c0_70, %c2, %c0_71], %260 {strides = array<i32>} : memref<4x4x4x16xf32, #tpu.memory_space<vmem>>, vector<4x4x1x16xf32>,
    %262 = vector.extract_strided_slice %197 {offsets = [0, 0, 3, 0], sizes = [4, 4, 1, 16], strides = [1, 1, 1, 1]} : vector<4x4x7x16xf32> to vector<4x4x1x16xf32>
    %cst_72 = arith.constant 2.97365818E-6 : f32
    %263 = vector.broadcast %cst_72 : f32 to vector<4x4x1x16xf32>
    %264 = arith.mulf %263, %262 : vector<4x4x1x16xf32>
    %265 = vector.extract_strided_slice %197 {offsets = [0, 0, 4, 0], sizes = [4, 4, 1, 16], strides = [1, 1, 1, 1]} : vector<4x4x7x16xf32> to vector<4x4x1x16xf32>
    %cst_73 = arith.constant 0.00308478507 : f32
    %266 = vector.broadcast %cst_73 : f32 to vector<4x4x1x16xf32>
    %267 = arith.mulf %266, %265 : vector<4x4x1x16xf32>
    %268 = arith.addf %264, %267 : vector<4x4x1x16xf32>
    %269 = vector.extract_strided_slice %197 {offsets = [0, 0, 5, 0], sizes = [4, 4, 1, 16], strides = [1, 1, 1, 1]} : vector<4x4x7x16xf32> to vector<4x4x1x16xf32>
    %cst_74 = arith.constant 0.198968932 : f32
    %270 = vector.broadcast %cst_74 : f32 to vector<4x4x1x16xf32>
    %271 = arith.mulf %270, %269 : vector<4x4x1x16xf32>
    %272 = arith.addf %268, %271 : vector<4x4x1x16xf32>
    %273 = vector.extract_strided_slice %197 {offsets = [0, 0, 6, 0], sizes = [4, 4, 1, 16], strides = [1, 1, 1, 1]} : vector<4x4x7x16xf32> to vector<4x4x1x16xf32>
    %cst_75 = arith.constant 0.797943294 : f32
    %274 = vector.broadcast %cst_75 : f32 to vector<4x4x1x16xf32>
    %275 = arith.mulf %274, %273 : vector<4x4x1x16xf32>
    %276 = arith.addf %272, %275 : vector<4x4x1x16xf32>
    %c0_76 = arith.constant 0 : index
    %c0_77 = arith.constant 0 : index
    %c3 = arith.constant 3 : index
    %c0_78 = arith.constant 0 : index
    %277 = vector.load %arg5[%c0_76, %c0_77, %c3, %c0_78] : memref<4x4x4x16xf32, #tpu.memory_space<vmem>>, vector<4x4x1x16xf32>
    tpu.vector_store %arg5[%c0_76, %c0_77, %c3, %c0_78], %276 {strides = array<i32>} : memref<4x4x4x16xf32, #tpu.memory_space<vmem>>, vector<4x4x1x16xf32>,
    %c0_79 = arith.constant 0 : index
    %c0_80 = arith.constant 0 : index
    %c0_81 = arith.constant 0 : index
    %c0_82 = arith.constant 0 : index
    %278 = vector.load %arg5[%c0_79, %c0_80, %c0_81, %c0_82] : memref<4x4x4x16xf32, #tpu.memory_space<vmem>>, vector<4x4x4x16xf32>
    %279 = vector.shape_cast %278 : vector<4x4x4x16xf32> to vector<64x16xf32>
    %280 = arith.truncf %279 : vector<64x16xf32> to vector<64x16xbf16>
    %c0_83 = arith.constant 0 : index
    %c0_84 = arith.constant 0 : index
    %281 = vector.load %arg3[%c0_83, %c0_84] : memref<16x16xbf16, #tpu.memory_space<vmem>>, vector<16x16xbf16>
    %cst_85 = arith.constant dense<0.000000e+00> : vector<64x16xf32>
    %282 = tpu.matmul %280, %281, %cst_85 {dimension_numbers = #tpu.dot_dimension_numbers<[1], [0], [0], [1], [0, 0, 1, 1], [], []>} : vector<64x16xbf16>, vector<16x16xbf16>, vector<64x16xf32> -> vector<64x16xf32>
    %283 = vector.shape_cast %282 : vector<64x16xf32> to vector<4x4x4x16xf32>
    %c0_86 = arith.constant 0 : index
    %c0_87 = arith.constant 0 : index
    %c0_88 = arith.constant 0 : index
    %c0_89 = arith.constant 0 : index
    %c0_90 = arith.constant 0 : index
    %284 = vector.load %arg4[%c0_86, %c0_87, %c0_88, %c0_89, %c0_90] : memref<1x4x4x4x16xf32, #tpu.memory_space<vmem>>, vector<1x4x4x4x16xf32>
    %285 = vector.shape_cast %284 : vector<1x4x4x4x16xf32> to vector<4x4x4x16xf32>
    %286 = vector.shape_cast %283 : vector<4x4x4x16xf32> to vector<1x4x4x4x16xf32>
    tpu.vector_store %arg4[%c0_86, %c0_87, %c0_88, %c0_89, %c0_90], %286 {strides = array<i32>} : memref<1x4x4x4x16xf32, #tpu.memory_space<vmem>>, vector<1x4x4x4x16xf32>,
    return
  }
  func.func @transform_0(%arg0: i32) -> (i32, i32, i32, i32, i32) {
    %c0_i32 = arith.constant 0 : i32
    %c0_i32_0 = arith.constant 0 : i32
    %c0_i32_1 = arith.constant 0 : i32
    %c0_i32_2 = arith.constant 0 : i32
    %c0_i32_3 = arith.constant 0 : i32
    return %arg0, %c0_i32, %c0_i32_0, %c0_i32_1, %c0_i32_2 : i32, i32, i32, i32, i32
  }
  func.func @transform_1(%arg0: i32) -> (i32, i32) {
    %c0_i32 = arith.constant 0 : i32
    %c0_i32_0 = arith.constant 0 : i32
    %c0_i32_1 = arith.constant 0 : i32
    return %c0_i32, %c0_i32_0 : i32, i32
  }
  func.func @transform_2(%arg0: i32) -> (i32, i32) {
    %c0_i32 = arith.constant 0 : i32
    %c0_i32_0 = arith.constant 0 : i32
    %c0_i32_1 = arith.constant 0 : i32
    return %c0_i32, %c0_i32_0 : i32, i32
  }
  func.func @transform_3(%arg0: i32) -> (i32, i32, i32, i32, i32) {
    %c0_i32 = arith.constant 0 : i32
    %c0_i32_0 = arith.constant 0 : i32
    %c0_i32_1 = arith.constant 0 : i32
    %c0_i32_2 = arith.constant 0 : i32
    %c0_i32_3 = arith.constant 0 : i32
    return %arg0, %c0_i32, %c0_i32_0, %c0_i32_1, %c0_i32_2 : i32, i32, i32, i32, i32
  }
}

</mosaic_0001>

<bundles_post_ra>
// kernel: tpu_custom_call.1
= control target key start
LH: loop header
LB: loop body
LE: loop exit
PB: predicated region body
PF: predicated region fallthrough
CT: control target
= control target key end

     0   :  { %8 = vsyncpa [#allocation4], 0  ;;  %s6673_s0 = inlined_call_operand.hbm [shape: f32[2,8,8,8,16], index: 0, kind: input, shape index: {}]   ;;  %s6674_s1 = inlined_call_operand.hbm [shape: bf16[16,16], index: 1, kind: input, shape index: {}]   ;;  %s6675_s2 = inlined_call_operand.hbm [shape: bf16[16,16], index: 2, kind: input, shape index: {}]   ;;  %s6676_s3 = inlined_call_operand.hbm [shape: f32[2,4,4,4,16], index: 3, kind: output, shape index: {}]  }
   0x1   :  { %10 = vsyncpa [#allocation4 + $0x1], 0 }
   0x2   :  { %11 = vsyncpa [#allocation7], 0 }
   0x3   :  { %12 = vsyncpa [#allocation5], 0 }
   0x4   :  { %14 = vsyncpa [#allocation5 + $0x1], 0  ;;  %s4236_s12 = smov 0   ;;  %s4238_s13 = smov 0  }
   0x5   :  { %s4240_s14 = smov 0   ;;  %s4242_s15 = smov 0  }
   0x6 LB: > { %s4257_s16 = sadd.s32 4294967295, %s4204_s15   ;;  %s3791_s17 = sadd.s32 4294967294, %s4204_s15   ;;  %s4204_s15 = sphi %s4242_s15, %s7078_s15   ;;  %s4200_s14 = sphi %s4240_s14, %s7077_s14   ;;  %s4196_s13 = sphi %s4238_s13, %s7076_s13   ;;  %s4192_s12 = sphi %s4236_s12, %s7075_s12  }
   0x7   : > { %p40_p0 = scmp.ne.s32.totalorder %s4196_s13, %s4192_s12  ;;  %p6677_p1 = scmp.eq.s32.totalorder %s4257_s16, 0 }
   0x8   : > { %p112_p3 = scmp.eq.s32.totalorder %s3791_s17, 1  ;;  %p3792_p5 = scmp.ge.s32.totalorder %s4204_s15, 1 }
   0x9   : > { %p4266_p4 = por %p6677_p1, %p40_p0  ;;  %p119_p7 = scmp.lt.s32.totalorder %s4204_s15, 3 }
   0xa   : > { %p4271_p6 = por %p112_p3, %p40_p0  ;;  %s4206_s21 = smov [#allocation6]  }
   0xb   : > { %s6763_s18 = scalar_select %p4266_p4, 1, 0 }
   0xc   : > { %s6764_s19 = scalar_select %p4271_p6, 1, 0 }
   0xd   : > { %p4276_p8 = pnand %p3792_p5, %p119_p7  ;;  %s131_s22 = sshll.u32 %s4206_s21, 4  ;;  %s4280_s22 = int_to_ptr.vmem [resolvable:$true] %s131_s22 }
   0xe   : > { %s4207_s24 = smov [#allocation8]   ;;  %s4048_s28 = scalar_lea.hbm %s6674_s1, 128 }
   0xf   : > { %p3977_p9 = pneg %p4276_p8  ;;  %s144_s25 = sshll.u32 %s4207_s24, 4  ;;  %s4291_s25 = int_to_ptr.vmem [resolvable:$true] %s144_s25 }
  0x10   : > { %p4049_p12 = scmp.ne.s32.totalorder %s6674_s1, %s4048_s28  ;;  %p4055_p5 = scmp.lt.u32.totalorder %s4048_s28, %s6674_s1 }
  0x11   : > { %p4287_p11 = pnand %p3977_p9, %p6677_p1 }
  0x13   : > { %p4050_p13 = pneg %p4287_p11 }
  0x15   : > { %p4051_p0 = pnand %p4050_p13, %p4049_p12 }
  0x17   : > { %p4052_p3 = pneg %p4051_p0 }
  0x19   : > { %p4057_p7 = pnand %p4055_p5, %p4052_p3 }
  0x1b   : > { %4060 = shalt.err (!%p4057_p7)
}
  0x1c   : > { %s4061_s6 = scalar_lea.vmem %s4280_s22, 128  ;;  %p4069_p2 = scmp.lt.s32.totalorder %s4280_s22, %s4280_s22 }
  0x1d   : > { %p4062_p9 = scmp.ne.s32.totalorder %s4280_s22, %s4061_s6  ;;  %p4070_p12 = scmp.lt.s32.totalorder %s4061_s6, %s4061_s6 }
  0x1f   : > { %p4064_p10 = pnand %p4062_p9, %p4050_p13  ;;  %p4071_p0 = por %p4070_p12, %p4069_p2 }
  0x21   : > { %p4065_p1 = pneg %p4064_p10 }
  0x23   : > { %p4072_p6 = pnand %p4071_p0, %p4065_p1 }
  0x25   : > { %4075 = shalt.err (!%p4072_p6)
}
  0x26   : > { %s4208_s7 = smov 64   ;;  %s4209_s8 = smov 4  }
  0x27   : > { %3980 = dma.hbm_to_vmem [thread:$0]  (!%p4287_p11), %s6674_s1, 128, %s4280_s22, [#allocation7], %s4208_s7, %s4208_s7, %s4209_s8  }
  0x28   : > { %s4076_s21 = scalar_lea.hbm %s6675_s2, 128 }
  0x29   : > { %p4077_p2 = scmp.ne.s32.totalorder %s6675_s2, %s4076_s21  ;;  %p4083_p10 = scmp.lt.u32.totalorder %s4076_s21, %s6675_s2 }
  0x2b   : > { %p4079_p1 = pnand %p4077_p2, %p4050_p13 }
  0x2d   : > { %p4080_p6 = pneg %p4079_p1 }
  0x2f   : > { %p4085_p3 = pnand %p4083_p10, %p4080_p6 }
  0x31   : > { %4088 = shalt.err (!%p4085_p3)
}
  0x32   : > { %s4089_s22 = scalar_lea.vmem %s4291_s25, 128  ;;  %p4097_p12 = scmp.lt.s32.totalorder %s4291_s25, %s4291_s25 }
  0x33   : > { %p4090_p5 = scmp.ne.s32.totalorder %s4291_s25, %s4089_s22  ;;  %p4098_p0 = scmp.lt.s32.totalorder %s4089_s22, %s4089_s22 }
  0x35   : > { %p4092_p7 = pnand %p4090_p5, %p4050_p13  ;;  %p4099_p2 = por %p4098_p0, %p4097_p12 }
  0x37   : > { %p4093_p9 = pneg %p4092_p7 }
  0x39   : > { %p4100_p1 = pnand %p4099_p2, %p4093_p9 }
  0x3b   : > { %4103 = shalt.err (!%p4100_p1)
}
  0x3c   : > { %3983 = dma.hbm_to_vmem [thread:$0]  (!%p4287_p11), %s6675_s2, 128, %s4291_s25, [#allocation7], %s4208_s7, %s4208_s7, %s4209_s8  }
  0x3d   : > { %s4346_s4 = sadd.s32 1, %s4204_s15   ;;  %s27_s23 = sadd.s32 1, %s4200_s14 }
  0x3e   : > { %s24_s5 = ssub.s32 %s4204_s15, %s4346_s4  ;;  %p34_p13 = scmp.ne.s32.totalorder %s4200_s14, %s4196_s13 }
  0x3f   : > { %p25_p6 = scmp.eq.s32.totalorder %s24_s5, 0  ;;  %p35_p10 = scmp.eq.s32.totalorder %s4204_s15, 0 }
  0x40   : > { %p6767_p3 = scmp.eq.s32.totalorder %s4257_s16, 1  ;;  %p3994_p7 = scmp.lt.s32.totalorder %s4204_s15, 2 }
  0x41   : > { %s4362_s9 = scalar_select %p25_p6, %s4200_s14, %s27_s23  }
  0x42   : > { %p4356_p5 = por %p6767_p3, %p34_p13  ;;  %p36_p9 = por %p35_p10, %p34_p13 }
  0x43   : > { %s158_s10 = sand.u32 1, %s4200_s14   ;;  %s3847_s25 = sshll.u32 %s4204_s15, 13 }
  0x44   : > { %s6768_s6 = scalar_select %p4356_p5, 1, 0 }
  0x45   : > { %s3796_s11 = sshll.u32 %s158_s10, 9  ;;  %s4369_s17 = scalar_lea.hbm %s6673_s0, %s3847_s25 }
  0x46   : > { %s162_s21 = scalar_lea.vmem [#allocation3], %s3796_s11  ;;  %p4373_p11 = pnand %p3994_p7, %p36_p9 }
  0x47   : > { %s169_s24 = sshll.u32 %s162_s21, 4  ;;  %s4377_s27 = scalar_lea.sflag [#allocation4], %s158_s10  ;;  %s4371_s24 = int_to_ptr.vmem [resolvable:$true] %s169_s24 }
  0x48   : > { %s4104_s28 = scalar_lea.hbm %s4369_s17, 8192  ;;  %p4106_p0 = pneg %p4373_p11 }
  0x49   : > { %p4105_p12 = scmp.ne.s32.totalorder %s4369_s17, %s4104_s28  ;;  %s4109_s30 = scalar_lea.hbm %s6673_s0, 16384 }
  0x4a   : > { %p4110_p13 = scmp.lt.u32.totalorder %s4369_s17, %s6673_s0  ;;  %p4111_p6 = scmp.lt.u32.totalorder %s4109_s30, %s4104_s28 }
  0x4b   : > { %p4107_p2 = pnand %p4106_p0, %p4105_p12  ;;  %p4113_p3 = scmp.lt.u32.totalorder %s4104_s28, %s4369_s17 }
  0x4c   : > { %p4112_p10 = por %p4111_p6, %p4110_p13 }
  0x4d   : > { %p4108_p1 = pneg %p4107_p2 }
  0x4e   : > { %p4114_p7 = por %p4113_p3, %p4112_p10 }
  0x50   : > { %p4115_p9 = pnand %p4114_p7, %p4108_p1 }
  0x52   : > { %4118 = shalt.err (!%p4115_p9)
}
  0x53   : > { %s4119_s10 = scalar_lea.vmem %s4371_s24, 8192  ;;  %s4210_s11 = smov [#allocation3]  }
  0x54   : > { %p4120_p12 = scmp.ne.s32.totalorder %s4371_s24, %s4119_s10  ;;  %s4124_s25 = sshll.u32 %s4210_s11, 4  ;;  %s4125_s25 = int_to_ptr.vmem [resolvable:$false] %s4124_s25 }
  0x55   : > { %s4126_s7 = scalar_lea.vmem %s4125_s25, 16384  ;;  %p4127_p4 = scmp.lt.s32.totalorder %s4371_s24, %s4125_s25 }
  0x56   : > { %p4122_p2 = pnand %p4120_p12, %p4106_p0  ;;  %p4128_p13 = scmp.lt.s32.totalorder %s4126_s7, %s4119_s10 }
  0x58   : > { %p4123_p5 = pneg %p4122_p2  ;;  %p4129_p6 = por %p4128_p13, %p4127_p4 }
  0x5a   : > { %p4130_p10 = pnand %p4129_p6, %p4123_p5 }
  0x5c   : > { %4133 = shalt.err (!%p4130_p10)
}
  0x5d   : > { %s4211_s8 = smov 128   ;;  %s4212_s21 = smov 8  }
  0x5e   : > { %3987 = dma.hbm_to_vmem [thread:$0]  (!%p4373_p11), %s4369_s17, 8192, %s4371_s24, %s4377_s27, %s4211_s8, %s4211_s8, %s4212_s21  }
  0x5f   : > { %181 = sbr.rel (%p4276_p8) target bundleno = 1068 (0x42c), region = 32 }
  0x66   : > { %s4408_s28 = sand.u32 1, %s4196_s13   ;;  %p6770_p4 = scmp.ne.s32.totalorder %s6763_s18, 0 }
  0x67   : > { %s3800_s22 = sshll.u32 %s4408_s28, 9  ;;  %s184_s29 = scalar_lea.sflag [#allocation4], %s4408_s28 }
  0x68   : > { %s4412_s30 = scalar_lea.vmem [#allocation3], %s3800_s22 }
  0x69   : > { %4179 = dma.done.wait (%p6770_p4), %s184_s29, 8192  }
  0x6a   : > { %4181 = vsyncadd (%p6770_p4), %s184_s29, 4294959104  ;;  %p6771_p5 = scmp.eq.s32.totalorder %s4257_s16, 0 }
  0x6c   : > { %4183 = dma.done.wait (%p6771_p5), [#allocation7], 256   ;;  %p6772_p8 = pmov %p6771_p5 }
  0x6d   : > { %v4038_v0 = vld [vmem:[#allocation6] sm:$0xff]   ;;  %v220_v2 = vld [vmem:[%s4412_s30 + $0x8] sm:$0xff]  ;;  %vm323_vm0 = vcmask 130048   ;;  %v221_v3 = vld [vmem:[%s4412_s30 + $0x10] sm:$0xff]  ;;  %s3803_s18 = sshll.u32 %s4408_s28, 6  ;;  %s3848_s17 = sshll.u32 %s4257_s16, 10 }
  0x6e   : > { %4185 = vsyncadd (%p6772_p8), [#allocation7], 4294967040  ;;  %v219_v1 = vld [vmem:[%s4412_s30] sm:$0xff]  ;;  %3887 = vmatprep.subr.bf16.mxu0 %v4038_v0  ;;  %3963 = vmatprep.subr.bf16.mxu1 %v4038_v0  ;;  %v222_v5 = vld [vmem:[%s4412_s30 + $0x18] sm:$0xff]  ;;  %s6588_s20 = scalar_lea.vmem [#allocation9], %s3803_s18  ;;  %s6619_s27 = scalar_lea.hbm %s6676_s3, %s3848_s17 }
  0x6f   : > { %v283_v4 = vpack.c.bf16 %v220_v2, %v219_v1  ;;  %v255_v6 = vld [vmem:[%s4412_s30 + $0x120] sm:$0xff]  ;;  %v256_v7 = vld [vmem:[%s4412_s30 + $0x128] sm:$0xff]  ;;  %3888 = vmatpush3.bf16.msra.mxu0 %v4038_v0  ;;  %3964 = vmatpush3.bf16.msra.mxu1 %v4038_v0  ;;  %v284_v8 = vpack.c.bf16 %v222_v5, %v221_v3  ;;  %v257_v10 = vld [vmem:[%s4412_s30 + $0x130] sm:$0xff]  ;;  %s3699_s24 = sshll.u32 %s6588_s20, 4  ;;  %s3686_s23 = scalar_lea.sflag [#allocation5], %s4408_s28  ;;  %s6621_s24 = int_to_ptr.vmem [resolvable:$true] %s3699_s24 }
  0x70   : > { %v301_v9 = vpack.c.bf16 %v256_v7, %v255_v6  ;;  %v258_v11 = vld [vmem:[%s4412_s30 + $0x138] sm:$0xff]  ;;  %v223_v12 = vld [vmem:[%s4412_s30 + $0x20] sm:$0xff]  ;;  %v224_v14 = vld [vmem:[%s4412_s30 + $0x28] sm:$0xff]  ;;  %s4134_s5 = scalar_lea.vmem %s6621_s24, 1024  ;;  %p7072_p0 = scmp.ne.s32.totalorder %s6768_s6, 0 }
  0x71   : > { %3889 = vmatprep.mubr.msk.bf16.mxu0 %vm323_vm0, %v283_v4  ;;  %v302_v13 = vpack.c.bf16 %v258_v11, %v257_v10  ;;  %v285_v15 = vpack.c.bf16 %v224_v14, %v223_v12  ;;  %v259_v16 = vld [vmem:[%s4412_s30 + $0x140] sm:$0xff]  ;;  %v260_v17 = vld [vmem:[%s4412_s30 + $0x148] sm:$0xff]  ;;  %v225_v18 = vld [vmem:[%s4412_s30 + $0x30] sm:$0xff]  ;;  %p4135_p11 = scmp.ne.s32.totalorder %s6621_s24, %s4134_s5  ;;  %s4213_s10 = smov [#allocation9]  }
  0x72   : > { %3925 = vmatprep.mubr.msk.bf16.mxu1 %vm323_vm0, %v301_v9  ;;  %3890 = vmatmul.mubr.msk.bf16.vlgmr.msra.gmra.mrb[0].mxu0 %vm323_vm0, %v284_v8  ;;  %v226_v19 = vld [vmem:[%s4412_s30 + $0x38] sm:$0xff]  ;;  %v303_v20 = vpack.c.bf16 %v260_v17, %v259_v16  ;;  %v261_v21 = vld [vmem:[%s4412_s30 + $0x150] sm:$0xff]  ;;  %v227_v23 = vld [vmem:[%s4412_s30 + $0x40] sm:$0xff]  ;;  %s4138_s11 = sshll.u32 %s4213_s10, 4  ;;  %s4139_s11 = int_to_ptr.vmem [resolvable:$false] %s4138_s11 }
  0x73   : > { %3926 = vmatmul.mubr.msk.bf16.vlgmr.msra.gmra.mrb[0].mxu1 %vm323_vm0, %v302_v13  ;;  %3893 = vmatprep.mubr.msk.bf16.mxu0 %vm323_vm0, %v285_v15  ;;  %v262_v22 = vld [vmem:[%s4412_s30 + $0x158] sm:$0xff]  ;;  %v228_v24 = vld [vmem:[%s4412_s30 + $0x48] sm:$0xff]  ;;  %v263_v25 = vld [vmem:[%s4412_s30 + $0x160] sm:$0xff]  ;;  %v286_v27 = vpack.c.bf16 %v226_v19, %v225_v18  ;;  %p4136_p1 = pnand %p4135_p11, %p7072_p0  ;;  %s4140_s25 = scalar_lea.vmem %s4139_s11, 2048 }
  0x74   : > { %3929 = vmatprep.mubr.msk.bf16.mxu1 %vm323_vm0, %v303_v20  ;;  %v264_v26 = vld [vmem:[%s4412_s30 + $0x168] sm:$0xff]  ;;  %v304_v28 = vpack.c.bf16 %v262_v22, %v261_v21  ;;  %v287_v29 = vpack.c.bf16 %v228_v24, %v227_v23  ;;  %v229_v31 = vld [vmem:[%s4412_s30 + $0x50] sm:$0xff]  ;;  %v230_v32 = vld [vmem:[%s4412_s30 + $0x58] sm:$0xff]  ;;  %p4141_p7 = scmp.lt.s32.totalorder %s6621_s24, %s4139_s11  ;;  %p4142_p9 = scmp.lt.s32.totalorder %s4140_s25, %s4134_s5 }
  0x75   : > { %v305_v30 = vpack.c.bf16 %v264_v26, %v263_v25  ;;  %v265_v33 = vld [vmem:[%s4412_s30 + $0x170] sm:$0xff]  ;;  %v266_v34 = vld [vmem:[%s4412_s30 + $0x178] sm:$0xff]  ;;  %v231_v35 = vld [vmem:[%s4412_s30 + $0x60] sm:$0xff]  ;;  %v288_v39 = vpack.c.bf16 %v230_v32, %v229_v31  ;;  %p4137_p3 = pneg %p4136_p1 }
  0x76   : > { %v232_v36 = vld [vmem:[%s4412_s30 + $0x68] sm:$0xff]  ;;  %v267_v37 = vld [vmem:[%s4412_s30 + $0x180] sm:$0xff]  ;;  %v306_v40 = vpack.c.bf16 %v266_v34, %v265_v33  ;;  %v233_v43 = vld [vmem:[%s4412_s30 + $0x70] sm:$0xff]  ;;  %p4143_p12 = por %p4142_p9, %p4141_p7 }
  0x77   : > { %v268_v38 = vld [vmem:[%s4412_s30 + $0x188] sm:$0xff]  ;;  %v289_v41 = vpack.c.bf16 %v232_v36, %v231_v35  ;;  %v234_v44 = vld [vmem:[%s4412_s30 + $0x78] sm:$0xff]  ;;  %v269_v45 = vld [vmem:[%s4412_s30 + $0x190] sm:$0xff] }
  0x78   : > { %v307_v42 = vpack.c.bf16 %v268_v38, %v267_v37  ;;  %v270_v46 = vld [vmem:[%s4412_s30 + $0x198] sm:$0xff]  ;;  %v235_v47 = vld [vmem:[%s4412_s30 + $0x80] sm:$0xff]  ;;  %v236_v48 = vld [vmem:[%s4412_s30 + $0x88] sm:$0xff]  ;;  %v290_v51 = vpack.c.bf16 %v234_v44, %v233_v43  ;;  %p4144_p2 = pnand %p4143_p12, %p4137_p3 }
  0x79   : > { %v271_v49 = vld [vmem:[%s4412_s30 + $0x1a0] sm:$0xff]  ;;  %v272_v50 = vld [vmem:[%s4412_s30 + $0x1a8] sm:$0xff]  ;;  %v308_v52 = vpack.c.bf16 %v270_v46, %v269_v45  ;;  %v291_v53 = vpack.c.bf16 %v236_v48, %v235_v47  ;;  %v237_v55 = vld [vmem:[%s4412_s30 + $0x90] sm:$0xff] }
  0x7a   : > { %3894 = vmatmul.mubr.msk.bf16.gmra.mrb[4].mxu0 %vm323_vm0, %v286_v27  ;;  %v309_v54 = vpack.c.bf16 %v272_v50, %v271_v49  ;;  %v238_v56 = vld [vmem:[%s4412_s30 + $0x98] sm:$0xff]  ;;  %v273_v57 = vld [vmem:[%s4412_s30 + $0x1b0] sm:$0xff]  ;;  %v239_v59 = vld [vmem:[%s4412_s30 + $0xa0] sm:$0xff] }
  0x7b   : > { %3930 = vmatmul.mubr.msk.bf16.gmra.mrb[4].mxu1 %vm323_vm0, %v304_v28  ;;  %3897 = vmatprep.mubr.msk.bf16.mxu0 %vm323_vm0, %v287_v29  ;;  %v274_v58 = vld [vmem:[%s4412_s30 + $0x1b8] sm:$0xff]  ;;  %v240_v60 = vld [vmem:[%s4412_s30 + $0xa8] sm:$0xff]  ;;  %v275_v61 = vld [vmem:[%s4412_s30 + $0x1c0] sm:$0xff]  ;;  %v292_v63 = vpack.c.bf16 %v238_v56, %v237_v55 }
  0x7c   : > { %3933 = vmatprep.mubr.msk.bf16.mxu1 %vm323_vm0, %v305_v30  ;;  %v276_v62 = vld [vmem:[%s4412_s30 + $0x1c8] sm:$0xff]  ;;  %v310_v0 = vpack.c.bf16 %v274_v58, %v273_v57  ;;  %v293_v1 = vpack.c.bf16 %v240_v60, %v239_v59  ;;  %v241_v3 = vld [vmem:[%s4412_s30 + $0xb0] sm:$0xff]  ;;  %v242_v4 = vld [vmem:[%s4412_s30 + $0xb8] sm:$0xff] }
  0x7d   : > { %v311_v2 = vpack.c.bf16 %v276_v62, %v275_v61  ;;  %v277_v5 = vld [vmem:[%s4412_s30 + $0x1d0] sm:$0xff]  ;;  %v278_v6 = vld [vmem:[%s4412_s30 + $0x1d8] sm:$0xff]  ;;  %v243_v7 = vld [vmem:[%s4412_s30 + $0xc0] sm:$0xff]  ;;  %v294_v11 = vpack.c.bf16 %v242_v4, %v241_v3 }
  0x7e   : > { %v244_v8 = vld [vmem:[%s4412_s30 + $0xc8] sm:$0xff]  ;;  %v279_v9 = vld [vmem:[%s4412_s30 + $0x1e0] sm:$0xff]  ;;  %v312_v12 = vpack.c.bf16 %v278_v6, %v277_v5  ;;  %v245_v15 = vld [vmem:[%s4412_s30 + $0xd0] sm:$0xff] }
  0x7f   : > { %v280_v10 = vld [vmem:[%s4412_s30 + $0x1e8] sm:$0xff]  ;;  %v295_v13 = vpack.c.bf16 %v244_v8, %v243_v7  ;;  %v246_v16 = vld [vmem:[%s4412_s30 + $0xd8] sm:$0xff]  ;;  %v281_v17 = vld [vmem:[%s4412_s30 + $0x1f0] sm:$0xff] }
  0x80   : > { %v313_v14 = vpack.c.bf16 %v280_v10, %v279_v9  ;;  %v282_v18 = vld [vmem:[%s4412_s30 + $0x1f8] sm:$0xff]  ;;  %v247_v19 = vld [vmem:[%s4412_s30 + $0xe0] sm:$0xff]  ;;  %v248_v20 = vld [vmem:[%s4412_s30 + $0xe8] sm:$0xff]  ;;  %v296_v21 = vpack.c.bf16 %v246_v16, %v245_v15 }
  0x81   : > { %v314_v22 = vpack.c.bf16 %v282_v18, %v281_v17  ;;  %v297_v23 = vpack.c.bf16 %v248_v20, %v247_v19  ;;  %v249_v24 = vld [vmem:[%s4412_s30 + $0xf0] sm:$0xff]  ;;  %v250_v25 = vld [vmem:[%s4412_s30 + $0xf8] sm:$0xff]  ;;  %v251_v26 = vld [vmem:[%s4412_s30 + $0x100] sm:$0xff] }
  0x82   : > { %3898 = vmatmul.mubr.msk.bf16.gmra.mrb[8].mxu0 %vm323_vm0, %v288_v39  ;;  %v252_v27 = vld [vmem:[%s4412_s30 + $0x108] sm:$0xff]  ;;  %v298_v28 = vpack.c.bf16 %v250_v25, %v249_v24  ;;  %v253_v30 = vld [vmem:[%s4412_s30 + $0x110] sm:$0xff]  ;;  %v254_v31 = vld [vmem:[%s4412_s30 + $0x118] sm:$0xff] }
  0x83   : > { %3934 = vmatmul.mubr.msk.bf16.gmra.mrb[8].mxu1 %vm323_vm0, %v306_v40  ;;  %3901 = vmatprep.mubr.msk.bf16.mxu0 %vm323_vm0, %v289_v41  ;;  %v299_v29 = vpack.c.bf16 %v252_v27, %v251_v26  ;;  %v300_v32 = vpack.c.bf16 %v254_v31, %v253_v30 }
  0x84   : > { %3937 = vmatprep.mubr.msk.bf16.mxu1 %vm323_vm0, %v307_v42 }
  0x8a   : > { %3902 = vmatmul.mubr.msk.bf16.gmra.mrb[12].mxu0 %vm323_vm0, %v290_v51 }
  0x8b   : > { %3938 = vmatmul.mubr.msk.bf16.gmra.mrb[12].mxu1 %vm323_vm0, %v308_v52  ;;  %3905 = vmatprep.mubr.msk.bf16.mxu0 %vm323_vm0, %v291_v53 }
  0x8c   : > { %3941 = vmatprep.mubr.msk.bf16.mxu1 %vm323_vm0, %v309_v54 }
  0x92   : > { %3906 = vmatmul.mubr.msk.bf16.gmra.mrb[16].mxu0 %vm323_vm0, %v292_v63 }
  0x93   : > { %3942 = vmatmul.mubr.msk.bf16.gmra.mrb[16].mxu1 %vm323_vm0, %v310_v0  ;;  %3909 = vmatprep.mubr.msk.bf16.mxu0 %vm323_vm0, %v293_v1 }
  0x94   : > { %3945 = vmatprep.mubr.msk.bf16.mxu1 %vm323_vm0, %v311_v2 }
  0x9a   : > { %3910 = vmatmul.mubr.msk.bf16.gmra.mrb[20].mxu0 %vm323_vm0, %v294_v11 }
  0x9b   : > { %3946 = vmatmul.mubr.msk.bf16.gmra.mrb[20].mxu1 %vm323_vm0, %v312_v12  ;;  %3913 = vmatprep.mubr.msk.bf16.mxu0 %vm323_vm0, %v295_v13 }
  0x9c   : > { %3949 = vmatprep.mubr.msk.bf16.mxu1 %vm323_vm0, %v313_v14 }
  0xa2   : > { %3914 = vmatmul.mubr.msk.bf16.gmra.mrb[24].mxu0 %vm323_vm0, %v296_v21 }
  0xa3   : > { %3950 = vmatmul.mubr.msk.bf16.gmra.mrb[24].mxu1 %vm323_vm0, %v314_v22  ;;  %3917 = vmatprep.mubr.msk.bf16.mxu0 %vm323_vm0, %v297_v23 }
  0xaa   : > { %3918 = vmatmul.mubr.msk.bf16.gmra.mrb[28].mxu0 %vm323_vm0, %v298_v28 }
  0xab   : > { %3921 = vmatprep.mubr.msk.bf16.mxu0 %vm323_vm0, %v299_v29 }
  0xb2   : > { %3922 = vmatmul.mubr.msk.bf16.gmra.mrb[32].mxu0 %vm323_vm0, %v300_v32 }
 0x145   : > { %v3891_v33 = vpop.f32.mrb[0].mxu0 }
 0x146   : > { %v4518_v34 = vpop.f32.mrb[0].mxu1  ;;  %v711_v35 = vand.u32 2147483647, %v3891_v33  ;;  %v1020_v36 = vrot.slane %v3891_v33, 7  ;;  %v454_v37 = vpop.f32.mrb[1].mxu0 }
 0x147   : > { %v4521_v38 = vand.u32 2147483647, %v4518_v34  ;;  %v709_v39 = vand.u32 2147483647, %v454_v37  ;;  %v1018_v40 = vrot.slane %v454_v37, 7  ;;  %v3892_v41 = vpop.f32.mrb[2].mxu0 }
 0x148   : > { %v1052_v42 = vrot.slane %v4518_v34, 7  ;;  %v4524_v43 = vpop.f32.mrb[1].mxu1  ;;  %v824_v44 = vrot.slane %v711_v35, 7  ;;  %v1167_v45 = vrot.slane %v711_v35, 1  ;;  %v712_v46 = vand.u32 2147483647, %v3892_v41 }
 0x149   : > { %v1021_v47 = vrot.slane %v3892_v41, 7  ;;  %v457_v48 = vpop.f32.mrb[3].mxu0  ;;  %v822_v49 = vrot.slane %v709_v39, 7  ;;  %v1165_v50 = vrot.slane %v709_v39, 1  ;;  %v4526_v53 = vpop.f32.mrb[2].mxu1 }
 0x14a   : > { %v710_v51 = vand.u32 2147483647, %v457_v48  ;;  %v1019_v52 = vrot.slane %v457_v48, 7  ;;  %vm922_vm1 = vcmp.gt.f32.partialorder %v711_v35, %v824_v44  ;;  %v4528_v54 = vmax.f32 %v711_v35, %v1167_v45  ;;  %v4530_v57 = vpop.f32.mrb[3].mxu1 }
 0x14b   : > { %v825_v55 = vrot.slane %v712_v46, 7  ;;  %v1168_v56 = vrot.slane %v712_v46, 1  ;;  %v1118_v58 = vsel %vm922_vm1, %v3891_v33, %v1020_v36  ;;  %vm920_vm2 = vcmp.gt.f32.partialorder %v709_v39, %v822_v49 }
 0x14c   : > { %v4532_v59 = vmax.f32 %v709_v39, %v1165_v50  ;;  %v823_v60 = vrot.slane %v710_v51, 7  ;;  %v1576_v61 = vrot.slane %v1118_v58, 1  ;;  %v1116_v62 = vsel %vm920_vm2, %v454_v37, %v1018_v40 }
 0x14d   : > { %vm923_vm3 = vcmp.gt.f32.partialorder %v712_v46, %v825_v55  ;;  %v4534_v63 = vmax.f32 %v712_v46, %v1168_v56  ;;  %v1680_v0 = vrot.slane %v1116_v62, 1  ;;  %v1166_v2 = vrot.slane %v710_v51, 1  ;;  %v3895_v3 = vpop.f32.mrb[4].mxu0 }
 0x14e   : > { %v1119_v1 = vsel %vm923_vm3, %v3892_v41, %v1021_v47  ;;  %vm921_vm4 = vcmp.gt.f32.partialorder %v710_v51, %v823_v60  ;;  %v4536_v4 = vpop.f32.mrb[4].mxu1  ;;  %v715_v7 = vand.u32 2147483647, %v3895_v3  ;;  %v470_v8 = vpop.f32.mrb[5].mxu0  ;;  %v1024_v12 = vrot.slane %v3895_v3, 7 }
 0x14f   : > { %vm1479_vm5 = vcmp.gt.f32.partialorder %v4534_v63, %v4528_v54  ;;  %v1577_v5 = vrot.slane %v1119_v1, 1  ;;  %v1117_v6 = vsel %vm921_vm4, %v457_v48, %v1019_v52  ;;  %v4540_v9 = vpop.f32.mrb[5].mxu1  ;;  %v4542_v10 = vmax.f32 %v710_v51, %v1166_v2  ;;  %v3896_v14 = vpop.f32.mrb[6].mxu0 }
 0x150   : > { %v1575_v11 = vrot.slane %v1117_v6, 1  ;;  %v713_v13 = vand.u32 2147483647, %v470_v8  ;;  %v4544_v15 = vpop.f32.mrb[6].mxu1  ;;  %v828_v17 = vrot.slane %v715_v7, 7  ;;  %v1171_v18 = vrot.slane %v715_v7, 1 }
 0x151   : > { %v4546_v16 = vsel %vm1479_vm5, %v1577_v5, %v1576_v61  ;;  %v1022_v19 = vrot.slane %v470_v8, 7  ;;  %v473_v20 = vpop.f32.mrb[7].mxu0  ;;  %v4548_v21 = vpop.f32.mrb[7].mxu1  ;;  %vm1477_vm6 = vcmp.gt.f32.partialorder %v4542_v10, %v4532_v59  ;;  %vm1478_vm7 = vcmp.gt.f32.partialorder %v4528_v54, %v4542_v10 }
 0x152   : > { %v826_v22 = vrot.slane %v713_v13, 7  ;;  %v1169_v23 = vrot.slane %v713_v13, 1  ;;  %v4554_v24 = vsel %vm1477_vm6, %v1575_v11, %v1680_v0  ;;  %v4556_v25 = vsel %vm1478_vm7, %v1576_v61, %v1575_v11 }
 0x153   : > { %vm926_vm8 = vcmp.gt.f32.partialorder %v715_v7, %v828_v17  ;;  %v4558_v26 = vmax.f32 %v715_v7, %v1171_v18  ;;  %v716_v29 = vand.u32 2147483647, %v3896_v14  ;;  %v1347_v32 = vrot.slane %v3896_v14, 7 }
 0x154   : > { %v1122_v27 = vsel %vm926_vm8, %v3895_v3, %v1024_v12  ;;  %vm924_vm9 = vcmp.gt.f32.partialorder %v713_v13, %v826_v22  ;;  %v4560_v28 = vmax.f32 %v713_v13, %v1169_v23  ;;  %v714_v33 = vand.u32 2147483647, %v473_v20 }
 0x155   : > { %v1580_v30 = vrot.slane %v1122_v27, 1  ;;  %v1120_v31 = vsel %vm924_vm9, %v470_v8, %v1022_v19  ;;  %v1319_v36 = vrot.slane %v716_v29, 7  ;;  %v1368_v37 = vrot.slane %v716_v29, 1  ;;  %v3899_v39 = vpop.f32.mrb[8].mxu0 }
 0x156   : > { %vm1480_vm10 = vcmp.gt.f32.partialorder %v4560_v28, %v4534_v63  ;;  %v1578_v35 = vrot.slane %v1120_v31, 1  ;;  %v4564_v40 = vpop.f32.mrb[8].mxu1  ;;  %v827_v41 = vrot.slane %v714_v33, 7  ;;  %v1023_v44 = vrot.slane %v473_v20, 7  ;;  %v486_v47 = vpop.f32.mrb[9].mxu0 }
 0x157   : > { %v1170_v45 = vrot.slane %v714_v33, 1  ;;  %v856_v46 = vrot.slane %v4521_v38, 7  ;;  %v4567_v48 = vpop.f32.mrb[9].mxu1  ;;  %vm1333_vm11 = vcmp.gt.f32.partialorder %v716_v29, %v1319_v36  ;;  %v4571_v50 = vmax.f32 %v716_v29, %v1368_v37  ;;  %v4574_v52 = vpop.f32.mrb[10].mxu0 }
 0x158   : > { %v4569_v49 = vsel %vm1480_vm10, %v1578_v35, %v1577_v5  ;;  %v1199_v51 = vrot.slane %v4521_v38, 1  ;;  %v4576_v55 = vpop.f32.mrb[10].mxu1  ;;  %v1361_v56 = vsel %vm1333_vm11, %v3896_v14, %v1347_v32  ;;  %vm925_vm12 = vcmp.gt.f32.partialorder %v714_v33, %v827_v41  ;;  %v4581_v60 = vpop.f32.mrb[11].mxu0 }
 0x159   : > { %v4578_v58 = vmax.f32 %v714_v33, %v1170_v45  ;;  %vm954_vm13 = vcmp.gt.f32.partialorder %v4521_v38, %v856_v46  ;;  %v4583_v61 = vpop.f32.mrb[11].mxu1  ;;  %vm1483_vm14 = vcmp.gt.f32.partialorder %v4571_v50, %v4558_v26  ;;  %v1581_v62 = vrot.slane %v1361_v56, 1 }
 0x15a   : > { %v1121_v1 = vsel %vm925_vm12, %v473_v20, %v1023_v44  ;;  %v4598_v5 = vsel %vm954_vm13, %v4518_v34, %v1052_v42  ;;  %v719_v6 = vand.u32 2147483647, %v3899_v39  ;;  %v4605_v11 = vmax.f32 %v4521_v38, %v1199_v51 }
 0x15b   : > { %vm1481_vm15 = vcmp.gt.f32.partialorder %v4578_v58, %v4560_v28  ;;  %vm1482_vm1 = vcmp.gt.f32.partialorder %v4558_v26, %v4578_v58  ;;  %v1579_v2 = vrot.slane %v1121_v1, 1  ;;  %v4593_v3 = vsel %vm1483_vm14, %v1581_v62, %v1580_v30 }
 0x15c   : > { %v745_v12 = vand.u32 2147483647, %v4524_v43  ;;  %v831_v13 = vrot.slane %v719_v6, 7  ;;  %v1174_v14 = vrot.slane %v719_v6, 1  ;;  %v1050_v17 = vrot.slane %v4524_v43, 7 }
 0x15d   : > { %v4600_v7 = vsel %vm1481_vm15, %v1579_v2, %v1578_v35  ;;  %v4602_v8 = vsel %vm1482_vm1, %v1580_v30, %v1579_v2  ;;  %v4609_v18 = vand.u32 2147483647, %v486_v47  ;;  %v4611_v19 = vpop.f32.mrb[12].mxu0  ;;  %v1027_v34 = vrot.slane %v3899_v39, 7 }
 0x15e   : > { %v854_v42 = vrot.slane %v745_v12, 7  ;;  %v1197_v20 = vrot.slane %v745_v12, 1  ;;  %v748_v22 = vand.u32 2147483647, %v4526_v53  ;;  %v4614_v23 = vpop.f32.mrb[13].mxu0  ;;  %v6684_v38 = vrot.slane %v4598_v5, 1 }
 0x15f   : > { %vm929_vm2 = vcmp.gt.f32.partialorder %v719_v6, %v831_v13  ;;  %v829_v27 = vrot.slane %v4609_v18, 7  ;;  %v1025_v29 = vrot.slane %v486_v47, 7  ;;  %v4618_v30 = vpop.f32.mrb[14].mxu0  ;;  %v4620_v31 = vpop.f32.mrb[12].mxu1  ;;  %v4624_v33 = vmax.f32 %v719_v6, %v1174_v14 }
 0x160   : > { %v4622_v32 = vsel %vm929_vm2, %v3899_v39, %v1027_v34  ;;  %vm952_vm3 = vcmp.gt.f32.partialorder %v745_v12, %v854_v42  ;;  %v1323_v35 = vrot.slane %v748_v22, 7  ;;  %v4626_v36 = vpop.f32.mrb[15].mxu0  ;;  %v4628_v37 = vpop.f32.mrb[13].mxu1  ;;  %v4633_v44 = vmax.f32 %v745_v12, %v1197_v20 }
 0x161   : > { %v4631_v41 = vsel %vm952_vm3, %v4524_v43, %v1050_v17  ;;  %vm927_vm4 = vcmp.gt.f32.partialorder %v4609_v18, %v829_v27  ;;  %v1172_v45 = vrot.slane %v4609_v18, 1  ;;  %v4637_v46 = vpop.f32.mrb[14].mxu1  ;;  %v1351_v56 = vrot.slane %v4526_v53, 7 }
 0x162   : > { %6773 = vst [vmem:[#allocation13_spill] sm:$0xff] %v4631_v41  ;;  %6774 = vst [vmem:[#allocation14_spill] sm:$0xff] %v4633_v44  ;;  %vm1337_vm5 = vcmp.gt.f32.partialorder %v748_v22, %v1323_v35  ;;  %v4642_v62 = vpop.f32.mrb[15].mxu1  ;;  %v4644_v1 = vsel %vm927_vm4, %v486_v47, %v1025_v29  ;;  %v1372_v43 = vrot.slane %v748_v22, 1  ;;  %v720_v2 = vand.u32 2147483647, %v4574_v52 }
 0x163   : > { %6775 = vst [vmem:[#allocation15_spill] sm:$0xff] %v4642_v62  ;;  %v1028_v6 = vrot.slane %v4574_v52, 7  ;;  %v1365_v12 = vsel %vm1337_vm5, %v4526_v53, %v1351_v56  ;;  %v1745_v13 = vmax.f32 %v4528_v54, %v4534_v63  ;;  %v746_v14 = vand.u32 2147483647, %v4530_v57 }
 0x164   : > { %v1051_v17 = vrot.slane %v4530_v57, 7  ;;  %v1386_v34 = vmax.f32 %v748_v22, %v1372_v43  ;;  %v1609_v42 = vrot.slane %v1365_v12, 1  ;;  %v832_v20 = vrot.slane %v720_v2, 7 }
 0x165   : > { %v1175_v27 = vrot.slane %v720_v2, 1  ;;  %v4653_v47 = vpop.f32.mrb[16].mxu0  ;;  %v855_v35 = vrot.slane %v746_v14, 7  ;;  %v1198_v0 = vrot.slane %v746_v14, 1  ;;  %v718_v51 = vand.u32 2147483647, %v4581_v60 }
 0x166   : > { %6776 = vst [vmem:[#allocation16_spill] sm:$0xff] %v4653_v47  ;;  %v4655_v29 = vpop.f32.mrb[16].mxu1  ;;  %v1026_v53 = vrot.slane %v4581_v60, 7  ;;  %v4659_v56 = vpop.f32.mrb[17].mxu0  ;;  %vm1511_vm6 = vcmp.gt.f32.partialorder %v1386_v34, %v4605_v11  ;;  %v4663_v39 = vmax.f32 %v4605_v11, %v1386_v34  ;;  %vm930_vm7 = vcmp.gt.f32.partialorder %v720_v2, %v832_v20 }
 0x167   : > { %6777 = vst [vmem:[#allocation17_spill] sm:$0xff] %v4655_v29  ;;  %6778 = vst [vmem:[#allocation18_spill] sm:$0xff] %v4659_v56  ;;  %v4665_v22 = vmax.f32 %v720_v2, %v1175_v27  ;;  %v4667_v43 = vpop.f32.mrb[18].mxu0  ;;  %v4669_v12 = vpop.f32.mrb[17].mxu1  ;;  %v4673_v29 = vsel %vm1511_vm6, %v1609_v42, %v6684_v38  ;;  %v4676_v62 = vsel %vm930_vm7, %v4574_v52, %v1028_v6  ;;  %v830_v6 = vrot.slane %v718_v51, 7 }
 0x168   : > { %6779 = vst [vmem:[#allocation19_spill] sm:$0xff] %v4663_v39  ;;  %6780 = vst [vmem:[#allocation20_spill] sm:$0xff] %v4673_v29  ;;  %vm953_vm8 = vcmp.gt.f32.partialorder %v746_v14, %v855_v35  ;;  %v4678_v56 = vmax.f32 %v746_v14, %v1198_v0  ;;  %v4680_v47 = vpop.f32.mrb[19].mxu0  ;;  %v4682_v34 = vpop.f32.mrb[18].mxu1  ;;  %v6687_v2 = vrot.slane %v4676_v62, 1  ;;  %v6785_v14 = vrot.slane %v4622_v32, 1 }
 0x169   : > { %6781 = vst [vmem:[#allocation21_spill] sm:$0xff] %v4680_v47  ;;  %6782 = vst [vmem:[#allocation22_spill] sm:$0xff] %v4682_v34  ;;  %vm1486_vm9 = vcmp.gt.f32.partialorder %v4665_v22, %v4624_v33  ;;  %v4689_v20 = vmax.f32 %v4624_v33, %v4665_v22  ;;  %v1149_v42 = vsel %vm953_vm8, %v4530_v57, %v1051_v17  ;;  %v4692_v52 = vpop.f32.mrb[19].mxu1  ;;  %v1173_v35 = vrot.slane %v718_v51, 1 }
 0x16a   : > { %6784 = vst [vmem:[#allocation24_spill] sm:$0xff] %v4692_v52  ;;  %vm1509_vm10 = vcmp.gt.f32.partialorder %v4678_v56, %v4633_v44  ;;  %vm1510_vm11 = vcmp.gt.f32.partialorder %v4605_v11, %v4678_v56  ;;  %v1607_v0 = vrot.slane %v1149_v42, 1  ;;  %v4702_v27 = vsel %vm1486_vm9, %v6687_v2, %v6785_v14 }
 0x16b   : > { %6783 = vst [vmem:[#allocation23_spill] sm:$0xff] %v4689_v20  ;;  %6786 = vst [vmem:[#allocation25_spill] sm:$0xff] %v4702_v27  ;;  %vm1839_vm12 = vcmp.gt.f32.partialorder %v4689_v20, %v1745_v13  ;;  %v1743_v57 = vmax.f32 %v4532_v59, %v4542_v10  ;;  %v6787_v38 = vrot.slane %v4631_v41, 1  ;;  %v6789_v52 = vrot.slane %v4598_v5, 1 }
 0x16c   : > { %v4709_v17 = vsel %vm1839_vm12, %v4702_v27, %v4546_v16  ;;  %vm928_vm13 = vcmp.gt.f32.partialorder %v718_v51, %v830_v6  ;;  %v1270_v14 = vmax.f32 %v4609_v18, %v1172_v45  ;;  %v1681_v13 = vrot.slane %v4644_v1, 1 }
 0x16d   : > { %v4713_v42 = vsel %vm1509_vm10, %v1607_v0, %v6787_v38  ;;  %v4717_v34 = vsel %vm1510_vm11, %v6789_v52, %v1607_v0  ;;  %v1124_v2 = vsel %vm928_vm13, %v4581_v60, %v1026_v53  ;;  %v1271_v59 = vmax.f32 %v718_v51, %v1173_v35  ;;  %v4722_v20 = vpop.f32.mrb[20].mxu0 }
 0x16e   : > { %6788 = vst [vmem:[#allocation26_spill] sm:$0xff] %v4713_v42  ;;  %6790 = vst [vmem:[#allocation27_spill] sm:$0xff] %v4717_v34  ;;  %v4724_v16 = vpop.f32.mrb[20].mxu1  ;;  %v1582_v27 = vrot.slane %v1124_v2, 1  ;;  %v1744_v38 = vmax.f32 %v4542_v10, %v4528_v54  ;;  %v751_v5 = vand.u32 2147483647, %v4536_v4 }
 0x16f   : > { %6791 = vst [vmem:[#allocation28_spill] sm:$0xff] %v4722_v20  ;;  %6792 = vst [vmem:[#allocation29_spill] sm:$0xff] %v4724_v16  ;;  %v1055_v52 = vrot.slane %v4536_v4, 7  ;;  %v4730_v0 = vpop.f32.mrb[21].mxu0  ;;  %v4732_v18 = vpop.f32.mrb[21].mxu1  ;;  %vm1484_vm14 = vcmp.gt.f32.partialorder %v1271_v59, %v1270_v14  ;;  %vm1485_vm15 = vcmp.gt.f32.partialorder %v4624_v33, %v1271_v59  ;;  %v4735_v60 = vmax.f32 %v1270_v14, %v1271_v59 }
 0x170   : > { %6793 = vst [vmem:[#allocation30_spill] sm:$0xff] %v4730_v0  ;;  %6794 = vst [vmem:[#allocation31_spill] sm:$0xff] %v4732_v18  ;;  %v4738_v45 = vmax.f32 %v1271_v59, %v4624_v33  ;;  %v4740_v51 = vpop.f32.mrb[22].mxu0  ;;  %v4742_v1 = vpop.f32.mrb[22].mxu1  ;;  %v4744_v54 = vsel %vm1484_vm14, %v1582_v27, %v1681_v13  ;;  %v6800_v10 = vrot.slane %v4622_v32, 1  ;;  %v859_v2 = vrot.slane %v751_v5, 7 }
 0x171   : > { %6795 = vst [vmem:[#allocation32_spill] sm:$0xff] %v4735_v60  ;;  %6797 = vst [vmem:[#allocation34_spill] sm:$0xff] %v4740_v51  ;;  %v1202_v6 = vrot.slane %v751_v5, 1  ;;  %v4750_v35 = vpop.f32.mrb[23].mxu0  ;;  %v4752_v41 = vpop.f32.mrb[23].mxu1  ;;  %vm1837_vm1 = vcmp.gt.f32.partialorder %v4735_v60, %v1743_v57  ;;  %v1053_v13 = vrot.slane %v4540_v9, 7 }
 0x172   : > { %6796 = vst [vmem:[#allocation33_spill] sm:$0xff] %v4738_v45  ;;  %6798 = vst [vmem:[#allocation35_spill] sm:$0xff] %v4742_v1  ;;  %v4748_v53 = vsel %vm1485_vm15, %v6800_v10, %v1582_v27  ;;  %vm1838_vm2 = vcmp.gt.f32.partialorder %v4738_v45, %v1744_v38  ;;  %v749_v33 = vand.u32 2147483647, %v4540_v9  ;;  %v4759_v14 = vsel %vm1837_vm1, %v4744_v54, %v4554_v24 }
 0x173   : > { %6799 = vst [vmem:[#allocation36_spill] sm:$0xff] %v4744_v54  ;;  %6801 = vst [vmem:[#allocation37_spill] sm:$0xff] %v4748_v53  ;;  %v4763_v32 = vsel %vm1838_vm2, %v4748_v53, %v4556_v25  ;;  %vm957_vm3 = vcmp.gt.f32.partialorder %v751_v5, %v859_v2  ;;  %v4767_v59 = vmax.f32 %v751_v5, %v1202_v6  ;;  %v1056_v1 = vrot.slane %v4544_v15, 7 }
 0x174   : > { %6802 = vst [vmem:[#allocation38_spill] sm:$0xff] %v4750_v35  ;;  %6803 = vst [vmem:[#allocation39_spill] sm:$0xff] %v4752_v41  ;;  %v1153_v27 = vsel %vm957_vm3, %v4536_v4, %v1055_v52  ;;  %v857_v10 = vrot.slane %v749_v33, 7  ;;  %v1200_v38 = vrot.slane %v749_v33, 1  ;;  %v752_v41 = vand.u32 2147483647, %v4544_v15 }
 0x175   : > { %v1611_v57 = vrot.slane %v1153_v27, 1  ;;  %v750_v24 = vand.u32 2147483647, %v4548_v21  ;;  %v1054_v18 = vrot.slane %v4548_v21, 7  ;;  %v755_v4 = vand.u32 2147483647, %v4564_v40 }
 0x176   : > { %vm955_vm4 = vcmp.gt.f32.partialorder %v749_v33, %v857_v10  ;;  %v4773_v25 = vmax.f32 %v749_v33, %v1200_v38  ;;  %v1059_v52 = vrot.slane %v4564_v40, 7  ;;  %v4777_v5 = vpop.f32.mrb[24].mxu0  ;;  %v4779_v2 = vpop.f32.mrb[24].mxu1  ;;  %v860_v27 = vrot.slane %v752_v41, 7 }
 0x177   : > { %6804 = vst [vmem:[#allocation40_spill] sm:$0xff] %v4777_v5  ;;  %6805 = vst [vmem:[#allocation41_spill] sm:$0xff] %v4779_v2  ;;  %v1151_v6 = vsel %vm955_vm4, %v4540_v9, %v1053_v13  ;;  %v1203_v16 = vrot.slane %v752_v41, 1  ;;  %v858_v35 = vrot.slane %v750_v24, 7  ;;  %v4782_v51 = vpop.f32.mrb[25].mxu0  ;;  %v4784_v0 = vpop.f32.mrb[25].mxu1 }
 0x178   : > { %6806 = vst [vmem:[#allocation42_spill] sm:$0xff] %v4782_v51  ;;  %6807 = vst [vmem:[#allocation43_spill] sm:$0xff] %v4784_v0  ;;  %v1685_v10 = vrot.slane %v1151_v6, 1  ;;  %v1201_v33 = vrot.slane %v750_v24, 1  ;;  %v863_v38 = vrot.slane %v755_v4, 7  ;;  %v1206_v53 = vrot.slane %v755_v4, 1 }
 0x179   : > { %v4786_v54 = vpop.f32.mrb[26].mxu0  ;;  %vm958_vm5 = vcmp.gt.f32.partialorder %v752_v41, %v860_v27  ;;  %v4788_v45 = vmax.f32 %v752_v41, %v1203_v16  ;;  %vm956_vm6 = vcmp.gt.f32.partialorder %v750_v24, %v858_v35  ;;  %v4791_v2 = vand.u32 2147483647, %v4611_v19 }
 0x17a   : > { %6808 = vst [vmem:[#allocation44_spill] sm:$0xff] %v4786_v54  ;;  %v4793_v9 = vpop.f32.mrb[27].mxu0  ;;  %v1154_v13 = vsel %vm958_vm5, %v4544_v15, %v1056_v1  ;;  %v1152_v51 = vsel %vm956_vm6, %v4548_v21, %v1054_v18  ;;  %v4797_v0 = vmax.f32 %v750_v24, %v1201_v33  ;;  %vm961_vm7 = vcmp.gt.f32.partialorder %v755_v4, %v863_v38  ;;  %v4828_v38 = vpop.f32.mrb[26].mxu1 }
 0x17b   : > { %6809 = vst [vmem:[#allocation45_spill] sm:$0xff] %v4793_v9  ;;  %vm1514_vm8 = vcmp.gt.f32.partialorder %v4788_v45, %v4767_v59  ;;  %v1612_v6 = vrot.slane %v1154_v13, 1  ;;  %v1610_v27 = vrot.slane %v1152_v51, 1  ;;  %v4802_v41 = vsel %vm961_vm7, %v4564_v40, %v1059_v52  ;;  %6815 = vst [vmem:[#allocation51_spill] sm:$0xff] %v4828_v38 }
 0x17c   : > { %vm1512_vm9 = vcmp.gt.f32.partialorder %v4797_v0, %v4773_v25  ;;  %vm1513_vm10 = vcmp.gt.f32.partialorder %v4767_v59, %v4797_v0  ;;  %v835_v18 = vrot.slane %v4791_v2, 7  ;;  %v4817_v51 = vmax.f32 %v755_v4, %v1206_v53 }
 0x17d   : > { %v4808_v15 = vsel %vm1514_vm8, %v1612_v6, %v1611_v57  ;;  %v4810_v21 = vsel %vm1512_vm9, %v1610_v27, %v1685_v10  ;;  %v4812_v16 = vsel %vm1513_vm10, %v1611_v57, %v1610_v27  ;;  %v4815_v1 = vpop.f32.mrb[28].mxu0  ;;  %v753_v35 = vand.u32 2147483647, %v4567_v48 }
 0x17e   : > { %6810 = vst [vmem:[#allocation46_spill] sm:$0xff] %v4808_v15  ;;  %6811 = vst [vmem:[#allocation47_spill] sm:$0xff] %v4810_v21  ;;  %v4821_v24 = vpop.f32.mrb[29].mxu0  ;;  %v1031_v52 = vrot.slane %v4611_v19, 7  ;;  %v1057_v33 = vrot.slane %v4567_v48, 7  ;;  %v1746_v57 = vmax.f32 %v4534_v63, %v4560_v28  ;;  %vm4831_vm11 = vcmp.gt.f32.partialorder %v4791_v2, %v835_v18 }
 0x17f   : > { %6812 = vst [vmem:[#allocation48_spill] sm:$0xff] %v4812_v16  ;;  %6813 = vst [vmem:[#allocation49_spill] sm:$0xff] %v4815_v1  ;;  %v721_v10 = vand.u32 2147483647, %v4614_v23  ;;  %v1178_v4 = vrot.slane %v4791_v2, 1  ;;  %v861_v13 = vrot.slane %v753_v35, 7 }
 0x180   : > { %6814 = vst [vmem:[#allocation50_spill] sm:$0xff] %v4821_v24  ;;  %v1204_v27 = vrot.slane %v753_v35, 1  ;;  %v1029_v24 = vrot.slane %v4614_v23, 7  ;;  %v756_v9 = vand.u32 2147483647, %v4576_v55  ;;  %v1352_v63 = vrot.slane %v4576_v55, 7 }
 0x181   : > { %v833_v40 = vrot.slane %v721_v10, 7  ;;  %v1176_v1 = vrot.slane %v721_v10, 1  ;;  %vm959_vm12 = vcmp.gt.f32.partialorder %v753_v35, %v861_v13  ;;  %v724_v18 = vand.u32 2147483647, %v4618_v30  ;;  %v4842_v38 = vpop.f32.mrb[30].mxu0 }
 0x182   : > { %v4838_v54 = vmax.f32 %v753_v35, %v1204_v27  ;;  %6818 = vst [vmem:[#allocation52_spill] sm:$0xff] %v4842_v38  ;;  %v4845_v5 = vsel %vm959_vm12, %v4567_v48, %v1057_v33  ;;  %v1324_v20 = vrot.slane %v756_v9, 7  ;;  %v1373_v27 = vrot.slane %v756_v9, 1 }
 0x183   : > { %vm931_vm13 = vcmp.gt.f32.partialorder %v721_v10, %v833_v40  ;;  %v4847_v60 = vmax.f32 %v721_v10, %v1176_v1  ;;  %v1613_v13 = vrot.slane %v4845_v5, 1  ;;  %v4862_v1 = vpop.f32.mrb[27].mxu1 }
 0x184   : > { %vm1515_vm14 = vcmp.gt.f32.partialorder %v4838_v54, %v4788_v45  ;;  %v4853_v35 = vsel %vm931_vm13, %v4614_v23, %v1029_v24  ;;  %vm1338_vm1 = vcmp.gt.f32.partialorder %v756_v9, %v1324_v20  ;;  %6819 = vst [vmem:[#allocation53_spill] sm:$0xff] %v4862_v1  ;;  %v1387_v33 = vmax.f32 %v756_v9, %v1373_v27 }
 0x185   : > { %vm1487_vm15 = vcmp.gt.f32.partialorder %v4847_v60, %v4665_v22  ;;  %v6714_v38 = vrot.slane %v4853_v35, 1  ;;  %v4860_v48 = vmax.f32 %v4665_v22, %v4847_v60  ;;  %v4864_v40 = vsel %vm1515_vm14, %v1613_v13, %v1612_v6 }
 0x186   : > { %6820 = vst [vmem:[#allocation54_spill] sm:$0xff] %v4864_v40  ;;  %v1366_v5 = vsel %vm1338_vm1, %v4576_v55, %v1352_v63  ;;  %v1320_v23 = vrot.slane %v724_v18, 7  ;;  %v6821_v24 = vrot.slane %v4676_v62, 1  ;;  %v1348_v22 = vrot.slane %v4618_v30, 7 }
 0x187   : > { %vm1840_vm2 = vcmp.gt.f32.partialorder %v4860_v48, %v1746_v57  ;;  %v1616_v47 = vrot.slane %v1366_v5, 1  ;;  %vm1518_vm3 = vcmp.gt.f32.partialorder %v1387_v33, %v4817_v51  ;;  %v4879_v55 = vmax.f32 %v4817_v51, %v1387_v33 }
 0x188   : > { %v4871_v10 = vsel %vm1487_vm15, %v6714_v38, %v6821_v24  ;;  %vm1334_vm4 = vcmp.gt.f32.partialorder %v724_v18, %v1320_v23  ;;  %v6822_v62 = vrot.slane %v4802_v41, 1  ;;  %v4889_v57 = vsel %vm4831_vm11, %v4611_v19, %v1031_v52 }
 0x189   : > { %v1889_v20 = vsel %vm1840_vm2, %v4871_v10, %v4569_v49  ;;  %v1362_v6 = vsel %vm1334_vm4, %v4618_v30, %v1348_v22  ;;  %vm1871_vm5 = vcmp.gt.f32.partialorder %v4879_v55, %v4663_v39  ;;  %v1369_v49 = vrot.slane %v724_v18, 1 }
 0x18a   : > { %v4883_v9 = vsel %vm1518_vm3, %v1616_v47, %v6822_v62  ;;  %v754_v63 = vand.u32 2147483647, %v4583_v61  ;;  %v1588_v5 = vrot.slane %v1362_v6, 1  ;;  %v4900_v47 = vmax.f32 %v4633_v44, %v4678_v56  ;;  %v4927_v44 = vpop.f32.mrb[31].mxu0 }
 0x18b   : > { %v4896_v27 = vsel %vm1871_vm5, %v4883_v9, %v4673_v29  ;;  %v4904_v30 = vmax.f32 %v4678_v56, %v4605_v11  ;;  %v4907_v19 = vmul.f32 0.79794323, %v4709_v17  ;;  %v1276_v52 = vmax.f32 %v4791_v2, %v1178_v4  ;;  %6826 = vst [vmem:[#allocation57_spill] sm:$0xff] %v4927_v44 }
 0x18c   : > { %6823 = vst [vmem:[#allocation55_spill] sm:$0xff] %v4900_v47  ;;  %v1383_v53 = vmax.f32 %v724_v18, %v1369_v49  ;;  %v1058_v33 = vrot.slane %v4583_v61, 7  ;;  %v1587_v23 = vrot.slane %v4889_v57, 1  ;;  %v862_v24 = vrot.slane %v754_v63, 7 }
 0x18d   : > { %6824 = vst [vmem:[#allocation56_spill] sm:$0xff] %v4904_v30  ;;  %v1205_v22 = vrot.slane %v754_v63, 1  ;;  %v722_v62 = vand.u32 2147483647, %v4626_v36  ;;  %v1747_v11 = vmax.f32 %v4560_v28, %v4578_v58  ;;  %v1748_v56 = vmax.f32 %v4578_v58, %v4558_v26 }
 0x18e   : > { %vm1490_vm6 = vcmp.gt.f32.partialorder %v1383_v53, %v1276_v52  ;;  %v4913_v6 = vmax.f32 %v1276_v52, %v1383_v53  ;;  %vm960_vm7 = vcmp.gt.f32.partialorder %v754_v63, %v862_v24  ;;  %v6825_v18 = vmax.f32 %v4558_v26, %v4571_v50 }
 0x18f   : > { %v4919_v38 = vsel %vm1490_vm6, %v1588_v5, %v1587_v23  ;;  %v1303_v2 = vmax.f32 %v754_v63, %v1205_v22  ;;  %v834_v4 = vrot.slane %v722_v62, 7  ;;  %v1156_v57 = vsel %vm960_vm7, %v4583_v61, %v1058_v33 }
 0x190   : > { %vm1843_vm8 = vcmp.gt.f32.partialorder %v4913_v6, %v6825_v18  ;;  %v1177_v49 = vrot.slane %v722_v62, 1  ;;  %v759_v53 = vand.u32 2147483647, %v4620_v31  ;;  %v1614_v58 = vrot.slane %v1156_v57, 1 }
 0x191   : > { %v1892_v28 = vsel %vm1843_vm8, %v4919_v38, %v4593_v3  ;;  %vm1516_vm9 = vcmp.gt.f32.partialorder %v1303_v2, %v4838_v54  ;;  %vm1517_vm10 = vcmp.gt.f32.partialorder %v4817_v51, %v1303_v2  ;;  %v4934_v63 = vmul.f32 0.0025662621, %v4709_v17 }
 0x192   : > { %v4937_v26 = vmax.f32 %v4838_v54, %v1303_v2  ;;  %v4940_v50 = vmax.f32 %v1303_v2, %v4817_v51  ;;  %v1030_v61 = vrot.slane %v4626_v36, 7  ;;  %v4943_v5 = vsel %vm1516_vm9, %v1614_v58, %v1613_v13 }
 0x193   : > { %v6827_v3 = vrot.slane %v4802_v41, 1  ;;  %vm932_vm11 = vcmp.gt.f32.partialorder %v722_v62, %v834_v4  ;;  %v1275_v24 = vmax.f32 %v722_v62, %v1177_v49  ;;  %v866_v51 = vrot.slane %v759_v53, 7 }
 0x194   : > { %vm1869_vm12 = vcmp.gt.f32.partialorder %v4937_v26, %v4900_v47  ;;  %vm1870_vm13 = vcmp.gt.f32.partialorder %v4940_v50, %v4904_v30  ;;  %v1128_v17 = vsel %vm932_vm11, %v4626_v36, %v1030_v61  ;;  %v4962_v41 = vmul.f32 0.79794323, %v4759_v14 }
 0x195   : > { %v4947_v33 = vsel %vm1517_vm10, %v6827_v3, %v1614_v58  ;;  %v1918_v22 = vsel %vm1869_vm12, %v4943_v5, %v4713_v42  ;;  %vm1488_vm14 = vcmp.gt.f32.partialorder %v1275_v24, %v4847_v60  ;;  %vm1489_vm15 = vcmp.gt.f32.partialorder %v1276_v52, %v1275_v24 }
 0x196   : > { %v4958_v13 = vsel %vm1870_vm13, %v4947_v33, %v4717_v34  ;;  %v4965_v62 = vmul.f32 0.79794323, %v4763_v32  ;;  %v4968_v2 = vmul.f32 0.0025662621, %v4759_v14  ;;  %v4971_v36 = vmax.f32 %v4847_v60, %v1275_v24 }
 0x197   : > { %v4974_v4 = vmul.f32 0.0025662621, %v4763_v32  ;;  %v4976_v18 = vmul.f32 0.79794323, %v1889_v20  ;;  %v4978_v57 = vmul.f32 0.0025662621, %v1889_v20  ;;  %v4980_v49 = vmax.f32 %v1275_v24, %v1276_v52 }
 0x198   : > { %v1586_v58 = vrot.slane %v1128_v17, 1  ;;  %vm1841_vm1 = vcmp.gt.f32.partialorder %v4971_v36, %v1747_v11  ;;  %vm964_vm2 = vcmp.gt.f32.partialorder %v759_v53, %v866_v51  ;;  %v1062_v61 = vrot.slane %v4620_v31, 7 }
 0x199   : > { %v4985_v14 = vmul.f32 0.0025662621, %v4896_v27  ;;  %vm1842_vm3 = vcmp.gt.f32.partialorder %v4980_v49, %v1748_v56  ;;  %v1209_v3 = vrot.slane %v759_v53, 1  ;;  %v757_v32 = vand.u32 2147483647, %v4628_v37 }
 0x19a   : > { %v4990_v34 = vmul.f32 0.66381663, %v4896_v27  ;;  %v6830_v20 = vrot.slane %v4853_v35, 1  ;;  %v4999_v11 = vsel %vm1489_vm15, %v1587_v23, %v1586_v58  ;;  %v760_v51 = vand.u32 2147483647, %v4637_v46 }
 0x19b   : > { %6828 = vst [vmem:[#allocation58_spill] sm:$0xff] %v4985_v14  ;;  %v5003_v42 = vmul.f32 0.003084785, %v4896_v27  ;;  %v5011_v30 = vsel %vm1842_vm3, %v4999_v11, %v4602_v8  ;;  %v1160_v60 = vsel %vm964_vm2, %v4620_v31, %v1062_v61  ;;  %v5014_v35 = vmul.f32 0.79794323, %v1892_v28  ;;  %v6834_v31 = vld [vmem:[#allocation16_spill] sm:$0xff] }
 0x19c   : > { %6829 = vst [vmem:[#allocation59_spill] sm:$0xff] %v4990_v34  ;;  %v4996_v17 = vsel %vm1488_vm14, %v1586_v58, %v6830_v20  ;;  %v5016_v52 = vmul.f32 0.0025662621, %v1892_v28  ;;  %v5018_v23 = vmul.f32 0.0025662621, %v1918_v22  ;;  %v5022_v27 = vmax.f32 %v4767_v59, %v4788_v45  ;;  %v6835_v14 = vld [vmem:[#allocation15_spill] sm:$0xff] }
 0x19d   : > { %6831 = vst [vmem:[#allocation60_spill] sm:$0xff] %v5003_v42  ;;  %v5007_v56 = vsel %vm1841_vm1, %v4996_v17, %v4600_v7  ;;  %v1307_v24 = vmax.f32 %v759_v53, %v1209_v3  ;;  %v864_v58 = vrot.slane %v757_v32, 7  ;;  %v1060_v7 = vrot.slane %v4628_v37, 7 }
 0x19e   : > { %6832 = vst [vmem:[#allocation61_spill] sm:$0xff] %v5018_v23  ;;  %6833 = vst [vmem:[#allocation62_spill] sm:$0xff] %v5022_v27  ;;  %v867_v20 = vrot.slane %v760_v51, 7  ;;  %v1618_v47 = vrot.slane %v1160_v60, 1  ;;  %v1063_v8 = vrot.slane %v4637_v46, 7  ;;  %v1210_v34 = vrot.slane %v760_v51, 1 }
 0x19f   : > { %v727_v61 = vand.u32 2147483647, %v6834_v31  ;;  %vm962_vm4 = vcmp.gt.f32.partialorder %v757_v32, %v864_v58  ;;  %v1207_v28 = vrot.slane %v757_v32, 1  ;;  %v758_v23 = vand.u32 2147483647, %v6835_v14 }
 0x1a0   : > { %vm965_vm5 = vcmp.gt.f32.partialorder %v760_v51, %v867_v20  ;;  %v5029_v42 = vmul.f32 0.0025662621, %v4958_v13  ;;  %v5031_v44 = vmul.f32 0.66381663, %v1918_v22  ;;  %v5036_v3 = vmax.f32 %v760_v51, %v1210_v34 }
 0x1a1   : > { %v5034_v53 = vsel %vm965_vm5, %v4637_v46, %v1063_v8  ;;  %v5039_v60 = vmul.f32 0.66381663, %v4958_v13  ;;  %v1158_v29 = vsel %vm962_vm4, %v4628_v37, %v1060_v7  ;;  %v865_v20 = vrot.slane %v758_v23, 7 }
 0x1a2   : > { %6836 = vst [vmem:[#allocation16_spill] sm:$0xff] %v5029_v42  ;;  %6837 = vst [vmem:[#allocation15_spill] sm:$0xff] %v5031_v44  ;;  %v6725_v58 = vrot.slane %v5034_v53, 1  ;;  %vm1521_vm6 = vcmp.gt.f32.partialorder %v5036_v3, %v1307_v24  ;;  %v5045_v39 = vmax.f32 %v1307_v24, %v5036_v3  ;;  %v838_v42 = vrot.slane %v727_v61, 7 }
 0x1a3   : > { %6838 = vst [vmem:[#allocation63_spill] sm:$0xff] %v5039_v60  ;;  %v1061_v44 = vrot.slane %v6835_v14, 7  ;;  %v5048_v46 = vmul.f32 0.003084785, %v1918_v22  ;;  %v1305_v34 = vmax.f32 %v757_v32, %v1207_v28  ;;  %vm963_vm7 = vcmp.gt.f32.partialorder %v758_v23, %v865_v20 }
 0x1a4   : > { %6839 = vst [vmem:[#allocation64_spill] sm:$0xff] %v5045_v39  ;;  %v5052_v51 = vsel %vm1521_vm6, %v6725_v58, %v1618_v47  ;;  %v1686_v37 = vrot.slane %v1158_v29, 1  ;;  %vm1874_vm8 = vcmp.gt.f32.partialorder %v5045_v39, %v5022_v27  ;;  %v1208_v8 = vrot.slane %v758_v23, 1 }
 0x1a5   : > { %6840 = vst [vmem:[#allocation65_spill] sm:$0xff] %v5048_v46  ;;  %6841 = vst [vmem:[#allocation66_spill] sm:$0xff] %v5052_v51  ;;  %v1159_v7 = vsel %vm963_vm7, %v6835_v14, %v1061_v44  ;;  %v1923_v60 = vsel %vm1874_vm8, %v5052_v51, %v4808_v15  ;;  %v5061_v22 = vmax.f32 %v4773_v25, %v4797_v0  ;;  %v5068_v29 = vmul.f32 0.003084785, %v4958_v13  ;;  %v6845_v25 = vld [vmem:[#allocation18_spill] sm:$0xff]  ;;  %v5082_v13 = vpop.f32.mrb[32].mxu0 }
 0x1a6   : > { %v1617_v1 = vrot.slane %v1159_v7, 1  ;;  %v5065_v32 = vmax.f32 %v4797_v0, %v4767_v59  ;;  %v5071_v28 = vmul.f32 0.79794323, %v5007_v56  ;;  %vm936_vm9 = vcmp.gt.f32.partialorder %v727_v61, %v838_v42  ;;  %6848 = vst [vmem:[#allocation71_spill] sm:$0xff] %v5082_v13  ;;  %v5125_v13 = vpop.f32.mrb[33].mxu0 }
 0x1a7   : > { %6842 = vst [vmem:[#allocation67_spill] sm:$0xff] %v5061_v22  ;;  %6844 = vst [vmem:[#allocation69_spill] sm:$0xff] %v5068_v29  ;;  %v1306_v44 = vmax.f32 %v758_v23, %v1208_v8  ;;  %v5074_v14 = vmul.f32 0.79794323, %v5011_v30  ;;  %v1034_v20 = vrot.slane %v6834_v31, 7  ;;  %v1181_v7 = vrot.slane %v727_v61, 1 }
 0x1a8   : > { %6843 = vst [vmem:[#allocation68_spill] sm:$0xff] %v5065_v32  ;;  %v725_v58 = vand.u32 2147483647, %v6845_v25  ;;  %v5115_v27 = vmul.f32 2.4738147e-06, %v1923_v60  ;;  %6855 = vst [vmem:[#allocation76_spill] sm:$0xff] %v5125_v13 }
 0x1a9   : > { %vm1519_vm10 = vcmp.gt.f32.partialorder %v1306_v44, %v1305_v34  ;;  %vm1520_vm11 = vcmp.gt.f32.partialorder %v1307_v24, %v1306_v44  ;;  %v5078_v0 = vmax.f32 %v1305_v34, %v1306_v44  ;;  %v5080_v59 = vmax.f32 %v1306_v44, %v1307_v24  ;;  %v6851_v24 = vld [vmem:[#allocation17_spill] sm:$0xff] }
 0x1aa   : > { %v5085_v15 = vsel %vm936_vm9, %v6834_v31, %v1034_v20  ;;  %v5087_v42 = vsel %vm1519_vm10, %v1617_v1, %v1686_v37  ;;  %v5089_v23 = vsel %vm1520_vm11, %v1618_v47, %v1617_v1  ;;  %v836_v8 = vrot.slane %v725_v58, 7  ;;  %6852 = vst [vmem:[#allocation17_spill] sm:$0xff] %v5115_v27 }
 0x1ab   : > { %6846 = vst [vmem:[#allocation18_spill] sm:$0xff] %v5078_v0  ;;  %6847 = vst [vmem:[#allocation70_spill] sm:$0xff] %v5080_v59  ;;  %vm1872_vm12 = vcmp.gt.f32.partialorder %v5078_v0, %v5061_v22  ;;  %vm1873_vm13 = vcmp.gt.f32.partialorder %v5080_v59, %v5065_v32  ;;  %v1032_v34 = vrot.slane %v6845_v25, 7  ;;  %v5097_v44 = vand.u32 2147483647, %v6851_v24 }
 0x1ac   : > { %6849 = vst [vmem:[#allocation72_spill] sm:$0xff] %v5087_v42  ;;  %6850 = vst [vmem:[#allocation73_spill] sm:$0xff] %v5089_v23  ;;  %v5101_v31 = vsel %vm1872_vm12, %v5087_v42, %v4810_v21  ;;  %v5105_v1 = vsel %vm1873_vm13, %v5089_v23, %v4812_v16  ;;  %vm934_vm14 = vcmp.gt.f32.partialorder %v725_v58, %v836_v8  ;;  %v1179_v47 = vrot.slane %v725_v58, 1 }
 0x1ad   : > { %v5108_v37 = vmul.f32 0.0025662621, %v5007_v56  ;;  %v5111_v20 = vmul.f32 0.0025662621, %v5011_v30  ;;  %v1590_v32 = vrot.slane %v5085_v15, 1  ;;  %v1130_v22 = vsel %vm934_vm14, %v6845_v25, %v1032_v34 }
 0x1ae   : > { %v5117_v21 = vmul.f32 0.16552415, %v1923_v60  ;;  %v5119_v29 = vmul.f32 0.19896893, %v1923_v60  ;;  %v1279_v16 = vmax.f32 %v727_v61, %v1181_v7  ;;  %v870_v8 = vrot.slane %v5097_v44, 7 }
 0x1af   : > { %v1066_v46 = vrot.slane %v6851_v24, 7  ;;  %v728_v30 = vand.u32 2147483647, %v4667_v43  ;;  %v1277_v15 = vmax.f32 %v725_v58, %v1179_v47  ;;  %v1682_v23 = vrot.slane %v1130_v22, 1 }
 0x1b0   : > { %6853 = vst [vmem:[#allocation74_spill] sm:$0xff] %v5117_v21  ;;  %6854 = vst [vmem:[#allocation75_spill] sm:$0xff] %v5119_v29  ;;  %v761_v25 = vand.u32 2147483647, %v4669_v12  ;;  %v1064_v34 = vrot.slane %v4669_v12, 7  ;;  %v5129_v21 = vpop.f32.mrb[34].mxu0  ;;  %v5133_v7 = vmax.f32 %v4788_v45, %v4838_v54  ;;  %vm968_vm7 = vcmp.gt.f32.partialorder %v5097_v44, %v870_v8 }
 0x1b1   : > { %6856 = vst [vmem:[#allocation77_spill] sm:$0xff] %v5129_v21  ;;  %v839_v60 = vrot.slane %v728_v30, 7  ;;  %v1182_v61 = vrot.slane %v728_v30, 1  ;;  %v6858_v29 = vld [vmem:[#allocation21_spill] sm:$0xff]  ;;  %v1035_v27 = vrot.slane %v4667_v43, 7  ;;  %v6859_v45 = vld [vmem:[#allocation28_spill] sm:$0xff] }
 0x1b2   : > { %6857 = vst [vmem:[#allocation78_spill] sm:$0xff] %v5133_v7  ;;  %v726_v56 = vand.u32 2147483647, %v6858_v29  ;;  %v868_v59 = vrot.slane %v761_v25, 7  ;;  %v1211_v13 = vrot.slane %v761_v25, 1  ;;  %v1033_v58 = vrot.slane %v6858_v29, 7 }
 0x1b3   : > { %vm937_vm15 = vcmp.gt.f32.partialorder %v728_v30, %v839_v60  ;;  %v5138_v22 = vmax.f32 %v728_v30, %v1182_v61  ;;  %v731_v54 = vand.u32 2147483647, %v6859_v45  ;;  %v6862_v61 = vrot.slane %v5034_v53, 1 }
 0x1b4   : > { %v837_v47 = vrot.slane %v726_v56, 7  ;;  %v1180_v42 = vrot.slane %v726_v56, 1  ;;  %v5141_v21 = vsel %vm937_vm15, %v4667_v43, %v1035_v27  ;;  %vm966_vm1 = vcmp.gt.f32.partialorder %v761_v25, %v868_v59 }
 0x1b5   : > { %v5143_v0 = vmax.f32 %v761_v25, %v1211_v13  ;;  %vm1493_vm2 = vcmp.gt.f32.partialorder %v5138_v22, %v1279_v16  ;;  %v6741_v51 = vrot.slane %v5141_v21, 1  ;;  %v5149_v39 = vmax.f32 %v1279_v16, %v5138_v22  ;;  %v6860_v13 = vld [vmem:[#allocation23_spill] sm:$0xff] }
 0x1b6   : > { %v5152_v30 = vsel %vm966_vm1, %v4669_v12, %v1064_v34  ;;  %vm935_vm4 = vcmp.gt.f32.partialorder %v726_v56, %v837_v47  ;;  %v1278_v25 = vmax.f32 %v726_v56, %v1180_v42  ;;  %v6861_v34 = vld [vmem:[#allocation25_spill] sm:$0xff]  ;;  %v842_v42 = vrot.slane %v731_v54, 7 }
 0x1b7   : > { %vm1522_vm3 = vcmp.gt.f32.partialorder %v5143_v0, %v5036_v3  ;;  %v6742_v43 = vrot.slane %v5152_v30, 1  ;;  %v5159_v27 = vmax.f32 %v5036_v3, %v5143_v0  ;;  %v5163_v59 = vsel %vm1493_vm2, %v6741_v51, %v1590_v32 }
 0x1b8   : > { %vm1846_vm5 = vcmp.gt.f32.partialorder %v5149_v39, %v6860_v13  ;;  %v1131_v12 = vsel %vm935_vm4, %v6858_v29, %v1033_v58  ;;  %v5187_v56 = vmul.f32 2.4738147e-06, %v5101_v31  ;;  %v5190_v53 = vmul.f32 2.4738147e-06, %v5105_v1 }
 0x1b9   : > { %v5170_v60 = vsel %vm1846_vm5, %v5163_v59, %v6861_v34  ;;  %v5176_v3 = vsel %vm1522_vm3, %v6742_v43, %v6862_v61  ;;  %vm1875_vm6 = vcmp.gt.f32.partialorder %v5159_v27, %v5133_v7  ;;  %v1589_v47 = vrot.slane %v1131_v12, 1 }
 0x1ba   : > { %6863 = vst [vmem:[#allocation21_spill] sm:$0xff] %v5176_v3  ;;  %v1944_v51 = vmul.f32 0.19896892, %v5170_v60  ;;  %v1993_v13 = vmul.f32 0.16552415, %v5170_v60  ;;  %v5184_v29 = vsel %vm1875_vm6, %v5176_v3, %v4864_v40  ;;  %6864 = vst [vmem:[#allocation28_spill] sm:$0xff] %v5187_v56  ;;  %vm1491_vm8 = vcmp.gt.f32.partialorder %v1278_v25, %v1277_v15 }
 0x1bb   : > { %6865 = vst [vmem:[#allocation23_spill] sm:$0xff] %v5190_v53  ;;  %vm1492_vm9 = vcmp.gt.f32.partialorder %v1279_v16, %v1278_v25  ;;  %v5199_v34 = vsel %vm1491_vm8, %v1589_v47, %v1682_v23  ;;  %v5202_v61 = vmul.f32 0.16552415, %v5101_v31  ;;  %v5206_v56 = vmax.f32 %v1277_v15, %v1278_v25  ;;  %v6877_v23 = vld [vmem:[#allocation32_spill] sm:$0xff] }
 0x1bc   : > { %v5194_v58 = vadd.f32 %v1944_v51, %v4907_v19  ;;  %v5197_v12 = vadd.f32 %v1993_v13, %v4934_v63  ;;  %6868 = vst [vmem:[#allocation80_spill] sm:$0xff] %v5199_v34  ;;  %v5204_v43 = vsel %vm1492_vm9, %v1590_v32, %v1589_v47  ;;  %v5208_v53 = vmax.f32 %v1278_v25, %v1279_v16  ;;  %v6878_v32 = vld [vmem:[#allocation33_spill] sm:$0xff]  ;;  %v6879_v25 = vld [vmem:[#allocation36_spill] sm:$0xff] }
 0x1bd   : > { %6869 = vst [vmem:[#allocation81_spill] sm:$0xff] %v5202_v61  ;;  %6870 = vst [vmem:[#allocation82_spill] sm:$0xff] %v5204_v43  ;;  %v5211_v8 = vmul.f32 0.16552415, %v5105_v1  ;;  %v5214_v19 = vmul.f32 0.19896893, %v5101_v31  ;;  %v5217_v63 = vsel %vm968_vm7, %v6851_v24, %v1066_v46  ;;  %vm5219_vm10 = vcmp.gt.f32.partialorder %v731_v54, %v842_v42 }
 0x1be   : > { %6866 = vst [vmem:[#allocation25_spill] sm:$0xff] %v5194_v58  ;;  %6867 = vst [vmem:[#allocation79_spill] sm:$0xff] %v5197_v12  ;;  %vm1844_vm11 = vcmp.gt.f32.partialorder %v5206_v56, %v6877_v23  ;;  %vm1845_vm12 = vcmp.gt.f32.partialorder %v5208_v53, %v6878_v32  ;;  %v1038_v16 = vrot.slane %v6859_v45, 7  ;;  %v1185_v15 = vrot.slane %v731_v54, 1  ;;  %v6880_v47 = vld [vmem:[#allocation37_spill] sm:$0xff]  ;;  %v6881_v24 = vld [vmem:[#allocation30_spill] sm:$0xff] }
 0x1bf   : > { %6871 = vst [vmem:[#allocation83_spill] sm:$0xff] %v5206_v56  ;;  %6872 = vst [vmem:[#allocation84_spill] sm:$0xff] %v5208_v53  ;;  %v5230_v31 = vsel %vm1844_vm11, %v5199_v34, %v6879_v25  ;;  %v5234_v46 = vsel %vm1845_vm12, %v5204_v43, %v6880_v47  ;;  %v729_v13 = vand.u32 2147483647, %v6881_v24  ;;  %v6882_v42 = vld [vmem:[#allocation22_spill] sm:$0xff]  ;;  %v6884_v23 = vrot.slane %v5097_v44, 1 }
 0x1c0   : > { %6873 = vst [vmem:[#allocation85_spill] sm:$0xff] %v5211_v8  ;;  %6874 = vst [vmem:[#allocation86_spill] sm:$0xff] %v5214_v19  ;;  %v764_v19 = vand.u32 2147483647, %v6882_v42  ;;  %v5238_v8 = vpop.f32.mrb[35].mxu0  ;;  %v1036_v43 = vrot.slane %v6881_v24, 7  ;;  %v5264_v53 = vsel %vm5219_vm10, %v6859_v45, %v1038_v16  ;;  %v5269_v58 = vmax.f32 %v731_v54, %v1185_v15 }
 0x1c1   : > { %6883 = vst [vmem:[#allocation32_spill] sm:$0xff] %v5238_v8  ;;  %v5243_v32 = vmax.f32 %v5097_v44, %v6884_v23  ;;  %v1942_v61 = vmul.f32 0.19896892, %v5230_v31  ;;  %v1943_v25 = vmul.f32 0.19896892, %v5234_v46  ;;  %v1353_v34 = vrot.slane %v6882_v42, 7 }
 0x1c2   : > { %v1991_v40 = vmul.f32 0.16552415, %v5230_v31  ;;  %v1992_v7 = vmul.f32 0.16552415, %v5234_v46  ;;  %v840_v56 = vrot.slane %v729_v13, 7  ;;  %v1183_v3 = vrot.slane %v729_v13, 1 }
 0x1c3   : > { %v5253_v8 = vadd.f32 %v1942_v61, %v4962_v41  ;;  %v5256_v44 = vadd.f32 %v1943_v25, %v4965_v62  ;;  %v1325_v12 = vrot.slane %v764_v19, 7  ;;  %v1374_v41 = vrot.slane %v764_v19, 1  ;;  %v6885_v61 = vld [vmem:[#allocation34_spill] sm:$0xff] }
 0x1c4   : > { %v5259_v23 = vadd.f32 %v1991_v40, %v4968_v2  ;;  %v5267_v47 = vadd.f32 %v1992_v7, %v4974_v4  ;;  %v732_v62 = vand.u32 2147483647, %v6885_v61  ;;  %v1349_v25 = vrot.slane %v6885_v61, 7  ;;  %v6886_v2 = vld [vmem:[#allocation24_spill] sm:$0xff] }
 0x1c5   : > { %vm938_vm13 = vcmp.gt.f32.partialorder %v729_v13, %v840_v56  ;;  %v5273_v40 = vmax.f32 %v729_v13, %v1183_v3  ;;  %vm1339_vm14 = vcmp.gt.f32.partialorder %v764_v19, %v1325_v12  ;;  %v762_v45 = vand.u32 2147483647, %v6886_v2 }
 0x1c6   : > { %v5277_v51 = vsel %vm938_vm13, %v6881_v24, %v1036_v43  ;;  %v1367_v4 = vsel %vm1339_vm14, %v6882_v42, %v1353_v34  ;;  %v1388_v7 = vmax.f32 %v764_v19, %v1374_v41  ;;  %v1321_v16 = vrot.slane %v732_v62, 7 }
 0x1c7   : > { %vm1494_vm15 = vcmp.gt.f32.partialorder %v5273_v40, %v5138_v22  ;;  %v6752_v54 = vrot.slane %v5277_v51, 1  ;;  %v5285_v56 = vmax.f32 %v5138_v22, %v5273_v40  ;;  %v1623_v3 = vrot.slane %v1367_v4, 1 }
 0x1c8   : > { %vm1525_vm1 = vcmp.gt.f32.partialorder %v1388_v7, %v5243_v32  ;;  %v5289_v12 = vmax.f32 %v5243_v32, %v1388_v7  ;;  %vm1335_vm2 = vcmp.gt.f32.partialorder %v732_v62, %v1321_v16  ;;  %v1370_v43 = vrot.slane %v732_v62, 1 }
 0x1c9   : > { %v6887_v34 = vrot.slane %v5141_v21, 1  ;;  %vm1847_vm3 = vcmp.gt.f32.partialorder %v5285_v56, %v4860_v48  ;;  %v6888_v22 = vrot.slane %v5217_v63, 1  ;;  %v1363_v24 = vsel %vm1335_vm2, %v6885_v61, %v1349_v25 }
 0x1ca   : > { %vm1878_vm4 = vcmp.gt.f32.partialorder %v5289_v12, %v4879_v55  ;;  %v1384_v21 = vmax.f32 %v732_v62, %v1370_v43  ;;  %v1595_v42 = vrot.slane %v1363_v24, 1  ;;  %v6751_v41 = vrot.slane %v5264_v53, 1  ;;  %v6891_v43 = vld [vmem:[#allocation38_spill] sm:$0xff] }
 0x1cb   : > { %v5295_v19 = vsel %vm1494_vm15, %v6752_v54, %v6887_v34  ;;  %v5301_v15 = vsel %vm1525_vm1, %v1623_v3, %v6888_v22  ;;  %v5312_v16 = vmul.f32 0.19896893, %v5105_v1  ;;  %v5315_v61 = vmul.f32 2.4738147e-06, %v5170_v60  ;;  %v6894_v54 = vld [vmem:[#allocation29_spill] sm:$0xff] }
 0x1cc   : > { %v1896_v13 = vsel %vm1847_vm3, %v5295_v19, %v4871_v10  ;;  %v1927_v48 = vsel %vm1878_vm4, %v5301_v15, %v4883_v9  ;;  %vm1497_vm5 = vcmp.gt.f32.partialorder %v1384_v21, %v5269_v58  ;;  %v1065_v10 = vrot.slane %v6886_v2, 7 }
 0x1cd   : > { %v1945_v4 = vmul.f32 0.19896892, %v1896_v13  ;;  %v1994_v7 = vmul.f32 0.16552415, %v1896_v13  ;;  %6889 = vst [vmem:[#allocation33_spill] sm:$0xff] %v5312_v16  ;;  %v5327_v25 = vsel %vm1497_vm5, %v1595_v42, %v6751_v41  ;;  %v5330_v9 = vmax.f32 %v5269_v58, %v1384_v21 }
 0x1ce   : > { %v5333_v1 = vmul.f32 2.4738147e-06, %v5184_v29  ;;  %v869_v60 = vrot.slane %v762_v45, 7  ;;  %v1212_v3 = vrot.slane %v762_v45, 1  ;;  %v730_v34 = vand.u32 2147483647, %v6891_v43 }
 0x1cf   : > { %v5320_v55 = vadd.f32 %v1945_v4, %v4976_v18  ;;  %v5323_v62 = vadd.f32 %v1994_v7, %v4978_v57  ;;  %v5337_v18 = vmul.f32 0.16552415, %v5184_v29  ;;  %v5340_v57 = vmul.f32 0.19896893, %v5184_v29 }
 0x1d0   : > { %6890 = vst [vmem:[#allocation36_spill] sm:$0xff] %v5333_v1  ;;  %vm1850_vm6 = vcmp.gt.f32.partialorder %v5330_v9, %v4913_v6  ;;  %v1037_v22 = vrot.slane %v6891_v43, 7  ;;  %vm967_vm7 = vcmp.gt.f32.partialorder %v762_v45, %v869_v60  ;;  %v1310_v21 = vmax.f32 %v762_v45, %v1212_v3  ;;  %v6914_v1 = vld [vmem:[#allocation35_spill] sm:$0xff] }
 0x1d1   : > { %6892 = vst [vmem:[#allocation37_spill] sm:$0xff] %v5337_v18  ;;  %6893 = vst [vmem:[#allocation30_spill] sm:$0xff] %v5340_v57  ;;  %v1899_v24 = vsel %vm1850_vm6, %v5327_v25, %v4919_v38  ;;  %v841_v42 = vrot.slane %v730_v34, 7  ;;  %v1163_v41 = vsel %vm967_vm7, %v6886_v2, %v1065_v10  ;;  %v767_v16 = vand.u32 2147483647, %v6894_v54 }
 0x1d2   : > { %v1948_v4 = vmul.f32 0.19896892, %v1899_v24  ;;  %v1997_v7 = vmul.f32 0.16552415, %v1899_v24  ;;  %vm1523_vm8 = vcmp.gt.f32.partialorder %v1310_v21, %v5143_v0  ;;  %vm1524_vm9 = vcmp.gt.f32.partialorder %v5243_v32, %v1310_v21 }
 0x1d3   : > { %v1621_v29 = vrot.slane %v1163_v41, 1  ;;  %v5352_v6 = vmax.f32 %v5143_v0, %v1310_v21  ;;  %v5361_v45 = vmax.f32 %v1310_v21, %v5243_v32  ;;  %vm939_vm10 = vcmp.gt.f32.partialorder %v730_v34, %v841_v42  ;;  %v6898_v21 = vld [vmem:[#allocation31_spill] sm:$0xff] }
 0x1d4   : > { %v5355_v57 = vadd.f32 %v1948_v4, %v5014_v35  ;;  %v5358_v38 = vadd.f32 %v1997_v7, %v5016_v52  ;;  %v6895_v2 = vrot.slane %v5152_v30, 1  ;;  %v6896_v60 = vrot.slane %v5217_v63, 1 }
 0x1d5   : > { %vm1876_vm11 = vcmp.gt.f32.partialorder %v5352_v6, %v4937_v26  ;;  %v1135_v35 = vsel %vm939_vm10, %v6891_v43, %v1037_v22  ;;  %v5375_v52 = vmul.f32 2.4738147e-06, %v5230_v31  ;;  %vm1877_vm12 = vcmp.gt.f32.partialorder %v5361_v45, %v4940_v50 }
 0x1d6   : > { %v5365_v10 = vsel %vm1523_vm8, %v1621_v29, %v6895_v2  ;;  %v5369_v41 = vsel %vm1524_vm9, %v6896_v60, %v1621_v29  ;;  %v1184_v30 = vrot.slane %v730_v34, 1  ;;  %v5382_v32 = vmul.f32 2.4738147e-06, %v5234_v46 }
 0x1d7   : > { %v1925_v0 = vsel %vm1876_vm11, %v5365_v10, %v4943_v5  ;;  %v5384_v63 = vmul.f32 2.4738147e-06, %v1896_v13  ;;  %v1926_v26 = vsel %vm1877_vm12, %v5369_v41, %v4947_v33  ;;  %v1593_v3 = vrot.slane %v1135_v35, 1 }
 0x1d8   : > { %v5388_v43 = vmul.f32 2.4738147e-06, %v1927_v48  ;;  %v5390_v31 = vmul.f32 0.16552415, %v1927_v48  ;;  %v1282_v22 = vmax.f32 %v730_v34, %v1184_v30  ;;  %v765_v50 = vand.u32 2147483647, %v6898_v21 }
 0x1d9   : > { %v5393_v42 = vmul.f32 0.19896893, %v1927_v48  ;;  %v5395_v5 = vmul.f32 2.4738147e-06, %v1899_v24  ;;  %v1398_v4 = vrot.slane %v767_v16, 7  ;;  %v1426_v46 = vrot.slane %v6894_v54, 7 }
 0x1da   : > { %6897 = vst [vmem:[#allocation22_spill] sm:$0xff] %v5390_v31  ;;  %vm1495_vm13 = vcmp.gt.f32.partialorder %v1282_v22, %v5273_v40  ;;  %vm1496_vm14 = vcmp.gt.f32.partialorder %v5269_v58, %v1282_v22  ;;  %v5401_v33 = vmax.f32 %v5273_v40, %v1282_v22  ;;  %v5404_v13 = vmax.f32 %v1282_v22, %v5269_v58 }
 0x1db   : > { %v5406_v34 = vmul.f32 2.4738147e-06, %v1925_v0  ;;  %v5408_v7 = vmul.f32 0.16552415, %v1925_v0  ;;  %v6903_v48 = vrot.slane %v5277_v51, 1  ;;  %v6905_v29 = vrot.slane %v5264_v53, 1 }
 0x1dc   : > { %6899 = vst [vmem:[#allocation34_spill] sm:$0xff] %v5401_v33  ;;  %6900 = vst [vmem:[#allocation24_spill] sm:$0xff] %v5404_v13  ;;  %v5418_v60 = vmul.f32 0.19896893, %v1925_v0  ;;  %vm1848_vm15 = vcmp.gt.f32.partialorder %v5401_v33, %v4971_v36  ;;  %vm1849_vm1 = vcmp.gt.f32.partialorder %v5404_v13, %v4980_v49  ;;  %v1396_v58 = vrot.slane %v765_v50, 7  ;;  %v6938_v13 = vld [vmem:[#allocation79_spill] sm:$0xff] }
 0x1dd   : > { %6901 = vst [vmem:[#allocation38_spill] sm:$0xff] %v5406_v34  ;;  %6902 = vst [vmem:[#allocation29_spill] sm:$0xff] %v5408_v7  ;;  %v5412_v24 = vsel %vm1495_vm13, %v1593_v3, %v6903_v48  ;;  %v5416_v2 = vsel %vm1496_vm14, %v6905_v29, %v1593_v3  ;;  %v5424_v40 = vmul.f32 2.4738147e-06, %v1926_v26  ;;  %v1447_v53 = vrot.slane %v767_v16, 1  ;;  %v6916_v34 = vld [vmem:[#allocation39_spill] sm:$0xff] }
 0x1de   : > { %6904 = vst [vmem:[#allocation31_spill] sm:$0xff] %v5412_v24  ;;  %6906 = vst [vmem:[#allocation87_spill] sm:$0xff] %v5416_v2  ;;  %v1897_v51 = vsel %vm1848_vm15, %v5412_v24, %v4996_v17  ;;  %v1898_v35 = vsel %vm1849_vm1, %v5416_v2, %v4999_v11  ;;  %vm1412_vm2 = vcmp.gt.f32.partialorder %v767_v16, %v1398_v4  ;;  %v5430_v22 = vmul.f32 0.16552415, %v1926_v26 }
 0x1df   : > { %6907 = vst [vmem:[#allocation88_spill] sm:$0xff] %v5418_v60  ;;  %6908 = vst [vmem:[#allocation89_spill] sm:$0xff] %v5424_v40  ;;  %v1946_v30 = vmul.f32 0.19896892, %v1897_v51  ;;  %v1947_v3 = vmul.f32 0.19896892, %v1898_v35  ;;  %vm1410_vm3 = vcmp.gt.f32.partialorder %v765_v50, %v1396_v58  ;;  %v1440_v4 = vsel %vm1412_vm2, %v6894_v54, %v1426_v46 }
 0x1e0   : > { %v1995_v0 = vmul.f32 0.16552415, %v1897_v51  ;;  %6909 = vst [vmem:[#allocation90_spill] sm:$0xff] %v5430_v22  ;;  %v1996_v36 = vmul.f32 0.16552415, %v1898_v35  ;;  %v1424_v48 = vrot.slane %v6898_v21, 7  ;;  %v1461_v18 = vmax.f32 %v767_v16, %v1447_v53 }
 0x1e1   : > { %v5434_v49 = vadd.f32 %v1946_v30, %v5071_v28  ;;  %v5437_v29 = vadd.f32 %v1947_v3, %v5074_v14  ;;  %v768_v22 = vand.u32 2147483647, %v6914_v1  ;;  %v1445_v7 = vrot.slane %v765_v50, 1  ;;  %v6915_v28 = vld [vmem:[#allocation40_spill] sm:$0xff]  ;;  %v6917_v54 = vld [vmem:[#allocation42_spill] sm:$0xff] }
 0x1e2   : > { %v5440_v17 = vadd.f32 %v1995_v0, %v5108_v37  ;;  %v5443_v11 = vadd.f32 %v1996_v36, %v5111_v20  ;;  %v1427_v40 = vrot.slane %v6914_v1, 7  ;;  %v735_v30 = vand.u32 2147483647, %v6915_v28 }
 0x1e3   : > { %6910 = vst [vmem:[#allocation91_spill] sm:$0xff] %v5434_v49  ;;  %6911 = vst [vmem:[#allocation92_spill] sm:$0xff] %v5437_v29  ;;  %v766_v14 = vand.u32 2147483647, %v6916_v34  ;;  %v1438_v3 = vsel %vm1410_vm3, %v6898_v21, %v1424_v48  ;;  %v1399_v37 = vrot.slane %v768_v22, 7  ;;  %v1448_v0 = vrot.slane %v768_v22, 1 }
 0x1e4   : > { %6912 = vst [vmem:[#allocation93_spill] sm:$0xff] %v5440_v17  ;;  %6913 = vst [vmem:[#allocation94_spill] sm:$0xff] %v5443_v11  ;;  %v1425_v58 = vrot.slane %v6916_v34, 7  ;;  %v845_v20 = vrot.slane %v735_v30, 7  ;;  %v733_v16 = vand.u32 2147483647, %v6917_v54  ;;  %v1459_v17 = vmax.f32 %v765_v50, %v1445_v7 }
 0x1e5   : > { %v1397_v36 = vrot.slane %v766_v14, 7  ;;  %v1446_v60 = vrot.slane %v766_v14, 1  ;;  %v5453_v46 = vmul.f32 0.19896893, %v1926_v26  ;;  %v1807_v53 = vrot.slane %v1440_v4, 1  ;;  %v6919_v7 = vld [vmem:[#allocation64_spill] sm:$0xff] }
 0x1e6   : > { %vm1413_vm4 = vcmp.gt.f32.partialorder %v768_v22, %v1399_v37  ;;  %v5455_v11 = vmax.f32 %v768_v22, %v1448_v0  ;;  %v1821_v29 = vrot.slane %v1438_v3, 1  ;;  %v1041_v2 = vrot.slane %v6915_v28, 7  ;;  %v6920_v3 = vld [vmem:[#allocation66_spill] sm:$0xff] }
 0x1e7   : > { %6918 = vst [vmem:[#allocation35_spill] sm:$0xff] %v5453_v46  ;;  %v5458_v49 = vsel %vm1413_vm4, %v6914_v1, %v1427_v40  ;;  %vm1411_vm5 = vcmp.gt.f32.partialorder %v766_v14, %v1397_v36  ;;  %vm943_vm7 = vcmp.gt.f32.partialorder %v735_v30, %v845_v20  ;;  %v1460_v4 = vmax.f32 %v766_v14, %v1446_v60 }
 0x1e8   : > { %vm1794_vm6 = vcmp.gt.f32.partialorder %v5455_v11, %v1461_v18  ;;  %v6754_v21 = vrot.slane %v5458_v49, 1  ;;  %v1832_v48 = vmax.f32 %v1461_v18, %v5455_v11  ;;  %v1439_v26 = vsel %vm1411_vm5, %v6916_v34, %v1425_v58 }
 0x1e9   : > { %v843_v22 = vrot.slane %v733_v16, 7  ;;  %v1188_v1 = vrot.slane %v735_v30, 1  ;;  %v1806_v40 = vrot.slane %v1439_v26, 1  ;;  %vm1792_vm9 = vcmp.gt.f32.partialorder %v1460_v4, %v1459_v17 }
 0x1ea   : > { %v1825_v50 = vsel %vm1794_vm6, %v6754_v21, %v1807_v53  ;;  %vm1881_vm8 = vcmp.gt.f32.partialorder %v1832_v48, %v6919_v7  ;;  %vm1793_vm10 = vcmp.gt.f32.partialorder %v1461_v18, %v1460_v4  ;;  %v1830_v0 = vmax.f32 %v1459_v17, %v1460_v4  ;;  %v6923_v21 = vld [vmem:[#allocation18_spill] sm:$0xff]  ;;  %v6924_v48 = vld [vmem:[#allocation72_spill] sm:$0xff]  ;;  %v6925_v7 = vld [vmem:[#allocation41_spill] sm:$0xff] }
 0x1eb   : > { %v5469_v37 = vsel %vm1881_vm8, %v1825_v50, %v6920_v3  ;;  %v5471_v36 = vmul.f32 2.4738147e-06, %v1897_v51  ;;  %v5474_v20 = vsel %vm943_vm7, %v6915_v28, %v1041_v2  ;;  %v1823_v34 = vsel %vm1792_vm9, %v1806_v40, %v1821_v29  ;;  %v6926_v17 = vld [vmem:[#allocation44_spill] sm:$0xff]  ;;  %v6927_v29 = vld [vmem:[#allocation70_spill] sm:$0xff] }
 0x1ec   : > { %v1824_v60 = vsel %vm1793_vm10, %v1807_v53, %v1806_v40  ;;  %v5476_v14 = vmul.f32 2.4738147e-06, %v1898_v35  ;;  %v1831_v58 = vmax.f32 %v1460_v4, %v1461_v18  ;;  %vm1879_vm11 = vcmp.gt.f32.partialorder %v1830_v0, %v6923_v21  ;;  %v6928_v18 = vld [vmem:[#allocation73_spill] sm:$0xff] }
 0x1ed   : > { %6921 = vst [vmem:[#allocation40_spill] sm:$0xff] %v5471_v36  ;;  %vm941_vm12 = vcmp.gt.f32.partialorder %v733_v16, %v843_v22  ;;  %v5480_v26 = vsel %vm1879_vm11, %v1823_v34, %v6924_v48  ;;  %v1186_v50 = vrot.slane %v733_v16, 1  ;;  %v771_v3 = vand.u32 2147483647, %v6925_v7  ;;  %v6930_v34 = vld [vmem:[#allocation43_spill] sm:$0xff]  ;;  %v4039_v48 = vld [vmem:[#allocation8] sm:$0xff]  }
 0x1ee   : > { %6922 = vst [vmem:[#allocation39_spill] sm:$0xff] %v5476_v14  ;;  %v736_v51 = vand.u32 2147483647, %v6926_v17  ;;  %v5484_v46 = vmax.f32 %v735_v30, %v1188_v1  ;;  %vm1880_vm13 = vcmp.gt.f32.partialorder %v1831_v58, %v6927_v29  ;;  %v1039_v35 = vrot.slane %v6917_v54, 7  ;;  %3953 = vmatprep.subr.bf16.mxu1 %v4039_v48 }
 0x1ef   : > { %v5490_v28 = vsel %vm1880_vm13, %v1824_v60, %v6928_v18  ;;  %v1402_v53 = vrot.slane %v771_v3, 7  ;;  %v1430_v21 = vrot.slane %v6925_v7, 7  ;;  %v5494_v22 = vmul.f32 0.0025662621, %v5469_v37  ;;  %3954 = vmatpush3.bf16.msra.mxu1 %v4039_v48 }
 0x1f0   : > { %v846_v4 = vrot.slane %v736_v51, 7  ;;  %v1137_v40 = vsel %vm941_vm12, %v6917_v54, %v1039_v35  ;;  %v1042_v30 = vrot.slane %v6926_v17, 7  ;;  %v1189_v1 = vrot.slane %v736_v51, 1 }
 0x1f1   : > { %6929 = vst [vmem:[#allocation42_spill] sm:$0xff] %v5494_v22  ;;  %v1284_v0 = vmax.f32 %v733_v16, %v1186_v50  ;;  %vm1416_vm14 = vcmp.gt.f32.partialorder %v771_v3, %v1402_v53  ;;  %v769_v58 = vand.u32 2147483647, %v6930_v34  ;;  %v1451_v60 = vrot.slane %v771_v3, 1 }
 0x1f2   : > { %vm944_vm15 = vcmp.gt.f32.partialorder %v736_v51, %v846_v4  ;;  %v5502_v18 = vmax.f32 %v736_v51, %v1189_v1  ;;  %v1428_v2 = vrot.slane %v6930_v34, 7  ;;  %v5506_v22 = vsel %vm1416_vm14, %v6925_v7, %v1430_v21 }
 0x1f3   : > { %v5500_v29 = vsel %vm944_vm15, %v6926_v17, %v1042_v30  ;;  %v1400_v35 = vrot.slane %v769_v58, 7  ;;  %v1449_v16 = vrot.slane %v769_v58, 1  ;;  %v6932_v17 = vld [vmem:[#allocation45_spill] sm:$0xff]  ;;  %v6933_v7 = vrot.slane %v5474_v20, 1 }
 0x1f4   : > { %v6756_v54 = vrot.slane %v5500_v29, 1  ;;  %vm1500_vm1 = vcmp.gt.f32.partialorder %v5502_v18, %v5484_v46  ;;  %v5513_v50 = vmax.f32 %v5484_v46, %v5502_v18  ;;  %v734_v51 = vand.u32 2147483647, %v6932_v17  ;;  %v6935_v30 = vld [vmem:[#allocation49_spill] sm:$0xff] }
 0x1f5   : > { %v1040_v53 = vrot.slane %v6932_v17, 7  ;;  %vm1414_vm2 = vcmp.gt.f32.partialorder %v769_v58, %v1400_v35  ;;  %v5523_v4 = vmax.f32 %v769_v58, %v1449_v16  ;;  %v739_v1 = vand.u32 2147483647, %v6935_v30 }
 0x1f6   : > { %6931 = vst [vmem:[#allocation64_spill] sm:$0xff] %v5513_v50  ;;  %v5521_v21 = vsel %vm1500_vm1, %v6756_v54, %v6933_v7  ;;  %vm1853_vm3 = vcmp.gt.f32.partialorder %v5513_v50, %v5149_v39  ;;  %v5529_v14 = vsel %vm1414_vm2, %v6930_v34, %v1428_v2  ;;  %v844_v36 = vrot.slane %v734_v51, 7 }
 0x1f7   : > { %6934 = vst [vmem:[#allocation66_spill] sm:$0xff] %v5521_v21  ;;  %v1187_v24 = vrot.slane %v734_v51, 1  ;;  %v1902_v48 = vsel %vm1853_vm3, %v5521_v21, %v5163_v59  ;;  %vm1795_vm4 = vcmp.gt.f32.partialorder %v5523_v4, %v5455_v11  ;;  %v6761_v35 = vrot.slane %v5529_v14, 1  ;;  %v6937_v21 = vld [vmem:[#allocation25_spill] sm:$0xff] }
 0x1f8   : > { %v1833_v58 = vmax.f32 %v5455_v11, %v5523_v4  ;;  %v1958_v16 = vmul.f32 0.0030847848, %v1902_v48  ;;  %v2007_v7 = vmul.f32 0.66381663, %v1902_v48  ;;  %v2070_v54 = vmul.f32 0.0025662621, %v1902_v48 }
 0x1f9   : > { %vm942_vm5 = vcmp.gt.f32.partialorder %v734_v51, %v844_v36  ;;  %v6936_v39 = vrot.slane %v5458_v49, 1  ;;  %v1285_v34 = vmax.f32 %v734_v51, %v1187_v24  ;;  %v6939_v36 = vld [vmem:[#allocation21_spill] sm:$0xff]  ;;  %v1683_v49 = vrot.slane %v1137_v40, 1 }
 0x1fa   : > { %vm1882_vm6 = vcmp.gt.f32.partialorder %v1833_v58, %v5159_v27  ;;  %v1138_v59 = vsel %vm942_vm5, %v6932_v17, %v1040_v53  ;;  %v5545_v50 = vadd.f32 %v1958_v16, %v6937_v21  ;;  %v5548_v33 = vadd.f32 %v2007_v7, %v6938_v13  ;;  %v6940_v53 = vld [vmem:[#allocation50_spill] sm:$0xff]  ;;  %v6942_v58 = vld [vmem:[#allocation83_spill] sm:$0xff] }
 0x1fb   : > { %v1826_v2 = vsel %vm1795_vm4, %v6761_v35, %v6936_v39  ;;  %v5551_v11 = vadd.f32 %v2070_v54, %v5315_v61  ;;  %v5556_v31 = vmax.f32 %v771_v3, %v1451_v60  ;;  %vm1498_vm7 = vcmp.gt.f32.partialorder %v1285_v34, %v1284_v0  ;;  %v6945_v7 = vld [vmem:[#allocation82_spill] sm:$0xff] }
 0x1fc   : > { %v5554_v48 = vsel %vm1882_vm6, %v1826_v2, %v6939_v36  ;;  %vm1499_vm8 = vcmp.gt.f32.partialorder %v5484_v46, %v1285_v34  ;;  %v1596_v27 = vrot.slane %v1138_v59, 1  ;;  %v5559_v24 = vmax.f32 %v1284_v0, %v1285_v34  ;;  %v6943_v0 = vld [vmem:[#allocation84_spill] sm:$0xff] }
 0x1fd   : > { %v5562_v17 = vmax.f32 %v1285_v34, %v5484_v46  ;;  %v849_v13 = vrot.slane %v739_v1, 7  ;;  %v1045_v61 = vrot.slane %v6935_v30, 7  ;;  %v1192_v54 = vrot.slane %v739_v1, 1  ;;  %v6944_v46 = vld [vmem:[#allocation80_spill] sm:$0xff] }
 0x1fe   : > { %v737_v21 = vand.u32 2147483647, %v6940_v53  ;;  %v5567_v40 = vsel %vm1498_vm7, %v1596_v27, %v1683_v49  ;;  %v6941_v3 = vrot.slane %v5474_v20, 1  ;;  %vm1851_vm9 = vcmp.gt.f32.partialorder %v5559_v24, %v6942_v58 }
 0x1ff   : > { %vm1852_vm10 = vcmp.gt.f32.partialorder %v5562_v17, %v6943_v0  ;;  %v1900_v16 = vsel %vm1851_vm9, %v5567_v40, %v6944_v46  ;;  %vm947_vm11 = vcmp.gt.f32.partialorder %v739_v1, %v849_v13  ;;  %v1043_v2 = vrot.slane %v6940_v53, 7 }
 0x200   : > { %v5571_v60 = vsel %vm1499_vm8, %v6941_v3, %v1596_v27  ;;  %v1956_v59 = vmul.f32 0.0030847848, %v1900_v16  ;;  %v2005_v20 = vmul.f32 0.66381663, %v1900_v16  ;;  %v5583_v36 = vsel %vm947_vm11, %v6935_v30, %v1045_v61 }
 0x201   : > { %v1901_v39 = vsel %vm1852_vm10, %v5571_v60, %v6945_v7  ;;  %v2068_v27 = vmul.f32 0.0025662621, %v1900_v16  ;;  %v5585_v58 = vmax.f32 %v739_v1, %v1192_v54  ;;  %v847_v61 = vrot.slane %v737_v21, 7  ;;  %v6949_v54 = vld [vmem:[#allocation51_spill] sm:$0xff] }
 0x202   : > { %v1957_v34 = vmul.f32 0.0030847848, %v1901_v39  ;;  %v2006_v49 = vmul.f32 0.66381663, %v1901_v39  ;;  %v2069_v3 = vmul.f32 0.0025662621, %v1901_v39  ;;  %v5588_v0 = vadd.f32 %v1956_v59, %v5253_v8 }
 0x203   : > { %v5594_v13 = vadd.f32 %v2005_v20, %v5259_v23  ;;  %v5601_v30 = vadd.f32 %v2068_v27, %v5375_v52  ;;  %v1190_v8 = vrot.slane %v737_v21, 1  ;;  %v772_v16 = vand.u32 2147483647, %v6949_v54  ;;  %v6950_v39 = vld [vmem:[#allocation52_spill] sm:$0xff] }
 0x204   : > { %v5591_v46 = vadd.f32 %v1957_v34, %v5256_v44  ;;  %v5598_v35 = vadd.f32 %v2006_v49, %v5267_v47  ;;  %v5604_v1 = vadd.f32 %v2069_v3, %v5382_v32  ;;  %v1471_v44 = vrot.slane %v6949_v54, 7  ;;  %v6951_v34 = vld [vmem:[#allocation53_spill] sm:$0xff] }
 0x205   : > { %6947 = vst [vmem:[#allocation72_spill] sm:$0xff] %v5601_v30  ;;  %v740_v23 = vand.u32 2147483647, %v6950_v39  ;;  %vm945_vm12 = vcmp.gt.f32.partialorder %v737_v21, %v847_v61  ;;  %v1350_v59 = vrot.slane %v6950_v39, 7  ;;  %v770_v47 = vand.u32 2147483647, %v6951_v34 }
 0x206   : > { %6946 = vst [vmem:[#allocation18_spill] sm:$0xff] %v5598_v35  ;;  %6948 = vst [vmem:[#allocation41_spill] sm:$0xff] %v5604_v1  ;;  %v1429_v20 = vrot.slane %v6951_v34, 7  ;;  %v5613_v52 = vsel %vm945_vm12, %v6940_v53, %v1043_v2  ;;  %v5615_v32 = vmax.f32 %v737_v21, %v1190_v8  ;;  %v1467_v49 = vrot.slane %v772_v16, 7 }
 0x207   : > { %v1474_v27 = vrot.slane %v772_v16, 1  ;;  %v1599_v3 = vrot.slane %v5613_v52, 1  ;;  %v1322_v7 = vrot.slane %v740_v23, 7  ;;  %v1371_v51 = vrot.slane %v740_v23, 1 }
 0x208   : > { %v1401_v1 = vrot.slane %v770_v47, 7  ;;  %vm1501_vm13 = vcmp.gt.f32.partialorder %v5615_v32, %v5502_v18  ;;  %v5622_v61 = vmax.f32 %v5502_v18, %v5615_v32  ;;  %vm1469_vm14 = vcmp.gt.f32.partialorder %v772_v16, %v1467_v49 }
 0x209   : > { %v1476_v30 = vmax.f32 %v772_v16, %v1474_v27  ;;  %v6952_v53 = vrot.slane %v5500_v29, 1  ;;  %v1473_v2 = vsel %vm1469_vm14, %v6949_v54, %v1471_v44  ;;  %vm1336_vm15 = vcmp.gt.f32.partialorder %v740_v23, %v1322_v7 }
 0x20a   : > { %v1385_v8 = vmax.f32 %v740_v23, %v1371_v51  ;;  %vm1854_vm1 = vcmp.gt.f32.partialorder %v5622_v61, %v5285_v56  ;;  %v1812_v35 = vrot.slane %v1473_v2, 1  ;;  %v1364_v29 = vsel %vm1336_vm15, %v6950_v39, %v1350_v59  ;;  %v6956_v2 = vld [vmem:[#allocation20_spill] sm:$0xff] }
 0x20b   : > { %v5628_v21 = vsel %vm1501_vm13, %v1599_v3, %v6952_v53  ;;  %vm1798_vm2 = vcmp.gt.f32.partialorder %v1476_v30, %v5556_v31  ;;  %v1836_v18 = vmax.f32 %v5556_v31, %v1476_v30  ;;  %v6953_v44 = vrot.slane %v5506_v22, 1  ;;  %v6954_v30 = vld [vmem:[#allocation19_spill] sm:$0xff] }
 0x20c   : > { %v1903_v16 = vsel %vm1854_vm1, %v5628_v21, %v5295_v19  ;;  %vm1504_vm3 = vcmp.gt.f32.partialorder %v1385_v8, %v5585_v58  ;;  %v1770_v49 = vmax.f32 %v5585_v58, %v1385_v8  ;;  %v1602_v23 = vrot.slane %v1364_v29, 1 }
 0x20d   : > { %v1959_v54 = vmul.f32 0.0030847848, %v1903_v16  ;;  %v2008_v7 = vmul.f32 0.66381663, %v1903_v16  ;;  %v2071_v51 = vmul.f32 0.0025662621, %v1903_v16  ;;  %v1829_v56 = vsel %vm1798_vm2, %v1812_v35, %v6953_v44 }
 0x20e   : > { %vm1885_vm4 = vcmp.gt.f32.partialorder %v1836_v18, %v5289_v12  ;;  %vm1857_vm5 = vcmp.gt.f32.partialorder %v1770_v49, %v5330_v9  ;;  %vm1864_vm6 = vcmp.gt.f32.partialorder %v6954_v30, %v1770_v49  ;;  %v5656_v35 = vmul.f32 0.7979433, %v5469_v37 }
 0x20f   : > { %v5646_v19 = vadd.f32 %v1959_v54, %v5320_v55  ;;  %v5649_v39 = vadd.f32 %v2008_v7, %v5323_v62  ;;  %v5652_v59 = vadd.f32 %v2071_v51, %v5384_v63  ;;  %v1934_v27 = vsel %vm1885_vm4, %v1829_v56, %v5301_v15 }
 0x210   : > { %v2172_v12 = vmul.f32 0.7979433, %v1934_v27  ;;  %v6955_v53 = vrot.slane %v5583_v36, 1  ;;  %vm1415_vm7 = vcmp.gt.f32.partialorder %v770_v47, %v1401_v1  ;;  %v1450_v63 = vrot.slane %v770_v47, 1  ;;  %v6957_v1 = vld [vmem:[#allocation57_spill] sm:$0xff] }
 0x211   : > { %v1443_v18 = vsel %vm1415_vm7, %v6951_v34, %v1429_v20  ;;  %v738_v56 = vand.u32 2147483647, %v6957_v1 }
 0x212   : > { %v1721_v9 = vsel %vm1504_vm3, %v1602_v23, %v6955_v53  ;;  %v1464_v7 = vmax.f32 %v770_v47, %v1450_v63  ;;  %v1810_v44 = vrot.slane %v1443_v18, 1  ;;  %v6958_v23 = vld [vmem:[#allocation60_spill] sm:$0xff]  ;;  %v6959_v53 = vrot.slane %v5529_v14, 1  ;;  %v6962_v63 = vld [vmem:[#allocation58_spill] sm:$0xff] }
 0x213   : > { %v1906_v55 = vsel %vm1857_vm5, %v1721_v9, %v5327_v25  ;;  %v1913_v62 = vsel %vm1864_vm6, %v6956_v2, %v1721_v9  ;;  %v5683_v18 = vmul.f32 0.7979433, %v5480_v26  ;;  %v848_v14 = vrot.slane %v738_v56, 7 }
 0x214   : > { %v1962_v16 = vmul.f32 0.0030847848, %v1906_v55  ;;  %v1976_v29 = vmul.f32 2.973658e-06, %v1913_v62  ;;  %v2011_v15 = vmul.f32 0.66381663, %v1906_v55  ;;  %vm1796_vm8 = vcmp.gt.f32.partialorder %v1464_v7, %v5523_v4 }
 0x215   : > { %v2025_v49 = vmul.f32 0.16552415, %v1913_v62  ;;  %v2074_v37 = vmul.f32 0.0025662621, %v1906_v55  ;;  %v2137_v54 = vmul.f32 2.9736582e-06, %v1913_v62  ;;  %vm1797_vm9 = vcmp.gt.f32.partialorder %v5556_v31, %v1464_v7 }
 0x216   : > { %v1969_v51 = vadd.f32 %v1962_v16, %v5355_v57  ;;  %v2018_v8 = vadd.f32 %v2011_v15, %v5358_v38  ;;  %v1827_v47 = vsel %vm1796_vm8, %v1810_v44, %v6959_v53  ;;  %v6960_v57 = vrot.slane %v5506_v22, 1  ;;  %6961 = vst [vmem:[#allocation44_spill] sm:$0xff] %v5683_v18 }
 0x217   : > { %v2081_v25 = vadd.f32 %v2074_v37, %v5395_v5  ;;  %v2151_v30 = vadd.f32 %v6958_v23, %v2137_v54  ;;  %v1834_v2 = vmax.f32 %v5523_v4, %v1464_v7  ;;  %v1835_v5 = vmax.f32 %v1464_v7, %v5556_v31  ;;  %v6965_v54 = vld [vmem:[#allocation22_spill] sm:$0xff] }
 0x218   : > { %v1983_v34 = vadd.f32 %v1976_v29, %v1969_v51  ;;  %v2032_v20 = vadd.f32 %v2025_v49, %v2018_v8  ;;  %v1828_v9 = vsel %vm1797_vm9, %v6960_v57, %v1810_v44  ;;  %v5680_v62 = vmul.f32 0.0025662621, %v5480_v26  ;;  %v6963_v29 = vld [vmem:[#allocation59_spill] sm:$0xff] }
 0x219   : > { %v2088_v38 = vadd.f32 %v2081_v25, %v2025_v49  ;;  %v2165_v55 = vadd.f32 %v5393_v42, %v2151_v30  ;;  %vm1883_vm10 = vcmp.gt.f32.partialorder %v1834_v2, %v5352_v6  ;;  %vm1884_vm11 = vcmp.gt.f32.partialorder %v1835_v5, %v5361_v45 }
 0x21a   : > { %v2046_v16 = vadd.f32 %v6962_v63, %v2032_v20  ;;  %v5690_v42 = vmul.f32 0.0025662621, %v5490_v28  ;;  %v1932_v4 = vsel %vm1883_vm10, %v1827_v47, %v5365_v10  ;;  %v1933_v26 = vsel %vm1884_vm11, %v1828_v9, %v5369_v41  ;;  %v6969_v47 = vld [vmem:[#allocation71_spill] sm:$0xff] }
 0x21b   : > { %v2102_v15 = vadd.f32 %v6963_v29, %v2088_v38  ;;  %v2179_v22 = vadd.f32 %v2172_v12, %v2165_v55  ;;  %v5696_v49 = vmul.f32 0.7979433, %v5490_v28  ;;  %v5699_v37 = vmul.f32 0.0025662621, %v5554_v48  ;;  %v6971_v55 = vld [vmem:[#allocation76_spill] sm:$0xff] }
 0x21c   : > { %v2060_v31 = vadd.f32 %v5388_v43, %v2046_v16  ;;  %v2123_v12 = vmul.f32 0.0025662621, %v1934_v27  ;;  %v5703_v45 = vmul.f32 0.7979433, %v5554_v48  ;;  %v5705_v7 = vmul.f32 0.0025662621, %v1983_v34 }
 0x21d   : > { %6964 = vst [vmem:[#allocation70_spill] sm:$0xff] %v5696_v49  ;;  %v2116_v6 = vadd.f32 %v6965_v54, %v2102_v15  ;;  %v5707_v51 = vmul.f32 0.7979433, %v1983_v34  ;;  %vm946_vm12 = vcmp.gt.f32.partialorder %v738_v56, %v848_v14  ;;  %v5709_v43 = vmul.f32 0.0025662621, %v2179_v22  ;;  %v6973_v15 = vld [vmem:[#allocation34_spill] sm:$0xff] }
 0x21e   : > { %6966 = vst [vmem:[#allocation73_spill] sm:$0xff] %v5705_v7  ;;  %v5711_v41 = vmul.f32 0.7979433, %v2179_v22  ;;  %v1044_v28 = vrot.slane %v6957_v1, 7  ;;  %v5714_v8 = vmul.f32 0.0025662621, %v2060_v31 }
 0x21f   : > { %v2130_v10 = vadd.f32 %v2123_v12, %v2116_v6  ;;  %6967 = vst [vmem:[#allocation43_spill] sm:$0xff] %v5709_v43  ;;  %v5716_v27 = vmul.f32 0.0025662621, %v1932_v4  ;;  %v1191_v44 = vrot.slane %v738_v56, 1  ;;  %v5718_v25 = vmul.f32 0.7979433, %v2060_v31 }
 0x220   : > { %6968 = vst [vmem:[#allocation45_spill] sm:$0xff] %v5714_v8  ;;  %v5720_v48 = vmul.f32 0.0025662621, %v1933_v26  ;;  %v5722_v23 = vmul.f32 0.7979433, %v1932_v4  ;;  %v1142_v30 = vsel %vm946_vm12, %v6957_v1, %v1044_v28  ;;  %v6972_v16 = vrot.slane %v5583_v36, 1 }
 0x221   : > { %v2171_v34 = vmul.f32 0.7979433, %v1933_v26  ;;  %v1289_v20 = vmax.f32 %v738_v56, %v1191_v44  ;;  %v1600_v53 = vrot.slane %v1142_v30, 1  ;;  %v5726_v57 = vand.u32 2147483647, %v6969_v47  ;;  %v6974_v22 = vld [vmem:[#allocation24_spill] sm:$0xff] }
 0x222   : > { %v5728_v9 = vmul.f32 0.0025662621, %v2130_v10  ;;  %v5732_v2 = vand.u32 2147483647, %v6971_v55  ;;  %v5738_v56 = vmul.f32 0.7979433, %v2130_v10 }
 0x223   : > { %vm1502_vm13 = vcmp.gt.f32.partialorder %v1289_v20, %v5615_v32  ;;  %vm1503_vm14 = vcmp.gt.f32.partialorder %v5585_v58, %v1289_v20  ;;  %v1768_v5 = vmax.f32 %v5615_v32, %v1289_v20  ;;  %v1769_v1 = vmax.f32 %v1289_v20, %v5585_v58  ;;  %v6975_v31 = vld [vmem:[#allocation55_spill] sm:$0xff]  ;;  %v6976_v4 = vld [vmem:[#allocation56_spill] sm:$0xff]  ;;  %v6979_v54 = vld [vmem:[#allocation26_spill] sm:$0xff] }
 0x224   : > { %6970 = vst [vmem:[#allocation49_spill] sm:$0xff] %v5728_v9  ;;  %v1719_v63 = vsel %vm1502_vm13, %v1600_v53, %v1599_v3  ;;  %v1720_v14 = vsel %vm1503_vm14, %v6972_v16, %v1600_v53  ;;  %v6977_v32 = vld [vmem:[#allocation31_spill] sm:$0xff]  ;;  %v6985_v8 = vld [vmem:[#allocation40_spill] sm:$0xff] }
 0x225   : > { %vm1855_vm15 = vcmp.gt.f32.partialorder %v1768_v5, %v6973_v15  ;;  %vm1856_vm1 = vcmp.gt.f32.partialorder %v1769_v1, %v6974_v22  ;;  %vm1862_vm2 = vcmp.gt.f32.partialorder %v6975_v31, %v1768_v5  ;;  %vm1863_vm3 = vcmp.gt.f32.partialorder %v6976_v4, %v1769_v1  ;;  %v6978_v26 = vld [vmem:[#allocation87_spill] sm:$0xff]  ;;  %v6982_v15 = vld [vmem:[#allocation92_spill] sm:$0xff]  ;;  %v6983_v31 = vld [vmem:[#allocation93_spill] sm:$0xff] }
 0x226   : > { %v1904_v58 = vsel %vm1855_vm15, %v1719_v63, %v6977_v32  ;;  %v1905_v12 = vsel %vm1856_vm1, %v1720_v14, %v6978_v26  ;;  %v1911_v52 = vsel %vm1862_vm2, %v6979_v54, %v1719_v63  ;;  %v6980_v3 = vld [vmem:[#allocation27_spill] sm:$0xff]  ;;  %v6984_v32 = vld [vmem:[#allocation94_spill] sm:$0xff] }
 0x227   : > { %v1912_v6 = vsel %vm1863_vm3, %v6980_v3, %v1720_v14  ;;  %v1960_v36 = vmul.f32 0.0030847848, %v1904_v58  ;;  %v1961_v10 = vmul.f32 0.0030847848, %v1905_v12  ;;  %v1974_v28 = vmul.f32 2.973658e-06, %v1911_v52 }
 0x228   : > { %v1975_v44 = vmul.f32 2.973658e-06, %v1912_v6  ;;  %v2009_v30 = vmul.f32 0.66381663, %v1904_v58  ;;  %v2010_v20 = vmul.f32 0.66381663, %v1905_v12 }
 0x229   : > { %v6981_v53 = vld [vmem:[#allocation91_spill] sm:$0xff]  ;;  %v1968_v5 = vadd.f32 %v1961_v10, %v6982_v15  ;;  %v2023_v22 = vmul.f32 0.16552415, %v1911_v52  ;;  %v2024_v1 = vmul.f32 0.16552415, %v1912_v6  ;;  %v6988_v15 = vld [vmem:[#allocation69_spill] sm:$0xff] }
 0x22a   : > { %v1967_v16 = vadd.f32 %v1960_v36, %v6981_v53  ;;  %v2016_v4 = vadd.f32 %v2009_v30, %v6983_v31  ;;  %v2017_v26 = vadd.f32 %v2010_v20, %v6984_v32  ;;  %v2072_v29 = vmul.f32 0.0025662621, %v1904_v58  ;;  %v6986_v49 = vld [vmem:[#allocation39_spill] sm:$0xff]  ;;  %v6987_v53 = vld [vmem:[#allocation65_spill] sm:$0xff] }
 0x22b   : > { %v2073_v63 = vmul.f32 0.0025662621, %v1905_v12  ;;  %v1982_v14 = vadd.f32 %v1975_v44, %v1968_v5  ;;  %v2135_v3 = vmul.f32 2.9736582e-06, %v1911_v52  ;;  %v2136_v38 = vmul.f32 2.9736582e-06, %v1912_v6 }
 0x22c   : > { %v1981_v54 = vadd.f32 %v1974_v28, %v1967_v16  ;;  %v2030_v43 = vadd.f32 %v2023_v22, %v2016_v4  ;;  %v2031_v9 = vadd.f32 %v2024_v1, %v2017_v26  ;;  %v2079_v7 = vadd.f32 %v2072_v29, %v6985_v8  ;;  %v6989_v58 = vld [vmem:[#allocation61_spill] sm:$0xff]  ;;  %v6990_v28 = vld [vmem:[#allocation16_spill] sm:$0xff]  ;;  %v6992_v31 = vld [vmem:[#allocation35_spill] sm:$0xff] }
 0x22d   : > { %v2080_v36 = vadd.f32 %v2073_v63, %v6986_v49  ;;  %v2149_v10 = vadd.f32 %v6987_v53, %v2135_v3  ;;  %v2150_v18 = vadd.f32 %v6988_v15, %v2136_v38  ;;  %v852_v30 = vrot.slane %v5726_v57, 7  ;;  %v6991_v16 = vld [vmem:[#allocation88_spill] sm:$0xff]  ;;  %v6993_v4 = vld [vmem:[#allocation38_spill] sm:$0xff]  ;;  %v6994_v32 = vld [vmem:[#allocation89_spill] sm:$0xff] }
 0x22e   : > { %v1195_v20 = vrot.slane %v5726_v57, 1  ;;  %v2044_v12 = vadd.f32 %v6989_v58, %v2030_v43  ;;  %v2045_v44 = vadd.f32 %v6990_v28, %v2031_v9  ;;  %v2086_v52 = vadd.f32 %v2079_v7, %v2023_v22  ;;  %v6995_v63 = vld [vmem:[#allocation15_spill] sm:$0xff]  ;;  %v6997_v22 = vld [vmem:[#allocation77_spill] sm:$0xff]  ;;  %v6999_v15 = vld [vmem:[#allocation90_spill] sm:$0xff] }
 0x22f   : > { %v2087_v6 = vadd.f32 %v2080_v36, %v2024_v1  ;;  %v2163_v5 = vadd.f32 %v6991_v16, %v2149_v10  ;;  %v2164_v8 = vadd.f32 %v6992_v31, %v2150_v18  ;;  %v850_v49 = vrot.slane %v5732_v2, 7  ;;  %v6996_v53 = vld [vmem:[#allocation63_spill] sm:$0xff]  ;;  %v6998_v18 = vld [vmem:[#allocation29_spill] sm:$0xff] }
 0x230   : > { %v1193_v29 = vrot.slane %v5732_v2, 1  ;;  %v2058_v38 = vadd.f32 %v6993_v4, %v2044_v12  ;;  %v2059_v26 = vadd.f32 %v6994_v32, %v2045_v44  ;;  %v2100_v3 = vadd.f32 %v6995_v63, %v2086_v52 }
 0x231   : > { %v2101_v43 = vadd.f32 %v6996_v53, %v2087_v6  ;;  %v2177_v9 = vadd.f32 %v5722_v23, %v2163_v5  ;;  %v2178_v7 = vadd.f32 %v2171_v34, %v2164_v8  ;;  %v744_v1 = vand.u32 2147483647, %v6997_v22 }
 0x232   : > { %v1049_v36 = vrot.slane %v6997_v22, 7  ;;  %v2114_v10 = vadd.f32 %v6998_v18, %v2100_v3  ;;  %v5778_v28 = vmul.f32 0.0025662621, %v1981_v54  ;;  %v5780_v12 = vmul.f32 2.4738147e-06, %v1982_v14 }
 0x233   : > { %v2115_v58 = vadd.f32 %v6999_v15, %v2101_v43  ;;  %v5782_v44 = vmul.f32 0.66381663, %v1981_v54  ;;  %v5784_v52 = vmul.f32 0.16552415, %v1982_v14  ;;  %v5786_v6 = vmul.f32 0.003084785, %v1981_v54 }
 0x234   : > { %7000 = vst [vmem:[#allocation25_spill] sm:$0xff] %v5780_v12  ;;  %vm5789_vm4 = vcmp.gt.f32.partialorder %v5726_v57, %v852_v30  ;;  %v2128_v34 = vadd.f32 %v5716_v27, %v2114_v10  ;;  %v5795_v5 = vmul.f32 0.0025662621, %v2058_v38  ;;  %v5797_v31 = vmul.f32 0.19896893, %v1982_v14 }
 0x235   : > { %7001 = vst [vmem:[#allocation79_spill] sm:$0xff] %v5782_v44  ;;  %7002 = vst [vmem:[#allocation21_spill] sm:$0xff] %v5784_v52  ;;  %v2129_v16 = vadd.f32 %v5720_v48, %v2115_v58  ;;  %v5799_v8 = vmul.f32 0.0025662621, %v2177_v9  ;;  %v5801_v4 = vmul.f32 2.4738147e-06, %v2059_v26  ;;  %vm948_vm5 = vcmp.gt.f32.partialorder %v5732_v2, %v850_v49 }
 0x236   : > { %v5803_v32 = vmul.f32 2.4738147e-06, %v2178_v7  ;;  %v5806_v54 = vmul.f32 0.66381663, %v2058_v38  ;;  %v5808_v30 = vmul.f32 0.66381663, %v2177_v9  ;;  %v5813_v27 = vmax.f32 %v5726_v57, %v1195_v20 }
 0x237   : > { %7005 = vst [vmem:[#allocation50_spill] sm:$0xff] %v5799_v8  ;;  %7006 = vst [vmem:[#allocation83_spill] sm:$0xff] %v5801_v4  ;;  %v5810_v63 = vmul.f32 0.16552415, %v2059_v26  ;;  %v5815_v48 = vmul.f32 0.16552415, %v2178_v7 }
 0x238   : > { %7007 = vst [vmem:[#allocation84_spill] sm:$0xff] %v5803_v32  ;;  %7008 = vst [vmem:[#allocation80_spill] sm:$0xff] %v5806_v54  ;;  %v5817_v14 = vmul.f32 0.003084785, %v2058_v38  ;;  %v5819_v3 = vmul.f32 0.003084785, %v2177_v9 }
 0x239   : > { %7009 = vst [vmem:[#allocation82_spill] sm:$0xff] %v5808_v30  ;;  %7010 = vst [vmem:[#allocation51_spill] sm:$0xff] %v5810_v63  ;;  %v7012_v53 = vrot.slane %v6969_v47, 7  ;;  %v5828_v43 = vmul.f32 0.0025662621, %v2128_v34  ;;  %v7016_v57 = vrot.slane %v6971_v55, 7  ;;  %v5849_v63 = vmax.f32 %v5732_v2, %v1193_v29 }
 0x23a   : > { %7011 = vst [vmem:[#allocation52_spill] sm:$0xff] %v5815_v48  ;;  %v5830_v18 = vmul.f32 2.4738147e-06, %v2129_v16  ;;  %v5832_v10 = vmul.f32 0.66381663, %v2128_v34  ;;  %v853_v9 = vrot.slane %v744_v1, 7 }
 0x23b   : > { %v5826_v49 = vsel %vm5789_vm4, %v6969_v47, %v7012_v53  ;;  %7013 = vst [vmem:[#allocation53_spill] sm:$0xff] %v5828_v43  ;;  %v5837_v20 = vsel %vm948_vm5, %v6971_v55, %v7016_v57  ;;  %v5839_v38 = vmul.f32 0.16552415, %v2129_v16  ;;  %v1196_v15 = vrot.slane %v744_v1, 1  ;;  %v7018_v58 = vld [vmem:[#allocation32_spill] sm:$0xff]  ;;  %v7028_v44 = vld [vmem:[#allocation46_spill] sm:$0xff] }
 0x23c   : > { %7014 = vst [vmem:[#allocation19_spill] sm:$0xff] %v5830_v18  ;;  %7015 = vst [vmem:[#allocation20_spill] sm:$0xff] %v5832_v10  ;;  %v742_v48 = vand.u32 2147483647, %v7018_v58  ;;  %v5842_v23 = vmul.f32 0.003084785, %v2128_v34  ;;  %vm951_vm6 = vcmp.gt.f32.partialorder %v744_v1, %v853_v9 }
 0x23d   : > { %7017 = vst [vmem:[#allocation57_spill] sm:$0xff] %v5839_v38  ;;  %v5844_v47 = vmul.f32 0.19896893, %v2059_v26  ;;  %v5846_v53 = vmul.f32 0.19896893, %v2129_v16  ;;  %v1294_v52 = vmax.f32 %v744_v1, %v1196_v15  ;;  %v6762_v38 = vrot.slane %v5826_v49, 1 }
 0x23e   : > { %v851_v30 = vrot.slane %v742_v48, 7  ;;  %v1194_v55 = vrot.slane %v742_v48, 1  ;;  %v5851_v57 = vmul.f32 0.19896893, %v2178_v7  ;;  %v1147_v34 = vsel %vm951_vm6, %v6997_v22, %v1049_v36  ;;  %v7019_v26 = vld [vmem:[#allocation14_spill] sm:$0xff]  ;;  %v7022_v36 = vld [vmem:[#allocation13_spill] sm:$0xff] }
 0x23f   : > { %vm1507_vm7 = vcmp.gt.f32.partialorder %v1294_v52, %v5813_v27  ;;  %vm1508_vm8 = vcmp.gt.f32.partialorder %v7019_v26, %v1294_v52  ;;  %v1605_v16 = vrot.slane %v1147_v34, 1  ;;  %v1773_v2 = vmax.f32 %v5813_v27, %v1294_v52  ;;  %v7024_v54 = vld [vmem:[#allocation64_spill] sm:$0xff]  ;;  %v7025_v34 = vld [vmem:[#allocation62_spill] sm:$0xff] }
 0x240   : > { %v1774_v29 = vmax.f32 %v1294_v52, %v7019_v26  ;;  %vm5860_vm9 = vcmp.gt.f32.partialorder %v742_v48, %v851_v30  ;;  %v1047_v7 = vrot.slane %v7018_v58, 7  ;;  %v5865_v9 = vmax.f32 %v742_v48, %v1194_v55  ;;  %v7026_v52 = vld [vmem:[#allocation78_spill] sm:$0xff] }
 0x241   : > { %v1724_v22 = vsel %vm1507_vm7, %v1605_v16, %v6762_v38  ;;  %v7023_v15 = vrot.slane %v7022_v36, 1  ;;  %vm1860_vm10 = vcmp.gt.f32.partialorder %v1773_v2, %v7024_v54  ;;  %vm1867_vm11 = vcmp.gt.f32.partialorder %v7025_v34, %v1773_v2  ;;  %v7027_v30 = vld [vmem:[#allocation66_spill] sm:$0xff] }
 0x242   : > { %vm1861_vm12 = vcmp.gt.f32.partialorder %v1774_v29, %v5622_v61  ;;  %vm1868_vm13 = vcmp.gt.f32.partialorder %v7026_v52, %v1774_v29  ;;  %v1909_v26 = vsel %vm1860_vm10, %v1724_v22, %v7027_v30  ;;  %v1916_v32 = vsel %vm1867_vm11, %v7028_v44, %v1724_v22  ;;  %v7029_v55 = vld [vmem:[#allocation54_spill] sm:$0xff] }
 0x243   : > { %v1725_v10 = vsel %vm1508_vm8, %v7023_v15, %v1605_v16  ;;  %v1972_v38 = vmul.f32 2.973658e-06, %v1909_v26  ;;  %v2021_v4 = vmul.f32 0.16552415, %v1909_v26  ;;  %v2035_v15 = vmul.f32 0.0025662621, %v1916_v32 }
 0x244   : > { %v1910_v48 = vsel %vm1861_vm12, %v1725_v10, %v5628_v21  ;;  %v1917_v18 = vsel %vm1868_vm13, %v7029_v55, %v1725_v10  ;;  %v5882_v54 = vsel %vm5860_vm9, %v7018_v58, %v1047_v7  ;;  %v2091_v34 = vmul.f32 0.66381663, %v1916_v32 }
 0x245   : > { %v1973_v36 = vmul.f32 2.973658e-06, %v1910_v48  ;;  %v2022_v16 = vmul.f32 0.16552415, %v1910_v48  ;;  %v1979_v61 = vadd.f32 %v1972_v38, %v5545_v50  ;;  %v2028_v2 = vadd.f32 %v2021_v4, %v5548_v33  ;;  %v7030_v38 = vld [vmem:[#allocation17_spill] sm:$0xff] }
 0x246   : > { %v2036_v29 = vmul.f32 0.0025662621, %v1917_v18  ;;  %v2084_v44 = vadd.f32 %v5551_v11, %v2021_v4  ;;  %v2092_v30 = vmul.f32 0.66381663, %v1917_v18  ;;  %v2133_v55 = vmul.f32 2.9736582e-06, %v1909_v26 }
 0x247   : > { %v1980_v21 = vadd.f32 %v1973_v36, %v5646_v19  ;;  %v2029_v10 = vadd.f32 %v2022_v16, %v5649_v39  ;;  %v2085_v22 = vadd.f32 %v5652_v59, %v2022_v16  ;;  %v2042_v52 = vadd.f32 %v2035_v15, %v2028_v2  ;;  %v7031_v19 = vld [vmem:[#allocation36_spill] sm:$0xff]  ;;  %v7032_v4 = vld [vmem:[#allocation74_spill] sm:$0xff]  ;;  %v7033_v15 = vld [vmem:[#allocation37_spill] sm:$0xff] }
 0x248   : > { %v2134_v1 = vmul.f32 2.9736582e-06, %v1910_v48  ;;  %v2098_v7 = vadd.f32 %v2091_v34, %v2084_v44  ;;  %v2140_v12 = vmul.f32 0.003084785, %v1916_v32  ;;  %v2141_v50 = vmul.f32 0.003084785, %v1917_v18 }
 0x249   : > { %v2043_v58 = vadd.f32 %v2036_v29, %v2029_v10  ;;  %v2056_v33 = vadd.f32 %v7030_v38, %v2042_v52  ;;  %v2099_v8 = vadd.f32 %v2092_v30, %v2085_v22  ;;  %v5891_v43 = vmul.f32 0.0030847848, %v1979_v61  ;;  %v7034_v18 = vld [vmem:[#allocation42_spill] sm:$0xff]  ;;  %v7035_v44 = vld [vmem:[#allocation75_spill] sm:$0xff] }
 0x24a   : > { %v5893_v11 = vmul.f32 2.973658e-06, %v1980_v21  ;;  %v2112_v59 = vadd.f32 %v7032_v4, %v2098_v7  ;;  %v2147_v36 = vadd.f32 %v2140_v12, %v2133_v55  ;;  %v2148_v16 = vadd.f32 %v2141_v50, %v2134_v1  ;;  %v7036_v22 = vld [vmem:[#allocation30_spill] sm:$0xff] }
 0x24b   : > { %v2057_v39 = vadd.f32 %v7031_v19, %v2043_v58  ;;  %v2113_v26 = vadd.f32 %v7033_v15, %v2099_v8  ;;  %v5898_v48 = vmul.f32 0.0030847848, %v2056_v33  ;;  %v5900_v2 = vmul.f32 0.66381663, %v1979_v61 }
 0x24c   : > { %v5902_v32 = vmul.f32 0.66381663, %v2056_v33  ;;  %v2126_v29 = vadd.f32 %v7034_v18, %v2112_v59  ;;  %v2161_v10 = vadd.f32 %v7035_v44, %v2147_v36  ;;  %v2162_v34 = vadd.f32 %v7036_v22, %v2148_v16  ;;  %v7037_v22 = vld [vmem:[#allocation67_spill] sm:$0xff] }
 0x24d   : > { %v5907_v52 = vmul.f32 2.973658e-06, %v2057_v39  ;;  %v2127_v30 = vadd.f32 %v5699_v37, %v2113_v26  ;;  %v5910_v12 = vmul.f32 0.16552415, %v1980_v21  ;;  %v5912_v55 = vmul.f32 0.16552415, %v2057_v39 }
 0x24e   : > { %v5914_v8 = vmul.f32 0.0025662621, %v1979_v61  ;;  %v2175_v1 = vadd.f32 %v5656_v35, %v2161_v10  ;;  %v2176_v58 = vadd.f32 %v5703_v45, %v2162_v34  ;;  %v5918_v7 = vmul.f32 0.0030847848, %v2126_v29 }
 0x24f   : > { %v5920_v50 = vmul.f32 0.66381663, %v2126_v29  ;;  %v5922_v38 = vmul.f32 2.973658e-06, %v2127_v30  ;;  %v5924_v19 = vmul.f32 0.16552415, %v2127_v30  ;;  %vm1505_vm14 = vcmp.gt.f32.partialorder %v5865_v9, %v5849_v63 }
 0x250   : > { %v5926_v4 = vmul.f32 0.0025662621, %v2056_v33  ;;  %v5930_v37 = vmul.f32 0.0030847848, %v2175_v1  ;;  %v5932_v61 = vmul.f32 2.973658e-06, %v2176_v58  ;;  %vm1506_vm15 = vcmp.gt.f32.partialorder %v5813_v27, %v5865_v9 }
 0x251   : > { %v5934_v35 = vmul.f32 0.66381663, %v2175_v1  ;;  %v5938_v45 = vmul.f32 0.16552415, %v2176_v58  ;;  %v5940_v59 = vmul.f32 0.0025662621, %v2126_v29  ;;  %v1771_v33 = vmax.f32 %v5849_v63, %v5865_v9 }
 0x252   : > { %v5942_v36 = vmul.f32 0.0025662621, %v2175_v1  ;;  %v2292_v16 = vmul.f32 2.9736582e-06, %v1980_v21  ;;  %v2293_v15 = vmul.f32 2.9736582e-06, %v2057_v39  ;;  %v1772_v18 = vmax.f32 %v5865_v9, %v5813_v27 }
 0x253   : > { %v2294_v26 = vmul.f32 2.9736582e-06, %v2127_v30  ;;  %v2295_v44 = vmul.f32 2.9736582e-06, %v2176_v58  ;;  %v1603_v10 = vrot.slane %v5882_v54, 1  ;;  %vm1858_vm1 = vcmp.gt.f32.partialorder %v1771_v33, %v5559_v24  ;;  %v7040_v30 = vld [vmem:[#allocation68_spill] sm:$0xff] }
 0x254   : > { %vm1865_vm2 = vcmp.gt.f32.partialorder %v7037_v22, %v1771_v33  ;;  %v2300_v29 = vadd.f32 %v5786_v6, %v2292_v16  ;;  %v2301_v34 = vadd.f32 %v5817_v14, %v2293_v15  ;;  %vm1859_vm3 = vcmp.gt.f32.partialorder %v1772_v18, %v5562_v17  ;;  %v7041_v58 = vld [vmem:[#allocation47_spill] sm:$0xff]  ;;  %v7042_v33 = vld [vmem:[#allocation48_spill] sm:$0xff] }
 0x255   : > { %v2302_v1 = vadd.f32 %v5842_v23, %v2294_v26  ;;  %v2303_v21 = vadd.f32 %v5819_v3, %v2295_v44  ;;  %v7038_v39 = vrot.slane %v5837_v20, 1  ;;  %v7039_v24 = vrot.slane %v5826_v49, 1 }
 0x256   : > { %vm1866_vm4 = vcmp.gt.f32.partialorder %v7040_v30, %v1772_v18  ;;  %v2308_v14 = vadd.f32 %v5797_v31, %v2300_v29  ;;  %v2309_v17 = vadd.f32 %v5844_v47, %v2301_v34  ;;  %v7045_v34 = vld [vmem:[#allocation41_spill] sm:$0xff]  ;;  %vm2576_vm5 = vcmask 122880  }
 0x257   : > { %v1722_v54 = vsel %vm1505_vm14, %v1603_v10, %v7038_v39  ;;  %v1723_v6 = vsel %vm1506_vm15, %v7039_v24, %v1603_v10  ;;  %v2310_v3 = vadd.f32 %v5846_v53, %v2302_v1  ;;  %v2311_v23 = vadd.f32 %v5851_v57, %v2303_v21  ;;  %v7043_v10 = vld [vmem:[#allocation18_spill] sm:$0xff] }
 0x258   : > { %v1907_v20 = vsel %vm1858_vm1, %v1722_v54, %v5567_v40  ;;  %v1908_v63 = vsel %vm1859_vm3, %v1723_v6, %v5571_v60  ;;  %v1914_v49 = vsel %vm1865_vm2, %v7041_v58, %v1722_v54  ;;  %v1915_v16 = vsel %vm1866_vm4, %v7042_v33, %v1723_v6  ;;  %v7048_v33 = vld [vmem:[#allocation81_spill] sm:$0xff] }
 0x259   : > { %v5976_v27 = vadd.f32 %v5707_v51, %v2308_v14  ;;  %v5979_v9 = vadd.f32 %v5718_v25, %v2309_v17  ;;  %v5982_v31 = vadd.f32 %v5738_v56, %v2310_v3  ;;  %v1970_v47 = vmul.f32 2.973658e-06, %v1907_v20  ;;  %v7044_v56 = vld [vmem:[#allocation72_spill] sm:$0xff] }
 0x25a   : > { %v5985_v40 = vadd.f32 %v5711_v41, %v2311_v23  ;;  %v1971_v53 = vmul.f32 2.973658e-06, %v1908_v63  ;;  %v2019_v57 = vmul.f32 0.16552415, %v1907_v20  ;;  %v2020_v60 = vmul.f32 0.16552415, %v1908_v63 }
 0x25b   : > { %v1977_v15 = vadd.f32 %v1970_v47, %v5588_v0  ;;  %v2033_v26 = vmul.f32 0.0025662621, %v1914_v49  ;;  %v2034_v18 = vmul.f32 0.0025662621, %v1915_v16  ;;  %v2089_v44 = vmul.f32 0.66381663, %v1914_v49 }
 0x25c   : > { %v1978_v51 = vadd.f32 %v1971_v53, %v5591_v46  ;;  %v2026_v25 = vadd.f32 %v2019_v57, %v5594_v13  ;;  %v2027_v22 = vadd.f32 %v2020_v60, %v7043_v10  ;;  %v2082_v29 = vadd.f32 %v7044_v56, %v2019_v57  ;;  %v7046_v46 = vld [vmem:[#allocation28_spill] sm:$0xff]  ;;  %v7047_v13 = vld [vmem:[#allocation23_spill] sm:$0xff]  ;;  %v7049_v57 = vld [vmem:[#allocation85_spill] sm:$0xff] }
 0x25d   : > { %v2083_v1 = vadd.f32 %v7045_v34, %v2020_v60  ;;  %v2090_v41 = vmul.f32 0.66381663, %v1915_v16  ;;  %v2131_v21 = vmul.f32 2.9736582e-06, %v1907_v20  ;;  %v2132_v39 = vmul.f32 2.9736582e-06, %v1908_v63 }
 0x25e   : > { %v2040_v54 = vadd.f32 %v2033_v26, %v2026_v25  ;;  %v2041_v24 = vadd.f32 %v2034_v18, %v2027_v22  ;;  %v2096_v6 = vadd.f32 %v2089_v44, %v2082_v29  ;;  %v2138_v0 = vmul.f32 0.003084785, %v1914_v49  ;;  %v7050_v18 = vld [vmem:[#allocation86_spill] sm:$0xff]  ;;  %v7051_v22 = vld [vmem:[#allocation33_spill] sm:$0xff] }
 0x25f   : > { %v2097_v30 = vadd.f32 %v2090_v41, %v2083_v1  ;;  %v2139_v14 = vmul.f32 0.003084785, %v1915_v16  ;;  %v2180_v17 = vmul.f32 0.79794323, %v1977_v15  ;;  %v2184_v3 = vmul.f32 0.19896892, %v1978_v51 }
 0x260   : > { %v2054_v23 = vadd.f32 %v7046_v46, %v2040_v54  ;;  %v2055_v58 = vadd.f32 %v7047_v13, %v2041_v24  ;;  %v2110_v47 = vadd.f32 %v7048_v33, %v2096_v6  ;;  %v2145_v53 = vadd.f32 %v2138_v0, %v2131_v21  ;;  %v7052_v1 = vld [vmem:[#allocation44_spill] sm:$0xff]  ;;  %v7053_v24 = vld [vmem:[#allocation70_spill] sm:$0xff] }
 0x261   : > { %v2111_v60 = vadd.f32 %v7049_v57, %v2097_v30  ;;  %v2146_v10 = vadd.f32 %v2139_v14, %v2132_v39  ;;  %v2188_v20 = vadd.f32 %v2184_v3, %v2180_v17  ;;  %v2208_v63 = vmul.f32 0.0025662621, %v1977_v15 }
 0x262   : > { %v2124_v26 = vadd.f32 %v5680_v62, %v2110_v47  ;;  %v2159_v49 = vadd.f32 %v7050_v18, %v2145_v53  ;;  %v2181_v44 = vmul.f32 0.79794323, %v2054_v23  ;;  %v2185_v16 = vmul.f32 0.19896892, %v2055_v58 }
 0x263   : > { %v2125_v25 = vadd.f32 %v5690_v42, %v2111_v60  ;;  %v2160_v56 = vadd.f32 %v7051_v22, %v2146_v10  ;;  %v2196_v29 = vadd.f32 %v5891_v43, %v2188_v20  ;;  %v2209_v34 = vmul.f32 0.0025662621, %v2054_v23 }
 0x264   : > { %v2173_v41 = vadd.f32 %v7052_v1, %v2159_v49  ;;  %v2182_v21 = vmul.f32 0.79794323, %v2124_v26  ;;  %v2189_v54 = vadd.f32 %v2185_v16, %v2181_v44  ;;  %v2210_v39 = vmul.f32 0.0025662621, %v2124_v26 }
 0x265   : > { %v2174_v15 = vadd.f32 %v7053_v24, %v2160_v56  ;;  %v2186_v6 = vmul.f32 0.19896892, %v2125_v25  ;;  %v6005_v62 = vadd.f32 %v5893_v11, %v2196_v29  ;;  %v2212_v0 = vmul.f32 0.16552415, %v1978_v51  ;;  %v7054_v56 = vld [vmem:[#allocation53_spill] sm:$0xff] }
 0x266   : > { %v2183_v30 = vmul.f32 0.79794323, %v2173_v41  ;;  %v2197_v42 = vadd.f32 %v5898_v48, %v2189_v54  ;;  %v2211_v14 = vmul.f32 0.0025662621, %v2173_v41  ;;  %v2213_v17 = vmul.f32 0.16552415, %v2055_v58 }
 0x267   : > { %v2187_v3 = vmul.f32 0.19896892, %v2174_v15  ;;  %v2190_v43 = vadd.f32 %v2186_v6, %v2182_v21  ;;  %v2214_v46 = vmul.f32 0.16552415, %v2125_v25  ;;  %v2215_v23 = vmul.f32 0.16552415, %v2174_v15 }
 0x268   : > { %v6009_v13 = vadd.f32 %v5907_v52, %v2197_v42  ;;  %v2216_v33 = vadd.f32 %v2212_v0, %v2208_v63  ;;  %v2217_v47 = vadd.f32 %v2213_v17, %v2209_v34  ;;  %v2252_v53 = vmul.f32 2.4738147e-06, %v1978_v51  ;;  %v7056_v41 = vld [vmem:[#allocation25_spill] sm:$0xff]  ;;  %v7061_v6 = vld [vmem:[#allocation80_spill] sm:$0xff]  ;;  %v7063_v42 = vld [vmem:[#allocation82_spill] sm:$0xff] }
 0x269   : > { %v2191_v57 = vadd.f32 %v2187_v3, %v2183_v30  ;;  %v2198_v11 = vadd.f32 %v5918_v7, %v2190_v43  ;;  %v2218_v60 = vadd.f32 %v2214_v46, %v2210_v39  ;;  %v2219_v10 = vadd.f32 %v2215_v23, %v2211_v14  ;;  %v7059_v39 = vld [vmem:[#allocation84_spill] sm:$0xff]  ;;  %v7064_v3 = vld [vmem:[#allocation21_spill] sm:$0xff]  ;;  %v7065_v43 = vld [vmem:[#allocation51_spill] sm:$0xff] }
 0x26a   : > { %v2224_v20 = vadd.f32 %v5900_v2, %v2216_v33  ;;  %v2225_v48 = vadd.f32 %v5902_v32, %v2217_v47  ;;  %v2253_v26 = vmul.f32 2.4738147e-06, %v2055_v58  ;;  %v2254_v18 = vmul.f32 2.4738147e-06, %v2125_v25  ;;  %v7062_v0 = vld [vmem:[#allocation20_spill] sm:$0xff]  ;;  %v7066_v47 = vld [vmem:[#allocation57_spill] sm:$0xff] }
 0x26b   : > { %v2199_v49 = vadd.f32 %v5930_v37, %v2191_v57  ;;  %v6016_v44 = vadd.f32 %v5922_v38, %v2198_v11  ;;  %v2226_v52 = vadd.f32 %v5920_v50, %v2218_v60  ;;  %v2227_v51 = vadd.f32 %v5934_v35, %v2219_v10  ;;  %v7067_v57 = vld [vmem:[#allocation52_spill] sm:$0xff] }
 0x26c   : > { %v2232_v63 = vadd.f32 %v5910_v12, %v2224_v20  ;;  %v2233_v7 = vadd.f32 %v5912_v55, %v2225_v48  ;;  %v2255_v16 = vmul.f32 2.4738147e-06, %v2174_v15  ;;  %v2260_v2 = vadd.f32 %v5914_v8, %v2252_v53  ;;  %v7055_v8 = vld [vmem:[#allocation50_spill] sm:$0xff]  ;;  %v7060_v15 = vld [vmem:[#allocation79_spill] sm:$0xff]  ;;  %v7068_v20 = vld [vmem:[#allocation73_spill] sm:$0xff] }
 0x26d   : > { %v6024_v32 = vadd.f32 %v5932_v61, %v2199_v49  ;;  %v2234_v58 = vadd.f32 %v5924_v19, %v2226_v52  ;;  %v2235_v37 = vadd.f32 %v5938_v45, %v2227_v51  ;;  %v2261_v38 = vadd.f32 %v5926_v4, %v2253_v26  ;;  %v7057_v4 = vld [vmem:[#allocation83_spill] sm:$0xff]  ;;  %v7069_v26 = vld [vmem:[#allocation45_spill] sm:$0xff] }
 0x26e   : > { %v2240_v50 = vadd.f32 %v5778_v28, %v2232_v63  ;;  %v2241_v35 = vadd.f32 %v5795_v5, %v2233_v7  ;;  %v2262_v25 = vadd.f32 %v5940_v59, %v2254_v18  ;;  %v2263_v22 = vadd.f32 %v5942_v36, %v2255_v16  ;;  %v7058_v59 = vld [vmem:[#allocation19_spill] sm:$0xff]  ;;  %v7070_v51 = vld [vmem:[#allocation49_spill] sm:$0xff] }
 0x26f   : > { %v2242_v29 = vadd.f32 %v7054_v56, %v2234_v58  ;;  %v2243_v34 = vadd.f32 %v7055_v8, %v2235_v37  ;;  %v2264_v61 = vadd.f32 %v2260_v2, %v5910_v12  ;;  %v2265_v1 = vadd.f32 %v2261_v38, %v5912_v55  ;;  %v7071_v7 = vld [vmem:[#allocation43_spill] sm:$0xff] }
 0x270   : > { %v6038_v21 = vadd.f32 %v7056_v41, %v2240_v50  ;;  %v6041_v54 = vadd.f32 %v7057_v4, %v2241_v35  ;;  %v2266_v28 = vadd.f32 %v2262_v25, %v5924_v19  ;;  %v2267_v5 = vadd.f32 %v2263_v22, %v5938_v45 }
 0x271   : > { %v6046_v36 = vadd.f32 %v7058_v59, %v2242_v29  ;;  %v6049_v24 = vadd.f32 %v7059_v39, %v2243_v34  ;;  %v2272_v12 = vadd.f32 %v7060_v15, %v2264_v61  ;;  %v2273_v55 = vadd.f32 %v7061_v6, %v2265_v1 }
 0x272   : > { %v2274_v30 = vadd.f32 %v7062_v0, %v2266_v28  ;;  %v2275_v14 = vadd.f32 %v7063_v42, %v2267_v5  ;;  %v2320_v17 = vmul.f32 0.79794323, %v6005_v62  ;;  %v2321_v19 = vmul.f32 0.79794323, %v6038_v21 }
 0x273   : > { %v2280_v45 = vadd.f32 %v7064_v3, %v2272_v12  ;;  %v2281_v46 = vadd.f32 %v7065_v43, %v2273_v55  ;;  %v2323_v23 = vmul.f32 0.79794323, %v5976_v27  ;;  %v2336_v33 = vmul.f32 0.19896892, %v6005_v62 }
 0x274   : > { %v2282_v53 = vadd.f32 %v7066_v47, %v2274_v30  ;;  %v2283_v11 = vadd.f32 %v7067_v57, %v2275_v14  ;;  %v2337_v60 = vmul.f32 0.19896892, %v6038_v21  ;;  %v2339_v10 = vmul.f32 0.19896892, %v5976_v27 }
 0x275   : > { %v6066_v48 = vadd.f32 %v7068_v20, %v2280_v45  ;;  %v6069_v18 = vadd.f32 %v7069_v26, %v2281_v46  ;;  %v2368_v49 = vrot.slane %v2336_v33, 1  ;;  %v2416_v52 = vmul.f32 0.0030847848, %v6005_v62 }
 0x276   : > { %v6073_v63 = vadd.f32 %v7070_v51, %v2282_v53  ;;  %v6076_v16 = vadd.f32 %v7071_v7, %v2283_v11  ;;  %v2369_v2 = vrot.slane %v2337_v60, 1  ;;  %v2371_v58 = vrot.slane %v2339_v10, 1 }
 0x277   : > { %v2322_v37 = vmul.f32 0.79794323, %v6066_v48  ;;  %v2338_v38 = vmul.f32 0.19896892, %v6066_v48  ;;  %v2400_v50 = vadd.f32 %v2368_v49, %v2320_v17  ;;  %v2417_v35 = vmul.f32 0.0030847848, %v6038_v21 }
 0x278   : > { %v2401_v25 = vadd.f32 %v2369_v2, %v2321_v19  ;;  %v2403_v22 = vadd.f32 %v2371_v58, %v2323_v23  ;;  %v2418_v56 = vmul.f32 0.0030847848, %v6066_v48  ;;  %v2419_v29 = vmul.f32 0.0030847848, %v5976_v27 }
 0x279   : > { %v2370_v8 = vrot.slane %v2338_v38, 1  ;;  %v2448_v34 = vrot.slane %v2416_v52, 2  ;;  %v2449_v61 = vrot.slane %v2417_v35, 2  ;;  %v2496_v1 = vmul.f32 2.973658e-06, %v6005_v62 }
 0x27a   : > { %v2450_v41 = vrot.slane %v2418_v56, 2  ;;  %v2451_v4 = vrot.slane %v2419_v29, 2  ;;  %v2497_v28 = vmul.f32 2.973658e-06, %v6038_v21  ;;  %v2498_v5 = vmul.f32 2.973658e-06, %v6066_v48 }
 0x27b   : > { %v2402_v59 = vadd.f32 %v2370_v8, %v2322_v37  ;;  %v2480_v39 = vadd.f32 %v2448_v34, %v2400_v50  ;;  %v2481_v15 = vadd.f32 %v2449_v61, %v2401_v25  ;;  %v2499_v12 = vmul.f32 2.973658e-06, %v5976_v27 }
 0x27c   : > { %v2483_v6 = vadd.f32 %v2451_v4, %v2403_v22  ;;  %v2528_v55 = vrot.slane %v2496_v1, 3  ;;  %v2529_v0 = vrot.slane %v2497_v28, 3  ;;  %v2530_v30 = vrot.slane %v2498_v5, 3 }
 0x27d   : > { %v2482_v42 = vadd.f32 %v2450_v41, %v2402_v59  ;;  %v2531_v14 = vrot.slane %v2499_v12, 3  ;;  %v6088_v17 = vmul.f32 0.0025662621, %v6005_v62  ;;  %v6091_v19 = vmul.f32 0.0025662621, %v6038_v21 }
 0x27e   : > { %v2560_v3 = vadd.f32 %v2528_v55, %v2480_v39  ;;  %v2561_v45 = vadd.f32 %v2529_v0, %v2481_v15  ;;  %v6094_v43 = vmul.f32 0.0025662621, %v6066_v48  ;;  %v6097_v46 = vmul.f32 0.0025662621, %v5976_v27 }
 0x27f   : > { %v2562_v23 = vadd.f32 %v2530_v30, %v2482_v42  ;;  %v2563_v33 = vadd.f32 %v2531_v14, %v2483_v6  ;;  %v6100_v47 = vmul.f32 0.16552415, %v6005_v62  ;;  %v6103_v53 = vmul.f32 0.16552415, %v6038_v21 }
 0x280   : > { %2577 = vst.msk [vmem:[#allocation2] sm:$0x1] %vm2576_vm5, %v2560_v3  ;;  %2578 = vst.msk [vmem:[#allocation2 + $0x4] sm:$0x1] %vm2576_vm5, %v2561_v45  ;;  %v6108_v57 = vmul.f32 0.16552415, %v6066_v48 }
 0x281   : > { %v6111_v11 = vmul.f32 0.16552415, %v5976_v27  ;;  %v6114_v60 = vmul.f32 0.66381663, %v6005_v62  ;;  %2579 = vst.msk [vmem:[#allocation2 + $0x8] sm:$0x1] %vm2576_vm5, %v2562_v23 }
 0x282   : > { %2580 = vst.msk [vmem:[#allocation2 + $0xc] sm:$0x1] %vm2576_vm5, %v2563_v33  ;;  %v2641_v10 = vrot.slane %v6100_v47, 1  ;;  %v2642_v20 = vrot.slane %v6103_v53, 1  ;;  %v6121_v26 = vmul.f32 0.66381663, %v6038_v21 }
 0x283   : > { %v6124_v49 = vmul.f32 0.66381663, %v6066_v48  ;;  %v2643_v52 = vrot.slane %v6108_v57, 1  ;;  %v2644_v51 = vrot.slane %v6111_v11, 1  ;;  %v6129_v7 = vmul.f32 0.66381663, %v5976_v27 }
 0x284   : > { %v2721_v2 = vrot.slane %v6114_v60, 2  ;;  %v2673_v58 = vadd.f32 %v2641_v10, %v6088_v17  ;;  %v2674_v37 = vadd.f32 %v2642_v20, %v6091_v19  ;;  %v2722_v38 = vrot.slane %v6121_v26, 2 }
 0x285   : > { %v2723_v50 = vrot.slane %v6124_v49, 2  ;;  %v2675_v35 = vadd.f32 %v2643_v52, %v6094_v43  ;;  %v2676_v25 = vadd.f32 %v2644_v51, %v6097_v46  ;;  %v2724_v22 = vrot.slane %v6129_v7, 2 }
 0x286   : > { %v2769_v56 = vrot.slane %v6100_v47, 3  ;;  %v2753_v29 = vadd.f32 %v2721_v2, %v2673_v58  ;;  %v2754_v8 = vadd.f32 %v2722_v38, %v2674_v37  ;;  %v2770_v34 = vrot.slane %v6103_v53, 3 }
 0x287   : > { %v2771_v61 = vrot.slane %v6108_v57, 3  ;;  %v2755_v1 = vadd.f32 %v2723_v50, %v2675_v35  ;;  %v2756_v41 = vadd.f32 %v2724_v22, %v2676_v25  ;;  %v2772_v4 = vrot.slane %v6111_v11, 3 }
 0x288   : > { %v2833_v28 = vrot.slane %v6088_v17, 4  ;;  %v2801_v5 = vadd.f32 %v2769_v56, %v2753_v29  ;;  %v2802_v59 = vadd.f32 %v2770_v34, %v2754_v8  ;;  %v2834_v39 = vrot.slane %v6091_v19, 4 }
 0x289   : > { %v2835_v15 = vrot.slane %v6094_v43, 4  ;;  %v2803_v12 = vadd.f32 %v2771_v61, %v2755_v1  ;;  %v2804_v6 = vadd.f32 %v2772_v4, %v2756_v41  ;;  %v2836_v55 = vrot.slane %v6097_v46, 4 }
 0x28a   : > { %v2881_v0 = vmul.f32 2.4738147e-06, %v6005_v62  ;;  %v2865_v30 = vadd.f32 %v2833_v28, %v2801_v5  ;;  %v2866_v42 = vadd.f32 %v2834_v39, %v2802_v59  ;;  %v2882_v14 = vmul.f32 2.4738147e-06, %v6038_v21 }
 0x28b   : > { %v2883_v3 = vmul.f32 2.4738147e-06, %v6066_v48  ;;  %v2867_v45 = vadd.f32 %v2835_v15, %v2803_v12  ;;  %v2868_v23 = vadd.f32 %v2836_v55, %v2804_v6  ;;  %v2884_v33 = vmul.f32 2.4738147e-06, %v5976_v27 }
 0x28c   : > { %v2913_v10 = vrot.slane %v2881_v0, 5  ;;  %v2914_v20 = vrot.slane %v2882_v14, 5  ;;  %v2977_v51 = vrot.slane %v6088_v17, 1  ;;  %v2978_v2 = vrot.slane %v6091_v19, 1 }
 0x28d   : > { %v2915_v52 = vrot.slane %v2883_v3, 5  ;;  %v2916_v58 = vrot.slane %v2884_v33, 5  ;;  %v2979_v38 = vrot.slane %v6094_v43, 1  ;;  %v2980_v50 = vrot.slane %v6097_v46, 1 }
 0x28e   : > { %v2945_v37 = vadd.f32 %v2913_v10, %v2865_v30  ;;  %v2946_v35 = vadd.f32 %v2914_v20, %v2866_v42  ;;  %v3009_v22 = vadd.f32 %v2977_v51, %v2881_v0  ;;  %v3010_v56 = vadd.f32 %v2978_v2, %v2882_v14 }
 0x28f   : > { %v2947_v25 = vadd.f32 %v2915_v52, %v2867_v45  ;;  %vm3217_vm6 = vcmask 123905   ;;  %v2948_v29 = vadd.f32 %v2916_v58, %v2868_v23  ;;  %v3011_v8 = vadd.f32 %v2979_v38, %v2883_v3 }
 0x290   : > { %2961 = vst.msk [vmem:[#allocation2 + $0x1] sm:$0x1] %vm2576_vm5, %v2945_v37  ;;  %v3012_v34 = vadd.f32 %v2980_v50, %v2884_v33  ;;  %v3025_v61 = vrot.slane %v6100_v47, 2  ;;  %2962 = vst.msk [vmem:[#allocation2 + $0x5] sm:$0x1] %vm2576_vm5, %v2946_v35  ;;  %v3026_v1 = vrot.slane %v6103_v53, 2 }
 0x291   : > { %2963 = vst.msk [vmem:[#allocation2 + $0x9] sm:$0x1] %vm2576_vm5, %v2947_v25  ;;  %v3027_v41 = vrot.slane %v6108_v57, 2  ;;  %v3028_v4 = vrot.slane %v6111_v11, 2  ;;  %v3073_v28 = vrot.slane %v6114_v60, 3  ;;  %v3074_v59 = vrot.slane %v6121_v26, 3 }
 0x292   : > { %2964 = vst.msk [vmem:[#allocation2 + $0xd] sm:$0x1] %vm2576_vm5, %v2948_v29  ;;  %v3057_v5 = vadd.f32 %v3025_v61, %v3009_v22  ;;  %v3075_v39 = vrot.slane %v6124_v49, 3  ;;  %v3076_v15 = vrot.slane %v6129_v7, 3  ;;  %v3058_v12 = vadd.f32 %v3026_v1, %v3010_v56 }
 0x293   : > { %v3059_v6 = vadd.f32 %v3027_v41, %v3011_v8  ;;  %v3060_v55 = vadd.f32 %v3028_v4, %v3012_v34  ;;  %v3121_v0 = vrot.slane %v6100_v47, 4  ;;  %v3122_v42 = vrot.slane %v6103_v53, 4 }
 0x294   : > { %v3105_v30 = vadd.f32 %v3073_v28, %v3057_v5  ;;  %v3123_v14 = vrot.slane %v6108_v57, 4  ;;  %v3124_v60 = vrot.slane %v6111_v11, 4  ;;  %v3106_v3 = vadd.f32 %v3074_v59, %v3058_v12 }
 0x295   : > { %v3107_v45 = vadd.f32 %v3075_v39, %v3059_v6  ;;  %v3108_v23 = vadd.f32 %v3076_v15, %v3060_v55  ;;  %v3169_v26 = vrot.slane %v6088_v17, 5  ;;  %v3170_v7 = vrot.slane %v6091_v19, 5 }
 0x296   : > { %v3153_v49 = vadd.f32 %v3121_v0, %v3105_v30  ;;  %v3171_v33 = vrot.slane %v6094_v43, 5  ;;  %v3172_v10 = vrot.slane %v6097_v46, 5  ;;  %v3154_v47 = vadd.f32 %v3122_v42, %v3106_v3 }
 0x297   : > { %v3155_v20 = vadd.f32 %v3123_v14, %v3107_v45  ;;  %v3156_v52 = vadd.f32 %v3124_v60, %v3108_v23  ;;  %v3234_v53 = vmul.f32 2.9736582e-06, %v6005_v62  ;;  %v3235_v11 = vmul.f32 2.9736582e-06, %v6038_v21 }
 0x298   : > { %v3201_v57 = vadd.f32 %v3169_v26, %v3153_v49  ;;  %v3236_v51 = vmul.f32 2.9736582e-06, %v6066_v48  ;;  %v3237_v2 = vmul.f32 2.9736582e-06, %v5976_v27  ;;  %v3202_v17 = vadd.f32 %v3170_v7, %v3154_v47 }
 0x299   : > { %v3203_v58 = vadd.f32 %v3171_v33, %v3155_v20  ;;  %v3204_v37 = vadd.f32 %v3172_v10, %v3156_v52  ;;  %v3250_v19 = vmul.f32 0.003084785, %v6005_v62  ;;  %v3251_v43 = vmul.f32 0.003084785, %v6038_v21 }
 0x29a   : > { %3218 = vst.msk [vmem:[#allocation2 + $0x1] sm:$0x2] %vm3217_vm6, %v3201_v57  ;;  %v3252_v46 = vmul.f32 0.003084785, %v6066_v48  ;;  %v3253_v38 = vmul.f32 0.003084785, %v5976_v27 }
 0x29b   : > { %3219 = vst.msk [vmem:[#allocation2 + $0x5] sm:$0x2] %vm3217_vm6, %v3202_v17  ;;  %3220 = vst.msk [vmem:[#allocation2 + $0x9] sm:$0x2] %vm3217_vm6, %v3203_v58  ;;  %v3282_v50 = vrot.slane %v3250_v19, 1  ;;  %vm3490_vm7 = vcmask 125955  }
 0x29c   : > { %3221 = vst.msk [vmem:[#allocation2 + $0xd] sm:$0x2] %vm3217_vm6, %v3204_v37  ;;  %v3330_v35 = vmul.f32 0.19896893, %v6005_v62  ;;  %v3331_v25 = vmul.f32 0.19896893, %v6038_v21 }
 0x29d   : > { %v3283_v22 = vrot.slane %v3251_v43, 1  ;;  %v3284_v56 = vrot.slane %v3252_v46, 1  ;;  %v3285_v29 = vrot.slane %v3253_v38, 1  ;;  %v3332_v8 = vmul.f32 0.19896893, %v6066_v48 }
 0x29e   : > { %v3314_v34 = vadd.f32 %v3282_v50, %v3234_v53  ;;  %v3333_v61 = vmul.f32 0.19896893, %v5976_v27  ;;  %v3362_v1 = vrot.slane %v3330_v35, 2  ;;  %v3363_v41 = vrot.slane %v3331_v25, 2 }
 0x29f   : > { %v3315_v4 = vadd.f32 %v3283_v22, %v3235_v11  ;;  %v3316_v28 = vadd.f32 %v3284_v56, %v3236_v51  ;;  %v3317_v5 = vadd.f32 %v3285_v29, %v3237_v2  ;;  %v3364_v59 = vrot.slane %v3332_v8, 2 }
 0x2a0   : > { %v3365_v39 = vrot.slane %v3333_v61, 2  ;;  %v3394_v15 = vadd.f32 %v3362_v1, %v3314_v34  ;;  %v3410_v12 = vmul.f32 0.7979433, %v6005_v62  ;;  %v3411_v6 = vmul.f32 0.7979433, %v6038_v21 }
 0x2a1   : > { %v3395_v55 = vadd.f32 %v3363_v41, %v3315_v4  ;;  %v3396_v0 = vadd.f32 %v3364_v59, %v3316_v28  ;;  %v3412_v30 = vmul.f32 0.7979433, %v6066_v48  ;;  %v3413_v42 = vmul.f32 0.7979433, %v5976_v27 }
 0x2a2   : > { %v3397_v14 = vadd.f32 %v3365_v39, %v3317_v5  ;;  %v3442_v60 = vrot.slane %v3410_v12, 3  ;;  %v3443_v3 = vrot.slane %v3411_v6, 3  ;;  %v2324_v45 = vmul.f32 0.79794323, %v6009_v13 }
 0x2a3   : > { %v3444_v23 = vrot.slane %v3412_v30, 3  ;;  %v3445_v26 = vrot.slane %v3413_v42, 3  ;;  %v2325_v49 = vmul.f32 0.79794323, %v6041_v54  ;;  %v2326_v7 = vmul.f32 0.79794323, %v6069_v18 }
 0x2a4   : > { %v3474_v62 = vadd.f32 %v3442_v60, %v3394_v15  ;;  %v3475_v33 = vadd.f32 %v3443_v3, %v3395_v55  ;;  %v2327_v21 = vmul.f32 0.79794323, %v5979_v9  ;;  %v2340_v10 = vmul.f32 0.19896892, %v6009_v13 }
 0x2a5   : > { %v3476_v48 = vadd.f32 %v3444_v23, %v3396_v0  ;;  %v3477_v47 = vadd.f32 %v3445_v26, %v3397_v14  ;;  %v2341_v27 = vmul.f32 0.19896892, %v6041_v54  ;;  %v2342_v20 = vmul.f32 0.19896892, %v6069_v18 }
 0x2a6   : > { %3491 = vst.msk [vmem:[#allocation2] sm:$0x8] %vm3490_vm7, %v3474_v62  ;;  %3492 = vst.msk [vmem:[#allocation2 + $0x4] sm:$0x8] %vm3490_vm7, %v3475_v33  ;;  %v2343_v52 = vmul.f32 0.19896892, %v5979_v9 }
 0x2a7   : > { %v2372_v53 = vrot.slane %v2340_v10, 1  ;;  %v2420_v57 = vmul.f32 0.0030847848, %v6009_v13  ;;  %3493 = vst.msk [vmem:[#allocation2 + $0x8] sm:$0x8] %vm3490_vm7, %v3476_v48  ;;  %v2373_v11 = vrot.slane %v2341_v27, 1 }
 0x2a8   : > { %3494 = vst.msk [vmem:[#allocation2 + $0xc] sm:$0x8] %vm3490_vm7, %v3477_v47  ;;  %v2374_v51 = vrot.slane %v2342_v20, 1  ;;  %v2421_v2 = vmul.f32 0.0030847848, %v6041_v54  ;;  %v2375_v58 = vrot.slane %v2343_v52, 1 }
 0x2a9   : > { %v2422_v17 = vmul.f32 0.0030847848, %v6069_v18  ;;  %v2404_v37 = vadd.f32 %v2372_v53, %v2324_v45  ;;  %v2423_v19 = vmul.f32 0.0030847848, %v5979_v9  ;;  %v2452_v43 = vrot.slane %v2420_v57, 2 }
 0x2aa   : > { %v2405_v46 = vadd.f32 %v2373_v11, %v2325_v49  ;;  %v2406_v38 = vadd.f32 %v2374_v51, %v2326_v7  ;;  %v2453_v50 = vrot.slane %v2421_v2, 2  ;;  %v2407_v35 = vadd.f32 %v2375_v58, %v2327_v21 }
 0x2ab   : > { %v2454_v25 = vrot.slane %v2422_v17, 2  ;;  %v2484_v22 = vadd.f32 %v2452_v43, %v2404_v37  ;;  %v2500_v56 = vmul.f32 2.973658e-06, %v6009_v13  ;;  %v2455_v29 = vrot.slane %v2423_v19, 2 }
 0x2ac   : > { %v2485_v8 = vadd.f32 %v2453_v50, %v2405_v46  ;;  %v2501_v34 = vmul.f32 2.973658e-06, %v6041_v54  ;;  %v2502_v61 = vmul.f32 2.973658e-06, %v6069_v18  ;;  %v2503_v41 = vmul.f32 2.973658e-06, %v5979_v9 }
 0x2ad   : > { %v2486_v1 = vadd.f32 %v2454_v25, %v2406_v38  ;;  %v2532_v4 = vrot.slane %v2500_v56, 3  ;;  %v6216_v28 = vmul.f32 0.0025662621, %v6009_v13  ;;  %v4040_v5 = vld [vmem:[#allocation2] sm:$0xff]   ;;  %v2487_v59 = vadd.f32 %v2455_v29, %v2407_v35 }
 0x2ae   : > { %v2533_v39 = vrot.slane %v2501_v34, 3  ;;  %v2534_v12 = vrot.slane %v2502_v61, 3  ;;  %v2535_v55 = vrot.slane %v2503_v41, 3  ;;  %v6219_v30 = vmul.f32 0.0025662621, %v6041_v54 }
 0x2af   : > { %v4041_v15 = vld [vmem:[#allocation2 + $0x8] sm:$0xff]   ;;  %v2564_v6 = vadd.f32 %v2532_v4, %v2484_v22  ;;  %v6222_v42 = vmul.f32 0.0025662621, %v6069_v18  ;;  %v6226_v3 = vmul.f32 0.0025662621, %v5979_v9  ;;  %v2837_v25 = vrot.slane %v6216_v28, 4 }
 0x2b0   : > { %v2565_v0 = vadd.f32 %v2533_v39, %v2485_v8  ;;  %v3555_v14 = vpack.c.bf16 %v4041_v15, %v4040_v5  ;;  %v2566_v60 = vadd.f32 %v2534_v12, %v2486_v1  ;;  %v6229_v45 = vmul.f32 0.16552415, %v6009_v13 }
 0x2b1   : > { %2581 = vst.msk [vmem:[#allocation2 + $0x10] sm:$0x1] %vm2576_vm5, %v2564_v6  ;;  %v2567_v23 = vadd.f32 %v2535_v55, %v2487_v59  ;;  %v6233_v26 = vmul.f32 0.16552415, %v6041_v54  ;;  %v6236_v49 = vmul.f32 0.16552415, %v6069_v18 }
 0x2b2   : > { %2582 = vst.msk [vmem:[#allocation2 + $0x14] sm:$0x1] %vm2576_vm5, %v2565_v0  ;;  %v6239_v7 = vmul.f32 0.16552415, %v5979_v9  ;;  %3955 = vmatprep.mubr.msk.bf16.mxu1 %vm323_vm0, %v3555_v14  ;;  %2583 = vst.msk [vmem:[#allocation2 + $0x18] sm:$0x1] %vm2576_vm5, %v2566_v60 }
 0x2b3   : > { %v2645_v62 = vrot.slane %v6229_v45, 1  ;;  %v6245_v33 = vmul.f32 0.66381663, %v6009_v13  ;;  %v6248_v21 = vmul.f32 0.66381663, %v6041_v54  ;;  %v2773_v10 = vrot.slane %v6229_v45, 3 }
 0x2b4   : > { %2584 = vst.msk [vmem:[#allocation2 + $0x1c] sm:$0x1] %vm2576_vm5, %v2567_v23  ;;  %v2646_v48 = vrot.slane %v6233_v26, 1  ;;  %v2647_v47 = vrot.slane %v6236_v49, 1  ;;  %v2648_v27 = vrot.slane %v6239_v7, 1  ;;  %v2774_v43 = vrot.slane %v6233_v26, 3 }
 0x2b5   : > { %v6256_v20 = vmul.f32 0.66381663, %v6069_v18  ;;  %v2677_v52 = vadd.f32 %v2645_v62, %v6216_v28  ;;  %v6260_v53 = vmul.f32 0.66381663, %v5979_v9  ;;  %v2725_v57 = vrot.slane %v6245_v33, 2 }
 0x2b6   : > { %v2726_v11 = vrot.slane %v6248_v21, 2  ;;  %v2678_v51 = vadd.f32 %v2646_v48, %v6219_v30  ;;  %v2679_v2 = vadd.f32 %v2647_v47, %v6222_v42  ;;  %v2680_v17 = vadd.f32 %v2648_v27, %v6226_v3 }
 0x2b7   : > { %v2727_v58 = vrot.slane %v6256_v20, 2  ;;  %v2728_v37 = vrot.slane %v6260_v53, 2  ;;  %v2757_v19 = vadd.f32 %v2725_v57, %v2677_v52  ;;  %v2775_v46 = vrot.slane %v6236_v49, 3 }
 0x2b8   : > { %v2758_v38 = vadd.f32 %v2726_v11, %v2678_v51  ;;  %v2776_v35 = vrot.slane %v6239_v7, 3  ;;  %v2838_v29 = vrot.slane %v6219_v30, 4  ;;  %v2839_v8 = vrot.slane %v6222_v42, 4 }
 0x2b9   : > { %v2759_v50 = vadd.f32 %v2727_v58, %v2679_v2  ;;  %v2760_v22 = vadd.f32 %v2728_v37, %v2680_v17  ;;  %v2805_v56 = vadd.f32 %v2773_v10, %v2757_v19  ;;  %v2840_v1 = vrot.slane %v6226_v3, 4 }
 0x2ba   : > { %v2806_v34 = vadd.f32 %v2774_v43, %v2758_v38  ;;  %v2885_v41 = vmul.f32 2.4738147e-06, %v6009_v13  ;;  %v2886_v59 = vmul.f32 2.4738147e-06, %v6041_v54  ;;  %v2887_v39 = vmul.f32 2.4738147e-06, %v6069_v18 }
 0x2bb   : > { %v2807_v61 = vadd.f32 %v2775_v46, %v2759_v50  ;;  %v2808_v4 = vadd.f32 %v2776_v35, %v2760_v22  ;;  %v2869_v5 = vadd.f32 %v2837_v25, %v2805_v56  ;;  %v2888_v6 = vmul.f32 2.4738147e-06, %v5979_v9 }
 0x2bc   : > { %v2870_v15 = vadd.f32 %v2838_v29, %v2806_v34  ;;  %v2917_v55 = vrot.slane %v2885_v41, 5  ;;  %v2918_v14 = vrot.slane %v2886_v59, 5  ;;  %v2919_v60 = vrot.slane %v2887_v39, 5 }
 0x2bd   : > { %v2871_v12 = vadd.f32 %v2839_v8, %v2807_v61  ;;  %v2872_v0 = vadd.f32 %v2840_v1, %v2808_v4  ;;  %v2981_v23 = vrot.slane %v6216_v28, 1  ;;  %v2920_v62 = vrot.slane %v2888_v6, 5 }
 0x2be   : > { %v2949_v10 = vadd.f32 %v2917_v55, %v2869_v5  ;;  %v2982_v48 = vrot.slane %v6219_v30, 1  ;;  %v2983_v47 = vrot.slane %v6222_v42, 1  ;;  %v2950_v27 = vadd.f32 %v2918_v14, %v2870_v15 }
 0x2bf   : > { %v2951_v52 = vadd.f32 %v2919_v60, %v2871_v12  ;;  %v2984_v57 = vrot.slane %v6226_v3, 1  ;;  %v3013_v11 = vadd.f32 %v2981_v23, %v2885_v41  ;;  %v2952_v51 = vadd.f32 %v2920_v62, %v2872_v0 }
 0x2c0   : > { %2965 = vst.msk [vmem:[#allocation2 + $0x11] sm:$0x1] %vm2576_vm5, %v2949_v10  ;;  %v3014_v2 = vadd.f32 %v2982_v48, %v2886_v59  ;;  %v3015_v17 = vadd.f32 %v2983_v47, %v2887_v39  ;;  %v3029_v58 = vrot.slane %v6229_v45, 2  ;;  %2966 = vst.msk [vmem:[#allocation2 + $0x15] sm:$0x1] %vm2576_vm5, %v2950_v27  ;;  %v3030_v19 = vrot.slane %v6233_v26, 2 }
 0x2c1   : > { %2967 = vst.msk [vmem:[#allocation2 + $0x19] sm:$0x1] %vm2576_vm5, %v2951_v52  ;;  %v3016_v37 = vadd.f32 %v2984_v57, %v2888_v6  ;;  %v3031_v43 = vrot.slane %v6236_v49, 2  ;;  %v3032_v46 = vrot.slane %v6239_v7, 2  ;;  %2968 = vst.msk [vmem:[#allocation2 + $0x1d] sm:$0x1] %vm2576_vm5, %v2952_v51 }
 0x2c2   : > { %v3061_v38 = vadd.f32 %v3029_v58, %v3013_v11  ;;  %v3077_v50 = vrot.slane %v6245_v33, 3  ;;  %v3078_v35 = vrot.slane %v6248_v21, 3  ;;  %v3079_v25 = vrot.slane %v6256_v20, 3 }
 0x2c3   : > { %v3062_v22 = vadd.f32 %v3030_v19, %v3014_v2  ;;  %v3063_v56 = vadd.f32 %v3031_v43, %v3015_v17  ;;  %v3064_v29 = vadd.f32 %v3032_v46, %v3016_v37  ;;  %v3080_v8 = vrot.slane %v6260_v53, 3 }
 0x2c4   : > { %v3109_v34 = vadd.f32 %v3077_v50, %v3061_v38  ;;  %v3125_v61 = vrot.slane %v6229_v45, 4  ;;  %v3126_v1 = vrot.slane %v6233_v26, 4  ;;  %v3127_v41 = vrot.slane %v6236_v49, 4 }
 0x2c5   : > { %v3110_v4 = vadd.f32 %v3078_v35, %v3062_v22  ;;  %v3111_v5 = vadd.f32 %v3079_v25, %v3063_v56  ;;  %v3112_v59 = vadd.f32 %v3080_v8, %v3064_v29  ;;  %v3128_v33 = vrot.slane %v6239_v7, 4 }
 0x2c6   : > { %v3157_v21 = vadd.f32 %v3125_v61, %v3109_v34  ;;  %v3173_v20 = vrot.slane %v6216_v28, 5  ;;  %v3174_v39 = vrot.slane %v6219_v30, 5  ;;  %v3175_v15 = vrot.slane %v6222_v42, 5 }
 0x2c7   : > { %v3158_v53 = vadd.f32 %v3126_v1, %v3110_v4  ;;  %v3159_v12 = vadd.f32 %v3127_v41, %v3111_v5  ;;  %v3160_v6 = vadd.f32 %v3128_v33, %v3112_v59  ;;  %v3176_v45 = vrot.slane %v6226_v3, 5 }
 0x2c8   : > { %v3205_v26 = vadd.f32 %v3173_v20, %v3157_v21  ;;  %v3238_v49 = vmul.f32 2.9736582e-06, %v6009_v13  ;;  %v3239_v55 = vmul.f32 2.9736582e-06, %v6041_v54  ;;  %v3240_v0 = vmul.f32 2.9736582e-06, %v6069_v18 }
 0x2c9   : > { %v3206_v7 = vadd.f32 %v3174_v39, %v3158_v53  ;;  %v3207_v14 = vadd.f32 %v3175_v15, %v3159_v12  ;;  %v3208_v60 = vadd.f32 %v3176_v45, %v3160_v6  ;;  %v3241_v28 = vmul.f32 2.9736582e-06, %v5979_v9 }
 0x2ca   : > { %3222 = vst.msk [vmem:[#allocation2 + $0x11] sm:$0x2] %vm3217_vm6, %v3205_v26  ;;  %v3254_v30 = vmul.f32 0.003084785, %v6009_v13  ;;  %v3255_v42 = vmul.f32 0.003084785, %v6041_v54 }
 0x2cb   : > { %v3256_v3 = vmul.f32 0.003084785, %v6069_v18  ;;  %3223 = vst.msk [vmem:[#allocation2 + $0x15] sm:$0x2] %vm3217_vm6, %v3206_v7  ;;  %3224 = vst.msk [vmem:[#allocation2 + $0x19] sm:$0x2] %vm3217_vm6, %v3207_v14 }
 0x2cc   : > { %3225 = vst.msk [vmem:[#allocation2 + $0x1d] sm:$0x2] %vm3217_vm6, %v3208_v60  ;;  %v3257_v23 = vmul.f32 0.003084785, %v5979_v9  ;;  %v3334_v62 = vmul.f32 0.19896893, %v6009_v13 }
 0x2cd   : > { %v3335_v10 = vmul.f32 0.19896893, %v6041_v54  ;;  %v3286_v48 = vrot.slane %v3254_v30, 1  ;;  %v3287_v47 = vrot.slane %v3255_v42, 1  ;;  %v3288_v27 = vrot.slane %v3256_v3, 1 }
 0x2ce   : > { %v3336_v52 = vmul.f32 0.19896893, %v6069_v18  ;;  %v3289_v57 = vrot.slane %v3257_v23, 1  ;;  %v3337_v11 = vmul.f32 0.19896893, %v5979_v9  ;;  %v3366_v51 = vrot.slane %v3334_v62, 2 }
 0x2cf   : > { %v3367_v2 = vrot.slane %v3335_v10, 2  ;;  %v3318_v17 = vadd.f32 %v3286_v48, %v3238_v49  ;;  %v3319_v58 = vadd.f32 %v3287_v47, %v3239_v55  ;;  %v3320_v37 = vadd.f32 %v3288_v27, %v3240_v0 }
 0x2d0   : > { %v3368_v19 = vrot.slane %v3336_v52, 2  ;;  %v3321_v43 = vadd.f32 %v3289_v57, %v3241_v28  ;;  %v3369_v46 = vrot.slane %v3337_v11, 2  ;;  %v3414_v38 = vmul.f32 0.7979433, %v6009_v13 }
 0x2d1   : > { %v3415_v50 = vmul.f32 0.7979433, %v6041_v54  ;;  %v3398_v35 = vadd.f32 %v3366_v51, %v3318_v17  ;;  %v3399_v25 = vadd.f32 %v3367_v2, %v3319_v58  ;;  %v3416_v56 = vmul.f32 0.7979433, %v6069_v18 }
 0x2d2   : > { %v3400_v22 = vadd.f32 %v3368_v19, %v3320_v37  ;;  %v3401_v29 = vadd.f32 %v3369_v46, %v3321_v43  ;;  %v3417_v8 = vmul.f32 0.7979433, %v5979_v9  ;;  %v3446_v34 = vrot.slane %v3414_v38, 3 }
 0x2d3   : > { %v3447_v61 = vrot.slane %v3415_v50, 3  ;;  %v3448_v1 = vrot.slane %v3416_v56, 3  ;;  %v2328_v41 = vmul.f32 0.79794323, %v6016_v44  ;;  %v2329_v4 = vmul.f32 0.79794323, %v6046_v36 }
 0x2d4   : > { %v3449_v5 = vrot.slane %v3417_v8, 3  ;;  %v3478_v59 = vadd.f32 %v3446_v34, %v3398_v35  ;;  %v2330_v54 = vmul.f32 0.79794323, %v6073_v63  ;;  %v2331_v21 = vmul.f32 0.79794323, %v5982_v31 }
 0x2d5   : > { %v3479_v13 = vadd.f32 %v3447_v61, %v3399_v25  ;;  %v3480_v33 = vadd.f32 %v3448_v1, %v3400_v22  ;;  %v2344_v18 = vmul.f32 0.19896892, %v6016_v44  ;;  %v2345_v20 = vmul.f32 0.19896892, %v6046_v36 }
 0x2d6   : > { %v3481_v9 = vadd.f32 %v3449_v5, %v3401_v29  ;;  %3495 = vst.msk [vmem:[#allocation2 + $0x10] sm:$0x8] %vm3490_vm7, %v3478_v59  ;;  %v2346_v39 = vmul.f32 0.19896892, %v6073_v63  ;;  %v2347_v15 = vmul.f32 0.19896892, %v5982_v31 }
 0x2d7   : > { %3496 = vst.msk [vmem:[#allocation2 + $0x14] sm:$0x8] %vm3490_vm7, %v3479_v13  ;;  %v2424_v53 = vmul.f32 0.0030847848, %v6016_v44  ;;  %3497 = vst.msk [vmem:[#allocation2 + $0x18] sm:$0x8] %vm3490_vm7, %v3480_v33 }
 0x2d8   : > { %v2376_v12 = vrot.slane %v2344_v18, 1  ;;  %v2377_v6 = vrot.slane %v2345_v20, 1  ;;  %v2425_v45 = vmul.f32 0.0030847848, %v6046_v36  ;;  %v2426_v26 = vmul.f32 0.0030847848, %v6073_v63 }
 0x2d9   : > { %3498 = vst.msk [vmem:[#allocation2 + $0x1c] sm:$0x8] %vm3490_vm7, %v3481_v9  ;;  %v2378_v49 = vrot.slane %v2346_v39, 1  ;;  %v2379_v55 = vrot.slane %v2347_v15, 1  ;;  %v2427_v0 = vmul.f32 0.0030847848, %v5982_v31 }
 0x2da   : > { %v2456_v7 = vrot.slane %v2424_v53, 2  ;;  %v2408_v14 = vadd.f32 %v2376_v12, %v2328_v41  ;;  %v2409_v60 = vadd.f32 %v2377_v6, %v2329_v4  ;;  %v2457_v28 = vrot.slane %v2425_v45, 2 }
 0x2db   : > { %v2458_v30 = vrot.slane %v2426_v26, 2  ;;  %v2410_v42 = vadd.f32 %v2378_v49, %v2330_v54  ;;  %v2411_v3 = vadd.f32 %v2379_v55, %v2331_v21  ;;  %v2459_v23 = vrot.slane %v2427_v0, 2 }
 0x2dc   : > { %v2504_v62 = vmul.f32 2.973658e-06, %v6016_v44  ;;  %v2488_v10 = vadd.f32 %v2456_v7, %v2408_v14  ;;  %v2489_v48 = vadd.f32 %v2457_v28, %v2409_v60  ;;  %v2505_v47 = vmul.f32 2.973658e-06, %v6046_v36 }
 0x2dd   : > { %v2506_v27 = vmul.f32 2.973658e-06, %v6073_v63  ;;  %v2490_v52 = vadd.f32 %v2458_v30, %v2410_v42  ;;  %v2491_v57 = vadd.f32 %v2459_v23, %v2411_v3  ;;  %v2507_v11 = vmul.f32 2.973658e-06, %v5982_v31 }
 0x2de   : > { %v2536_v51 = vrot.slane %v2504_v62, 3  ;;  %v4042_v2 = vld [vmem:[#allocation2 + $0x10] sm:$0xff]   ;;  %v2537_v17 = vrot.slane %v2505_v47, 3  ;;  %v6345_v43 = vmul.f32 0.0025662621, %v6016_v44  ;;  %vm3668_vm8 = vcmask 125952  }
 0x2df   : > { %v2538_v58 = vrot.slane %v2506_v27, 3  ;;  %v2539_v37 = vrot.slane %v2507_v11, 3  ;;  %v6348_v50 = vmul.f32 0.0025662621, %v6046_v36  ;;  %v6352_v22 = vmul.f32 0.0025662621, %v6073_v63 }
 0x2e0   : > { %v2568_v19 = vadd.f32 %v2536_v51, %v2488_v10  ;;  %v4043_v46 = vld [vmem:[#allocation2 + $0x18] sm:$0xff]   ;;  %v2569_v38 = vadd.f32 %v2537_v17, %v2489_v48  ;;  %v6355_v56 = vmul.f32 0.0025662621, %v5982_v31  ;;  %v6359_v8 = vmul.f32 0.16552415, %v6016_v44 }
 0x2e1   : > { %v2570_v35 = vadd.f32 %v2538_v58, %v2490_v52  ;;  %v2571_v25 = vadd.f32 %v2539_v37, %v2491_v57  ;;  %v3556_v29 = vpack.c.bf16 %v4043_v46, %v4042_v2  ;;  %v6362_v34 = vmul.f32 0.16552415, %v6046_v36 }
 0x2e2   : > { %2585 = vst.msk [vmem:[#allocation2 + $0x20] sm:$0x1] %vm2576_vm5, %v2568_v19  ;;  %2586 = vst.msk [vmem:[#allocation2 + $0x24] sm:$0x1] %vm2576_vm5, %v2569_v38  ;;  %v6365_v61 = vmul.f32 0.16552415, %v6073_v63 }
 0x2e3   : > { %2587 = vst.msk [vmem:[#allocation2 + $0x28] sm:$0x1] %vm2576_vm5, %v2570_v35  ;;  %2588 = vst.msk [vmem:[#allocation2 + $0x2c] sm:$0x1] %vm2576_vm5, %v2571_v25  ;;  %v6370_v1 = vmul.f32 0.16552415, %v5982_v31  ;;  %3956 = vmatmul.mubr.msk.bf16.vlgmr.msra.gmra.mrb[28].mxu1 %vm323_vm0, %v3556_v29 }
 0x2e4   : > { %v6373_v41 = vmul.f32 0.66381663, %v6016_v44  ;;  %v6376_v4 = vmul.f32 0.66381663, %v6046_v36  ;;  %v2649_v5 = vrot.slane %v6359_v8, 1  ;;  %v2650_v59 = vrot.slane %v6362_v34, 1 }
 0x2e5   : > { %v2651_v13 = vrot.slane %v6365_v61, 1  ;;  %v6383_v54 = vmul.f32 0.66381663, %v6073_v63  ;;  %v2652_v33 = vrot.slane %v6370_v1, 1  ;;  %v6387_v21 = vmul.f32 0.66381663, %v5982_v31 }
 0x2e6   : > { %v2729_v18 = vrot.slane %v6373_v41, 2  ;;  %v2730_v20 = vrot.slane %v6376_v4, 2  ;;  %v2681_v9 = vadd.f32 %v2649_v5, %v6345_v43  ;;  %v2682_v39 = vadd.f32 %v2650_v59, %v6348_v50 }
 0x2e7   : > { %v2683_v15 = vadd.f32 %v2651_v13, %v6352_v22  ;;  %v2731_v53 = vrot.slane %v6383_v54, 2  ;;  %v2684_v12 = vadd.f32 %v2652_v33, %v6355_v56  ;;  %v2732_v6 = vrot.slane %v6387_v21, 2 }
 0x2e8   : > { %v2777_v45 = vrot.slane %v6359_v8, 3  ;;  %v2778_v26 = vrot.slane %v6362_v34, 3  ;;  %v2761_v49 = vadd.f32 %v2729_v18, %v2681_v9  ;;  %v2762_v55 = vadd.f32 %v2730_v20, %v2682_v39 }
 0x2e9   : > { %v2763_v0 = vadd.f32 %v2731_v53, %v2683_v15  ;;  %v2779_v7 = vrot.slane %v6365_v61, 3  ;;  %v2764_v14 = vadd.f32 %v2732_v6, %v2684_v12  ;;  %v2780_v60 = vrot.slane %v6370_v1, 3 }
 0x2ea   : > { %v2841_v28 = vrot.slane %v6345_v43, 4  ;;  %v2842_v30 = vrot.slane %v6348_v50, 4  ;;  %v2809_v42 = vadd.f32 %v2777_v45, %v2761_v49  ;;  %v2810_v3 = vadd.f32 %v2778_v26, %v2762_v55 }
 0x2eb   : > { %v2811_v23 = vadd.f32 %v2779_v7, %v2763_v0  ;;  %v2843_v62 = vrot.slane %v6352_v22, 4  ;;  %v2812_v10 = vadd.f32 %v2780_v60, %v2764_v14  ;;  %v2844_v48 = vrot.slane %v6355_v56, 4 }
 0x2ec   : > { %v2889_v47 = vmul.f32 2.4738147e-06, %v6016_v44  ;;  %v2890_v27 = vmul.f32 2.4738147e-06, %v6046_v36  ;;  %v2873_v52 = vadd.f32 %v2841_v28, %v2809_v42  ;;  %v2874_v57 = vadd.f32 %v2842_v30, %v2810_v3 }
 0x2ed   : > { %v2875_v11 = vadd.f32 %v2843_v62, %v2811_v23  ;;  %v2891_v51 = vmul.f32 2.4738147e-06, %v6073_v63  ;;  %v2876_v2 = vadd.f32 %v2844_v48, %v2812_v10  ;;  %v2892_v17 = vmul.f32 2.4738147e-06, %v5982_v31 }
 0x2ee   : > { %v2921_v58 = vrot.slane %v2889_v47, 5  ;;  %v2922_v37 = vrot.slane %v2890_v27, 5  ;;  %v2985_v46 = vrot.slane %v6345_v43, 1  ;;  %v2986_v38 = vrot.slane %v6348_v50, 1 }
 0x2ef   : > { %v2923_v19 = vrot.slane %v2891_v51, 5  ;;  %v2987_v35 = vrot.slane %v6352_v22, 1  ;;  %v2924_v25 = vrot.slane %v2892_v17, 5  ;;  %v2988_v59 = vrot.slane %v6355_v56, 1 }
 0x2f0   : > { %v2953_v29 = vadd.f32 %v2921_v58, %v2873_v52  ;;  %v2954_v5 = vadd.f32 %v2922_v37, %v2874_v57  ;;  %v3017_v33 = vadd.f32 %v2985_v46, %v2889_v47  ;;  %v3018_v18 = vadd.f32 %v2986_v38, %v2890_v27 }
 0x2f1   : > { %v2955_v13 = vadd.f32 %v2923_v19, %v2875_v11  ;;  %v3019_v20 = vadd.f32 %v2987_v35, %v2891_v51  ;;  %v2956_v9 = vadd.f32 %v2924_v25, %v2876_v2  ;;  %v3020_v39 = vadd.f32 %v2988_v59, %v2892_v17 }
 0x2f2   : > { %2969 = vst.msk [vmem:[#allocation2 + $0x21] sm:$0x1] %vm2576_vm5, %v2953_v29  ;;  %2970 = vst.msk [vmem:[#allocation2 + $0x25] sm:$0x1] %vm2576_vm5, %v2954_v5  ;;  %v3033_v15 = vrot.slane %v6359_v8, 2  ;;  %v3034_v53 = vrot.slane %v6362_v34, 2 }
 0x2f3   : > { %2971 = vst.msk [vmem:[#allocation2 + $0x29] sm:$0x1] %vm2576_vm5, %v2955_v13  ;;  %v3035_v12 = vrot.slane %v6365_v61, 2  ;;  %v3036_v6 = vrot.slane %v6370_v1, 2  ;;  %v3081_v45 = vrot.slane %v6373_v41, 3  ;;  %v3082_v26 = vrot.slane %v6376_v4, 3 }
 0x2f4   : > { %2972 = vst.msk [vmem:[#allocation2 + $0x2d] sm:$0x1] %vm2576_vm5, %v2956_v9  ;;  %v3065_v49 = vadd.f32 %v3033_v15, %v3017_v33  ;;  %v3066_v55 = vadd.f32 %v3034_v53, %v3018_v18  ;;  %v3083_v0 = vrot.slane %v6383_v54, 3  ;;  %v3084_v7 = vrot.slane %v6387_v21, 3 }
 0x2f5   : > { %v3067_v14 = vadd.f32 %v3035_v12, %v3019_v20  ;;  %v3068_v60 = vadd.f32 %v3036_v6, %v3020_v39  ;;  %v3129_v28 = vrot.slane %v6359_v8, 4  ;;  %v3130_v30 = vrot.slane %v6362_v34, 4 }
 0x2f6   : > { %v3113_v42 = vadd.f32 %v3081_v45, %v3065_v49  ;;  %v3114_v3 = vadd.f32 %v3082_v26, %v3066_v55  ;;  %v3131_v41 = vrot.slane %v6365_v61, 4  ;;  %v3132_v4 = vrot.slane %v6370_v1, 4 }
 0x2f7   : > { %v3115_v23 = vadd.f32 %v3083_v0, %v3067_v14  ;;  %v3116_v62 = vadd.f32 %v3084_v7, %v3068_v60  ;;  %v3177_v10 = vrot.slane %v6345_v43, 5  ;;  %v3178_v54 = vrot.slane %v6348_v50, 5 }
 0x2f8   : > { %v3161_v48 = vadd.f32 %v3129_v28, %v3113_v42  ;;  %v3162_v21 = vadd.f32 %v3130_v30, %v3114_v3  ;;  %v3179_v47 = vrot.slane %v6352_v22, 5  ;;  %v3180_v8 = vrot.slane %v6355_v56, 5 }
 0x2f9   : > { %v3163_v27 = vadd.f32 %v3131_v41, %v3115_v23  ;;  %v3164_v34 = vadd.f32 %v3132_v4, %v3116_v62  ;;  %v3242_v52 = vmul.f32 2.9736582e-06, %v6016_v44  ;;  %v3243_v61 = vmul.f32 2.9736582e-06, %v6046_v36 }
 0x2fa   : > { %v3209_v57 = vadd.f32 %v3177_v10, %v3161_v48  ;;  %v3210_v1 = vadd.f32 %v3178_v54, %v3162_v21  ;;  %v3244_v11 = vmul.f32 2.9736582e-06, %v6073_v63  ;;  %v3245_v43 = vmul.f32 2.9736582e-06, %v5982_v31 }
 0x2fb   : > { %v3211_v51 = vadd.f32 %v3179_v47, %v3163_v27  ;;  %v3212_v50 = vadd.f32 %v3180_v8, %v3164_v34  ;;  %v3258_v2 = vmul.f32 0.003084785, %v6016_v44  ;;  %v3259_v22 = vmul.f32 0.003084785, %v6046_v36 }
 0x2fc   : > { %3226 = vst.msk [vmem:[#allocation2 + $0x21] sm:$0x2] %vm3217_vm6, %v3209_v57  ;;  %3227 = vst.msk [vmem:[#allocation2 + $0x25] sm:$0x2] %vm3217_vm6, %v3210_v1  ;;  %v3260_v56 = vmul.f32 0.003084785, %v6073_v63 }
 0x2fd   : > { %v3261_v17 = vmul.f32 0.003084785, %v5982_v31  ;;  %v3338_v58 = vmul.f32 0.19896893, %v6016_v44  ;;  %3228 = vst.msk [vmem:[#allocation2 + $0x29] sm:$0x2] %vm3217_vm6, %v3211_v51 }
 0x2fe   : > { %3229 = vst.msk [vmem:[#allocation2 + $0x2d] sm:$0x2] %vm3217_vm6, %v3212_v50  ;;  %v3290_v37 = vrot.slane %v3258_v2, 1  ;;  %v3291_v19 = vrot.slane %v3259_v22, 1  ;;  %v3339_v46 = vmul.f32 0.19896893, %v6046_v36 }
 0x2ff   : > { %v3340_v38 = vmul.f32 0.19896893, %v6073_v63  ;;  %v3292_v35 = vrot.slane %v3260_v56, 1  ;;  %v3293_v25 = vrot.slane %v3261_v17, 1  ;;  %v3341_v29 = vmul.f32 0.19896893, %v5982_v31 }
 0x300   : > { %v3370_v5 = vrot.slane %v3338_v58, 2  ;;  %v3322_v59 = vadd.f32 %v3290_v37, %v3242_v52  ;;  %v3323_v13 = vadd.f32 %v3291_v19, %v3243_v61  ;;  %v3371_v33 = vrot.slane %v3339_v46, 2 }
 0x301   : > { %v3372_v18 = vrot.slane %v3340_v38, 2  ;;  %v3324_v20 = vadd.f32 %v3292_v35, %v3244_v11  ;;  %v3325_v9 = vadd.f32 %v3293_v25, %v3245_v43  ;;  %v3373_v39 = vrot.slane %v3341_v29, 2 }
 0x302   : > { %v3418_v15 = vmul.f32 0.7979433, %v6016_v44  ;;  %v3402_v53 = vadd.f32 %v3370_v5, %v3322_v59  ;;  %v3403_v12 = vadd.f32 %v3371_v33, %v3323_v13  ;;  %v3419_v6 = vmul.f32 0.7979433, %v6046_v36 }
 0x303   : > { %v3420_v45 = vmul.f32 0.7979433, %v6073_v63  ;;  %v3404_v26 = vadd.f32 %v3372_v18, %v3324_v20  ;;  %v3405_v49 = vadd.f32 %v3373_v39, %v3325_v9  ;;  %v3421_v55 = vmul.f32 0.7979433, %v5982_v31 }
 0x304   : > { %v3450_v0 = vrot.slane %v3418_v15, 3  ;;  %v3451_v7 = vrot.slane %v3419_v6, 3  ;;  %v2332_v60 = vmul.f32 0.79794323, %v6024_v32  ;;  %v2333_v28 = vmul.f32 0.79794323, %v6049_v24 }
 0x305   : > { %v3452_v14 = vrot.slane %v3420_v45, 3  ;;  %v3453_v30 = vrot.slane %v3421_v55, 3  ;;  %v2334_v44 = vmul.f32 0.79794323, %v6076_v16  ;;  %v2335_v3 = vmul.f32 0.79794323, %v5985_v40 }
 0x306   : > { %v3482_v42 = vadd.f32 %v3450_v0, %v3402_v53  ;;  %v3483_v36 = vadd.f32 %v3451_v7, %v3403_v12  ;;  %v2348_v63 = vmul.f32 0.19896892, %v6024_v32  ;;  %v2349_v4 = vmul.f32 0.19896892, %v6049_v24 }
 0x307   : > { %v3484_v41 = vadd.f32 %v3452_v14, %v3404_v26  ;;  %v3485_v31 = vadd.f32 %v3453_v30, %v3405_v49  ;;  %v2350_v23 = vmul.f32 0.19896892, %v6076_v16  ;;  %v2351_v62 = vmul.f32 0.19896892, %v5985_v40 }
 0x308   : > { %3499 = vst.msk [vmem:[#allocation2 + $0x20] sm:$0x8] %vm3490_vm7, %v3482_v42  ;;  %v2428_v10 = vmul.f32 0.0030847848, %v6024_v32  ;;  %3500 = vst.msk [vmem:[#allocation2 + $0x24] sm:$0x8] %vm3490_vm7, %v3483_v36 }
 0x309   : > { %3501 = vst.msk [vmem:[#allocation2 + $0x28] sm:$0x8] %vm3490_vm7, %v3484_v41  ;;  %v2380_v54 = vrot.slane %v2348_v63, 1  ;;  %v2381_v48 = vrot.slane %v2349_v4, 1  ;;  %v2429_v21 = vmul.f32 0.0030847848, %v6049_v24 }
 0x30a   : > { %v2430_v47 = vmul.f32 0.0030847848, %v6076_v16  ;;  %3502 = vst.msk [vmem:[#allocation2 + $0x2c] sm:$0x8] %vm3490_vm7, %v3485_v31  ;;  %v2382_v8 = vrot.slane %v2350_v23, 1  ;;  %v2383_v27 = vrot.slane %v2351_v62, 1 }
 0x30b   : > { %v2431_v34 = vmul.f32 0.0030847848, %v5985_v40  ;;  %v2460_v52 = vrot.slane %v2428_v10, 2  ;;  %v2412_v61 = vadd.f32 %v2380_v54, %v2332_v60  ;;  %v2413_v57 = vadd.f32 %v2381_v48, %v2333_v28 }
 0x30c   : > { %v2461_v1 = vrot.slane %v2429_v21, 2  ;;  %v2462_v11 = vrot.slane %v2430_v47, 2  ;;  %v2414_v43 = vadd.f32 %v2382_v8, %v2334_v44  ;;  %v2415_v51 = vadd.f32 %v2383_v27, %v2335_v3 }
 0x30d   : > { %v2463_v50 = vrot.slane %v2431_v34, 2  ;;  %v2508_v2 = vmul.f32 2.973658e-06, %v6024_v32  ;;  %v2492_v22 = vadd.f32 %v2460_v52, %v2412_v61  ;;  %v2509_v17 = vmul.f32 2.973658e-06, %v6049_v24 }
 0x30e   : > { %v2493_v56 = vadd.f32 %v2461_v1, %v2413_v57  ;;  %v2510_v58 = vmul.f32 2.973658e-06, %v6076_v16  ;;  %v2494_v37 = vadd.f32 %v2462_v11, %v2414_v43  ;;  %v2511_v46 = vmul.f32 2.973658e-06, %v5985_v40 }
 0x30f   : > { %v2495_v19 = vadd.f32 %v2463_v50, %v2415_v51  ;;  %v2540_v38 = vrot.slane %v2508_v2, 3  ;;  %v2541_v35 = vrot.slane %v2509_v17, 3  ;;  %v6474_v29 = vmul.f32 0.0025662621, %v6024_v32  ;;  %v4044_v5 = vld [vmem:[#allocation2 + $0x20] sm:$0xff]  }
 0x310   : > { %v2542_v25 = vrot.slane %v2510_v58, 3  ;;  %v2543_v59 = vrot.slane %v2511_v46, 3  ;;  %v6477_v9 = vmul.f32 0.0025662621, %v6049_v24  ;;  %v6482_v53 = vmul.f32 0.0025662621, %v6076_v16 }
 0x311   : > { %v2572_v13 = vadd.f32 %v2540_v38, %v2492_v22  ;;  %v4045_v33 = vld [vmem:[#allocation2 + $0x28] sm:$0xff]   ;;  %v2573_v18 = vadd.f32 %v2541_v35, %v2493_v56  ;;  %v2845_v39 = vrot.slane %v6474_v29, 4  ;;  %v6485_v12 = vmul.f32 0.0025662621, %v5985_v40 }
 0x312   : > { %v2574_v20 = vadd.f32 %v2542_v25, %v2494_v37  ;;  %v2575_v15 = vadd.f32 %v2543_v59, %v2495_v19  ;;  %v6488_v6 = vmul.f32 0.16552415, %v6024_v32  ;;  %v3557_v45 = vpack.c.bf16 %v4045_v33, %v4044_v5 }
 0x313   : > { %2589 = vst.msk [vmem:[#allocation2 + $0x30] sm:$0x1] %vm2576_vm5, %v2572_v13  ;;  %2590 = vst.msk [vmem:[#allocation2 + $0x34] sm:$0x1] %vm2576_vm5, %v2573_v18  ;;  %v6493_v26 = vmul.f32 0.16552415, %v6049_v24 }
 0x314   : > { %2591 = vst.msk [vmem:[#allocation2 + $0x38] sm:$0x1] %vm2576_vm5, %v2574_v20  ;;  %v6496_v49 = vmul.f32 0.16552415, %v6076_v16  ;;  %v6499_v55 = vmul.f32 0.16552415, %v5985_v40  ;;  %3959 = vmatprep.mubr.msk.bf16.mxu1 %vm323_vm0, %v3557_v45 }
 0x315   : > { %2592 = vst.msk [vmem:[#allocation2 + $0x3c] sm:$0x1] %vm2576_vm5, %v2575_v15  ;;  %v2653_v0 = vrot.slane %v6488_v6, 1  ;;  %v6504_v7 = vmul.f32 0.66381663, %v6024_v32  ;;  %v2781_v60 = vrot.slane %v6488_v6, 3 }
 0x316   : > { %v6507_v14 = vmul.f32 0.66381663, %v6049_v24  ;;  %v2654_v28 = vrot.slane %v6493_v26, 1  ;;  %v2655_v30 = vrot.slane %v6496_v49, 1  ;;  %v2656_v42 = vrot.slane %v6499_v55, 1 }
 0x317   : > { %v6515_v44 = vmul.f32 0.66381663, %v6076_v16  ;;  %v2685_v3 = vadd.f32 %v2653_v0, %v6474_v29  ;;  %v6519_v36 = vmul.f32 0.66381663, %v5985_v40  ;;  %v2733_v41 = vrot.slane %v6504_v7, 2 }
 0x318   : > { %v2734_v63 = vrot.slane %v6507_v14, 2  ;;  %v2686_v4 = vadd.f32 %v2654_v28, %v6477_v9  ;;  %v2687_v31 = vadd.f32 %v2655_v30, %v6482_v53  ;;  %v2688_v23 = vadd.f32 %v2656_v42, %v6485_v12 }
 0x319   : > { %v2735_v62 = vrot.slane %v6515_v44, 2  ;;  %v2736_v10 = vrot.slane %v6519_v36, 2  ;;  %v2765_v54 = vadd.f32 %v2733_v41, %v2685_v3  ;;  %v2782_v48 = vrot.slane %v6493_v26, 3 }
 0x31a   : > { %v2783_v21 = vrot.slane %v6496_v49, 3  ;;  %v2766_v47 = vadd.f32 %v2734_v63, %v2686_v4  ;;  %v2784_v27 = vrot.slane %v6499_v55, 3  ;;  %v2846_v34 = vrot.slane %v6477_v9, 4 }
 0x31b   : > { %v2767_v8 = vadd.f32 %v2735_v62, %v2687_v31  ;;  %v2768_v52 = vadd.f32 %v2736_v10, %v2688_v23  ;;  %v2813_v61 = vadd.f32 %v2781_v60, %v2765_v54  ;;  %v2847_v57 = vrot.slane %v6482_v53, 4 }
 0x31c   : > { %v2848_v1 = vrot.slane %v6485_v12, 4  ;;  %v2814_v11 = vadd.f32 %v2782_v48, %v2766_v47  ;;  %v2893_v51 = vmul.f32 2.4738147e-06, %v6024_v32  ;;  %v2894_v50 = vmul.f32 2.4738147e-06, %v6049_v24 }
 0x31d   : > { %v2815_v43 = vadd.f32 %v2783_v21, %v2767_v8  ;;  %v2816_v2 = vadd.f32 %v2784_v27, %v2768_v52  ;;  %v2877_v22 = vadd.f32 %v2845_v39, %v2813_v61  ;;  %v2895_v56 = vmul.f32 2.4738147e-06, %v6076_v16 }
 0x31e   : > { %v2896_v17 = vmul.f32 2.4738147e-06, %v5985_v40  ;;  %v2878_v58 = vadd.f32 %v2846_v34, %v2814_v11  ;;  %v2925_v19 = vrot.slane %v2893_v51, 5  ;;  %v2926_v46 = vrot.slane %v2894_v50, 5 }
 0x31f   : > { %v2879_v37 = vadd.f32 %v2847_v57, %v2815_v43  ;;  %v2880_v38 = vadd.f32 %v2848_v1, %v2816_v2  ;;  %v2927_v35 = vrot.slane %v2895_v56, 5  ;;  %v2989_v5 = vrot.slane %v6474_v29, 1 }
 0x320   : > { %v2928_v25 = vrot.slane %v2896_v17, 5  ;;  %v2957_v59 = vadd.f32 %v2925_v19, %v2877_v22  ;;  %v2958_v13 = vadd.f32 %v2926_v46, %v2878_v58  ;;  %v2990_v33 = vrot.slane %v6477_v9, 1 }
 0x321   : > { %v2991_v18 = vrot.slane %v6482_v53, 1  ;;  %v2959_v20 = vadd.f32 %v2927_v35, %v2879_v37  ;;  %v2992_v15 = vrot.slane %v6485_v12, 1  ;;  %v3021_v45 = vadd.f32 %v2989_v5, %v2893_v51 }
 0x322   : > { %v2960_v39 = vadd.f32 %v2928_v25, %v2880_v38  ;;  %2973 = vst.msk [vmem:[#allocation2 + $0x31] sm:$0x1] %vm2576_vm5, %v2957_v59  ;;  %2974 = vst.msk [vmem:[#allocation2 + $0x35] sm:$0x1] %vm2576_vm5, %v2958_v13  ;;  %v3022_v0 = vadd.f32 %v2990_v33, %v2894_v50  ;;  %v3037_v28 = vrot.slane %v6488_v6, 2  ;;  %v3038_v30 = vrot.slane %v6493_v26, 2 }
 0x323   : > { %v3023_v60 = vadd.f32 %v2991_v18, %v2895_v56  ;;  %2975 = vst.msk [vmem:[#allocation2 + $0x39] sm:$0x1] %vm2576_vm5, %v2959_v20  ;;  %v3024_v42 = vadd.f32 %v2992_v15, %v2896_v17  ;;  %v3039_v3 = vrot.slane %v6496_v49, 2  ;;  %v3040_v41 = vrot.slane %v6499_v55, 2 }
 0x324   : > { %2976 = vst.msk [vmem:[#allocation2 + $0x3d] sm:$0x1] %vm2576_vm5, %v2960_v39  ;;  %v3085_v63 = vrot.slane %v6504_v7, 3  ;;  %v3069_v4 = vadd.f32 %v3037_v28, %v3021_v45  ;;  %v3070_v31 = vadd.f32 %v3038_v30, %v3022_v0  ;;  %v3086_v23 = vrot.slane %v6507_v14, 3 }
 0x325   : > { %v3087_v62 = vrot.slane %v6515_v44, 3  ;;  %v3071_v10 = vadd.f32 %v3039_v3, %v3023_v60  ;;  %v3072_v54 = vadd.f32 %v3040_v41, %v3024_v42  ;;  %v3088_v48 = vrot.slane %v6519_v36, 3 }
 0x326   : > { %v3133_v21 = vrot.slane %v6488_v6, 4  ;;  %v3117_v47 = vadd.f32 %v3085_v63, %v3069_v4  ;;  %v3118_v8 = vadd.f32 %v3086_v23, %v3070_v31  ;;  %v3134_v27 = vrot.slane %v6493_v26, 4 }
 0x327   : > { %v3135_v34 = vrot.slane %v6496_v49, 4  ;;  %v3119_v52 = vadd.f32 %v3087_v62, %v3071_v10  ;;  %v3120_v7 = vadd.f32 %v3088_v48, %v3072_v54  ;;  %v3136_v61 = vrot.slane %v6499_v55, 4 }
 0x328   : > { %v3181_v14 = vrot.slane %v6474_v29, 5  ;;  %v3165_v57 = vadd.f32 %v3133_v21, %v3117_v47  ;;  %v3166_v44 = vadd.f32 %v3134_v27, %v3118_v8  ;;  %v3182_v1 = vrot.slane %v6477_v9, 5 }
 0x329   : > { %v3183_v36 = vrot.slane %v6482_v53, 5  ;;  %v3167_v11 = vadd.f32 %v3135_v34, %v3119_v52  ;;  %v3168_v6 = vadd.f32 %v3136_v61, %v3120_v7  ;;  %v3184_v43 = vrot.slane %v6485_v12, 5 }
 0x32a   : > { %v3246_v26 = vmul.f32 2.9736582e-06, %v6024_v32  ;;  %v3213_v51 = vadd.f32 %v3181_v14, %v3165_v57  ;;  %v3214_v49 = vadd.f32 %v3182_v1, %v3166_v44  ;;  %v3247_v50 = vmul.f32 2.9736582e-06, %v6049_v24 }
 0x32b   : > { %v3248_v55 = vmul.f32 2.9736582e-06, %v6076_v16  ;;  %v3215_v2 = vadd.f32 %v3183_v36, %v3167_v11  ;;  %v3216_v29 = vadd.f32 %v3184_v43, %v3168_v6  ;;  %v3249_v22 = vmul.f32 2.9736582e-06, %v5985_v40 }
 0x32c   : > { %v3262_v9 = vmul.f32 0.003084785, %v6024_v32  ;;  %3230 = vst.msk [vmem:[#allocation2 + $0x31] sm:$0x2] %vm3217_vm6, %v3213_v51  ;;  %3231 = vst.msk [vmem:[#allocation2 + $0x35] sm:$0x2] %vm3217_vm6, %v3214_v49 }
 0x32d   : > { %v3263_v53 = vmul.f32 0.003084785, %v6049_v24  ;;  %v3264_v12 = vmul.f32 0.003084785, %v6076_v16  ;;  %v3265_v56 = vmul.f32 0.003084785, %v5985_v40 }
 0x32e   : > { %3232 = vst.msk [vmem:[#allocation2 + $0x39] sm:$0x2] %vm3217_vm6, %v3215_v2  ;;  %3233 = vst.msk [vmem:[#allocation2 + $0x3d] sm:$0x2] %vm3217_vm6, %v3216_v29  ;;  %v3294_v17 = vrot.slane %v3262_v9, 1 }
 0x32f   : > { %v3342_v58 = vmul.f32 0.19896893, %v6024_v32  ;;  %v3343_v37 = vmul.f32 0.19896893, %v6049_v24  ;;  %v3295_v19 = vrot.slane %v3263_v53, 1  ;;  %v3296_v46 = vrot.slane %v3264_v12, 1 }
 0x330   : > { %v3297_v38 = vrot.slane %v3265_v56, 1  ;;  %v3344_v35 = vmul.f32 0.19896893, %v6076_v16  ;;  %v3326_v25 = vadd.f32 %v3294_v17, %v3246_v26  ;;  %v3345_v5 = vmul.f32 0.19896893, %v5985_v40 }
 0x331   : > { %v3374_v59 = vrot.slane %v3342_v58, 2  ;;  %v3375_v13 = vrot.slane %v3343_v37, 2  ;;  %v3327_v33 = vadd.f32 %v3295_v19, %v3247_v50  ;;  %v3328_v18 = vadd.f32 %v3296_v46, %v3248_v55 }
 0x332   : > { %v3329_v20 = vadd.f32 %v3297_v38, %v3249_v22  ;;  %v3376_v39 = vrot.slane %v3344_v35, 2  ;;  %v3377_v15 = vrot.slane %v3345_v5, 2  ;;  %v3422_v0 = vmul.f32 0.7979433, %v6024_v32 }
 0x333   : > { %v3406_v45 = vadd.f32 %v3374_v59, %v3326_v25  ;;  %v3423_v60 = vmul.f32 0.7979433, %v6049_v24  ;;  %v3407_v28 = vadd.f32 %v3375_v13, %v3327_v33  ;;  %v3424_v42 = vmul.f32 0.7979433, %v6076_v16 }
 0x334   : > { %v3408_v30 = vadd.f32 %v3376_v39, %v3328_v18  ;;  %v3425_v3 = vmul.f32 0.7979433, %v5985_v40  ;;  %v3409_v41 = vadd.f32 %v3377_v15, %v3329_v20  ;;  %v3454_v63 = vrot.slane %v3422_v0, 3 }
 0x335   : > { %v3455_v4 = vrot.slane %v3423_v60, 3  ;;  %v3456_v31 = vrot.slane %v3424_v42, 3 }
 0x336   : > { %v3457_v23 = vrot.slane %v3425_v3, 3  ;;  %v3486_v62 = vadd.f32 %v3454_v63, %v3406_v45 }
 0x337   : > { %v3487_v10 = vadd.f32 %v3455_v4, %v3407_v28  ;;  %v3488_v54 = vadd.f32 %v3456_v31, %v3408_v30 }
 0x338   : > { %v3489_v48 = vadd.f32 %v3457_v23, %v3409_v41  ;;  %3503 = vst.msk [vmem:[#allocation2 + $0x30] sm:$0x8] %vm3490_vm7, %v3486_v62 }
 0x339   : > { %3504 = vst.msk [vmem:[#allocation2 + $0x34] sm:$0x8] %vm3490_vm7, %v3487_v10  ;;  %3505 = vst.msk [vmem:[#allocation2 + $0x38] sm:$0x8] %vm3490_vm7, %v3488_v54 }
 0x33a   : > { %3506 = vst.msk [vmem:[#allocation2 + $0x3c] sm:$0x8] %vm3490_vm7, %v3489_v48 }
 0x340   : > { %v4046_v32 = vld [vmem:[#allocation2 + $0x30] sm:$0xff]  }
 0x341   : > { %v4047_v40 = vld [vmem:[#allocation2 + $0x38] sm:$0xff]  }
 0x342   : > { %v3558_v24 = vpack.c.bf16 %v4047_v40, %v4046_v32 }
 0x344   : > { %3960 = vmatmul.mubr.msk.bf16.gmra.mrb[32].mxu1 %vm323_vm0, %v3558_v24 }
 0x3b6   : > { %v3957_v16 = vpop.f32.mrb[28].mxu1 }
 0x3b7   : > { %v3654_v21 = vcombine.high %v3957_v16, %v3957_v16  ;;  %3673 = vst.msk [vmem:[%s6588_s20 + $0x10] sm:$0xf] %vm3668_vm8, %v3957_v16  ;;  %v3613_v47 = vpop.f32.mrb[29].mxu1 }
 0x3b8   : > { %v3652_v8 = vcombine.high %v3613_v47, %v3613_v47  ;;  %3669 = vst.msk [vmem:[%s6588_s20] sm:$0xf] %vm3668_vm8, %v3613_v47  ;;  %v3958_v27 = vpop.f32.mrb[30].mxu1 }
 0x3b9   : > { %3674 = vst.msk [vmem:[%s6588_s20 + $0x14] sm:$0xf] %vm3668_vm8, %v3654_v21  ;;  %v3655_v34 = vcombine.high %v3958_v27, %v3958_v27  ;;  %3675 = vst.msk [vmem:[%s6588_s20 + $0x18] sm:$0xf] %vm3668_vm8, %v3958_v27  ;;  %v3616_v52 = vpop.f32.mrb[31].mxu1 }
 0x3ba   : > { %3670 = vst.msk [vmem:[%s6588_s20 + $0x4] sm:$0xf] %vm3668_vm8, %v3652_v8  ;;  %v3653_v7 = vcombine.high %v3616_v52, %v3616_v52  ;;  %3671 = vst.msk [vmem:[%s6588_s20 + $0x8] sm:$0xf] %vm3668_vm8, %v3616_v52 }
 0x3bb   : > { %3676 = vst.msk [vmem:[%s6588_s20 + $0x1c] sm:$0xf] %vm3668_vm8, %v3655_v34 }
 0x3bc   : > { %3672 = vst.msk [vmem:[%s6588_s20 + $0xc] sm:$0xf] %vm3668_vm8, %v3653_v7 }
 0x417   : > { %v3961_v61 = vpop.f32.mrb[32].mxu1 }
 0x418   : > { %v3658_v14 = vcombine.high %v3961_v61, %v3961_v61  ;;  %3681 = vst.msk [vmem:[%s6588_s20 + $0x30] sm:$0xf] %vm3668_vm8, %v3961_v61  ;;  %v3629_v57 = vpop.f32.mrb[33].mxu1 }
 0x419   : > { %v3656_v44 = vcombine.high %v3629_v57, %v3629_v57  ;;  %3677 = vst.msk [vmem:[%s6588_s20 + $0x20] sm:$0xf] %vm3668_vm8, %v3629_v57  ;;  %v3962_v1 = vpop.f32.mrb[34].mxu1 }
 0x41a   : > { %3682 = vst.msk [vmem:[%s6588_s20 + $0x34] sm:$0xf] %vm3668_vm8, %v3658_v14  ;;  %v3659_v36 = vcombine.high %v3962_v1, %v3962_v1  ;;  %3683 = vst.msk [vmem:[%s6588_s20 + $0x38] sm:$0xf] %vm3668_vm8, %v3962_v1  ;;  %v3632_v11 = vpop.f32.mrb[35].mxu1 }
 0x41b   : > { %3678 = vst.msk [vmem:[%s6588_s20 + $0x24] sm:$0xf] %vm3668_vm8, %v3656_v44  ;;  %v3657_v6 = vcombine.high %v3632_v11, %v3632_v11  ;;  %3679 = vst.msk [vmem:[%s6588_s20 + $0x28] sm:$0xf] %vm3668_vm8, %v3632_v11 }
 0x41c   : > { %3684 = vst.msk [vmem:[%s6588_s20 + $0x3c] sm:$0xf] %vm3668_vm8, %v3659_v36 }
 0x41d   : > { %3680 = vst.msk [vmem:[%s6588_s20 + $0x2c] sm:$0xf] %vm3668_vm8, %v3657_v6 }
 0x41e   : > { %4147 = shalt.err (!%p4144_p2)
}
 0x41f   : > { %s4148_s7 = scalar_lea.hbm %s6619_s27, 1024  ;;  %s4152_s22 = scalar_lea.hbm %s6676_s3, 2048 }
 0x420   : > { %p4149_p13 = scmp.ne.s32.totalorder %s6619_s27, %s4148_s7  ;;  %p4153_p4 = scmp.lt.u32.totalorder %s6619_s27, %s6676_s3 }
 0x421   : > { %p4154_p5 = scmp.lt.u32.totalorder %s4152_s22, %s4148_s7  ;;  %p4156_p11 = scmp.lt.u32.totalorder %s4148_s7, %s6619_s27 }
 0x422   : > { %p4150_p6 = pnand %p4149_p13, %p7072_p0 }
 0x423   : > { %p4155_p8 = por %p4154_p5, %p4153_p4 }
 0x424   : > { %p4151_p10 = pneg %p4150_p6 }
 0x425   : > { %p4157_p1 = por %p4156_p11, %p4155_p8 }
 0x427   : > { %p4158_p3 = pnand %p4157_p1, %p4151_p10 }
 0x429   : > { %4161 = shalt.err (!%p4158_p3)
}
 0x42a   : > { %s4214_s18 = smov 64   ;;  %s4215_s20 = smov 4  }
 0x42b   : > { %3975 = dma.vmem_to_hbm [thread:$0]  (%p7072_p0), %s6621_s24, 1024, %s6619_s27, %s3686_s23, %s4214_s18, %s4214_s18, %s4215_s20  }
 0x42c PF: > { %s3714_s17 = sand.u32 1, %s4192_s12   ;;  %p7073_p7 = scmp.ne.s32.totalorder %s6764_s19, 0 }
 0x42d   : > { %p7074_p9 = scmp.ge.s32.totalorder %s4204_s15, 2  ;;  %s3715_s16 = scalar_lea.sflag [#allocation5], %s3714_s17 }
 0x42f   : > { %p3989_p12 = pnand %p7074_p9, %p7073_p7 }
 0x431   : > { %4187 = dma.done.wait (!%p3989_p12), %s3715_s16, 1024  }
 0x432   : > { %4189 = vsyncadd (!%p3989_p12), %s3715_s16, 4294966272  ;;  %p17_p2 = scmp.ge.s32.totalorder %s4346_s4, 4   ;;  %s7075_s12 = smov %s4196_s13 }
 0x433   : > { %s7076_s13 = smov %s4200_s14  ;;  %s7077_s14 = smov %s4362_s9 }
 0x434   : > { %s7078_s15 = smov %s4346_s4  ;;  %19 = sbr.rel (!%p17_p2) target bundleno = 6 (0x6), region = 85 }
 0x43b   :  { %3720 = vsyncpa [#allocation4], 1 }
 0x43c   :  { %3722 = vsyncpa [#allocation4 + $0x1], 1 }
 0x43d   :  { %3723 = vsyncpa [#allocation7], 1 }
 0x43e   :  { %3724 = vsyncpa [#allocation5], 1 }
 0x43f   :  { %3726 = vsyncpa [#allocation5 + $0x1], 1 }

</bundles_post_ra>
